<compile_context>
chip_gen: v7x
topology: tpu7x:2x2x1
jax: 0.10.0
libtpu: 0.0.40
codegen_flags: <defaults>
</compile_context>

<pallas_src>
import functools

import jax
import jax.numpy as jnp
from jax.experimental import pallas as pl
from jax.experimental.pallas import tpu as pltpu


# ----------------------------- kernel ----------------------------------------


def _layernorm(x, w, b, eps=1e-5):
    mean = jnp.mean(x, axis=-1, keepdims=True)
    var = jnp.mean(jnp.square(x - mean), axis=-1, keepdims=True)
    return (x - mean) * jax.lax.rsqrt(var + eps) * w + b


def fused_top_prior_kernel(
        h0_ref,
        wqkv_ref, bqkv_ref, wmix_ref, bmix_ref,
        n1w_ref, n1b_ref, w1_ref, b1_ref, w2_ref, b2_ref, n2w_ref, n2b_ref,
        ow1_ref, ob1_ref, ow2_ref, ob2_ref, ow3_ref, ob3_ref,
        o_ref,
        h_sc, mask_sc,
        *, num_heads, tile_batch, seq_len):
    """Grid = (batch_tile, layer).  h_sc carries the (M, D) activation across layers."""
    layer = pl.program_id(1)
    n_layers = pl.num_programs(1)
    TB, T = tile_batch, seq_len
    M, D = h_sc.shape                    # M = TB * T
    hd = D // num_heads
    scale = 1.0 / float(hd) ** 0.5

    @pl.when(layer == 0)
    def _init():
        # Load this tile's initial activation and (re)build the causal additive mask.
        h_sc[...] = h0_ref[...]
        row = jax.lax.broadcasted_iota(jnp.int32, (T, T), 0)
        col = jax.lax.broadcasted_iota(jnp.int32, (T, T), 1)
        mask_sc[...] = jnp.where(col <= row, 0.0, -1e30).astype(jnp.float32)

    x = h_sc[...]                                       # (M, D) fp32
    xb = x.astype(jnp.bfloat16)

    # qkv projection: Conv1d(depth, 3*depth, 1) == per-token linear over the M rows.
    # Weights stay resident in VMEM for the whole kernel; dynamic index selects layer.
    qkv = jnp.dot(xb, wqkv_ref[layer],
                  preferred_element_type=jnp.float32) + bqkv_ref[layer]   # (M, 3D) f32

    # Fold the attention scale into Q (fp32), cast the whole slab to bf16 ONCE.
    q_all = (qkv[:, :D] * scale).astype(jnp.bfloat16).reshape(TB, T, D)
    k_all = qkv[:, D:2 * D].astype(jnp.bfloat16).reshape(TB, T, D)
    v_all = qkv[:, 2 * D:].astype(jnp.bfloat16).reshape(TB, T, D)

    # Hoist the (T,T) -> (TB,T,T) mask broadcast out of the per-head loop.
    mask_b = jnp.broadcast_to(mask_sc[...], (TB, T, T))

    # Per-head causal attention (single-batch-dim einsums; safe Mosaic lowering).
    ctx_heads = []
    for h in range(num_heads):
        lo = h * hd
        qh = q_all[:, :, lo:lo + hd]
        kh = k_all[:, :, lo:lo + hd]
        vh = v_all[:, :, lo:lo + hd]

        logits = jnp.einsum('bqd,bkd->bqk', qh, kh,
                            preferred_element_type=jnp.float32) + mask_b
        m = jnp.max(logits, axis=-1, keepdims=True)
        p = jnp.exp(logits - m)
        denom = jnp.sum(p, axis=-1, keepdims=True)
        p = p * pl.reciprocal(denom, approx=True)        # EUP reciprocal, fp32

        ctx_heads.append(jnp.einsum('bqk,bkd->bqd', p.astype(jnp.bfloat16), vh,
                                    preferred_element_type=jnp.float32))

    # Head concat -> ONE K=D head-mix matmul (instead of num_heads K=hd matmuls).
    ctx = jnp.concatenate(ctx_heads, axis=-1).reshape(M, D)
    attn = jnp.dot(ctx.astype(jnp.bfloat16), wmix_ref[layer],
                   preferred_element_type=jnp.float32) + bmix_ref[layer]

    # Residual + LayerNorm, FFN with ReLU after BOTH 1x1 convs (matches reference),
    # then residual + LayerNorm.  All elementwise math fp32.
    h1 = _layernorm(attn + x, n1w_ref[layer], n1b_ref[layer])
    ff = jnp.maximum(
        jnp.dot(h1.astype(jnp.bfloat16), w1_ref[layer],
                preferred_element_type=jnp.float32) + b1_ref[layer], 0.0)
    ff = jnp.maximum(
        jnp.dot(ff.astype(jnp.bfloat16), w2_ref[layer],
                preferred_element_type=jnp.float32) + b2_ref[layer], 0.0)
    new_h = _layernorm(ff + h1, n2w_ref[layer], n2b_ref[layer])
    h_sc[...] = new_h

    @pl.when(layer == n_layers - 1)
    def _finalize():
        # out_stack: Conv1d(D,D,1) -> ReLU -> Conv1d(D,D,1) -> ReLU -> Conv1d(D,512,1)
        a = jnp.maximum(
            jnp.dot(new_h.astype(jnp.bfloat16), ow1_ref[...],
                    preferred_element_type=jnp.float32) + ob1_ref[...], 0.0)
        a = jnp.maximum(
            jnp.dot(a.astype(jnp.bfloat16), ow2_ref[...],
                    preferred_element_type=jnp.float32) + ob2_ref[...], 0.0)
        o_ref[...] = jnp.dot(a.astype(jnp.bfloat16), ow3_ref[...],
                             preferred_element_type=jnp.float32) + ob3_ref[...]


# ----------------------------- wrapper ----------------------------------------


def fused_top_prior(h0_flat, params, num_heads, batch, seq_len, tile_batch=1):
    BT, D = h0_flat.shape
    L = params["Wqkv"].shape[0]
    V = params["Ow3"].shape[1]
    assert batch % tile_batch == 0
    n_tiles = batch // tile_batch
    M = tile_batch * seq_len                  # rows per batch tile

    kernel = functools.partial(fused_top_prior_kernel, num_heads=num_heads,
                               tile_batch=tile_batch, seq_len=seq_len)

    def resident(arr):
        # Full-array block whose index never changes: DMA'd once, stays in VMEM.
        nd = arr.ndim
        return pl.BlockSpec(tuple(arr.shape), lambda b, l, nd=nd: (0,) * nd)

    tile_spec_in = pl.BlockSpec((M, D), lambda b, l: (b, 0))     # h0 per batch tile
    tile_spec_out = pl.BlockSpec((M, V), lambda b, l: (b, 0))    # logits per tile

    return pl.pallas_call(
        kernel,
        out_shape=jax.ShapeDtypeStruct((BT, V), jnp.float32),
        grid_spec=pltpu.PrefetchScalarGridSpec(
            num_scalar_prefetch=0,
            grid=(n_tiles, L),
            in_specs=[
                tile_spec_in,
                resident(params["Wqkv"]), resident(params["Bqkv"]),
                resident(params["Wmix"]), resident(params["Bmix"]),
                resident(params["N1w"]), resident(params["N1b"]),
                resident(params["W1"]), resident(params["B1"]),
                resident(params["W2"]), resident(params["B2"]),
                resident(params["N2w"]), resident(params["N2b"]),
                resident(params["Ow1"]), resident(params["Ob1"]),
                resident(params["Ow2"]), resident(params["Ob2"]),
                resident(params["Ow3"]), resident(params["Ob3"]),
            ],
            out_specs=tile_spec_out,
            scratch_shapes=[
                pltpu.VMEM((M, D), jnp.float32),             # resident activation
                pltpu.VMEM((seq_len, seq_len), jnp.float32),  # causal additive mask
            ],
        ),
        compiler_params=pltpu.CompilerParams(
            # batch tiles shard across cores (v7x); layer axis carries h_sc.
            dimension_semantics=("parallel", "arbitrary"),
            # Resident weight stacks + pipeline buffers exceed default scoped VMEM
            # at real sizes; 48 MiB is safe on v5e/v6e (128 MiB) and v7x (64 MiB).
            vmem_limit_bytes=48 * 1024 * 1024,
        ),
    )(h0_flat,
      params["Wqkv"], params["Bqkv"], params["Wmix"], params["Bmix"],
      params["N1w"], params["N1b"], params["W1"], params["B1"],
      params["W2"], params["B2"], params["N2w"], params["N2b"],
      params["Ow1"], params["Ob1"], params["Ow2"], params["Ob2"],
      params["Ow3"], params["Ob3"])


def top_prior_forward(tokens, params, num_heads):
    # Shift right: cat(zeros_like(x[:, :1]), x[:, :-1])  (plain-JAX glue)
    shifted = jnp.concatenate(
        [jnp.zeros_like(tokens[:, :1]), tokens[:, :-1]], axis=1)
    h = params["embed"][shifted] + params["pos_enc"]        # (B, T, D) fp32
    B, T, D = h.shape
    logits = fused_top_prior(h.reshape(B * T, D), params, num_heads, B, T,
                             tile_batch=1)
    logits = logits.reshape(B, T, -1)                       # lane-dense out of kernel
    # PyTorch returns NCT: (B, 512, T); transpose outside the kernel.
    return jnp.transpose(logits, (0, 2, 1))


# ----------------------------- parameters ------------------------------------


def init_params(key, seq_len, depth, hidden, n_layers=8, vocab=512):
    keys = iter(jax.random.split(key, 64))
    bf = jnp.bfloat16

    def w(shape, scale=0.05, dtype=jnp.float32):
        return (jax.random.normal(next(keys), shape, jnp.float32) * scale).astype(dtype)

    L, D, H, V = n_layers, depth, hidden, vocab
    return {
        "embed": w((V, D), 1.0),
        "pos_enc": w((1, seq_len, D), 1.0),
        # per-layer stacked weights (bf16 matmul operands, fp32 bias/LN params)
        "Wqkv": w((L, D, 3 * D), dtype=bf), "Bqkv": w((L, 1, 3 * D), 0.01),
        "Wmix": w((L, D, D), dtype=bf), "Bmix": w((L, 1, D), 0.01),
        "N1w": jnp.ones((L, 1, D), jnp.float32),
        "N1b": jnp.zeros((L, 1, D), jnp.float32),
        "W1": w((L, D, H), dtype=bf), "B1": w((L, 1, H), 0.01),
        "W2": w((L, H, D), dtype=bf), "B2": w((L, 1, D), 0.01),
        "N2w": jnp.ones((L, 1, D), jnp.float32),
        "N2b": jnp.zeros((L, 1, D), jnp.float32),
        # out_stack
        "Ow1": w((D, D), dtype=bf), "Ob1": w((1, D), 0.01),
        "Ow2": w((D, D), dtype=bf), "Ob2": w((1, D), 0.01),
        "Ow3": w((D, V), dtype=bf), "Ob3": w((1, V), 0.01),
    }


# ----------------------------- main -------------------------------------------


if __name__ == "__main__":
    B = 2
    SEQ_LEN = 16
    DEPTH = 256      # module default depth
    HIDDEN = 512     # small analogue of hidden=2048
    NUM_HEADS = 4
    N_LAYERS = 8
    VOCAB = 512

    key = jax.random.PRNGKey(0)
    k_tok, k_par = jax.random.split(key)
    tokens = jax.random.randint(k_tok, (B, SEQ_LEN), 0, VOCAB, dtype=jnp.int32)
    params = init_params(k_par, SEQ_LEN, DEPTH, HIDDEN, n_layers=N_LAYERS, vocab=VOCAB)

    fwd = jax.jit(functools.partial(top_prior_forward, num_heads=NUM_HEADS))
    out = fwd(tokens, params)
    jax.block_until_ready(out)
    assert out.shape == (B, VOCAB, SEQ_LEN), out.shape
    assert bool(jnp.all(jnp.isfinite(out)))
    print("KERNEL_OK")
</pallas_src>

<mosaic_0001>
module attributes {stable_mosaic.version = 11 : i64} {
  func.func @fused_top_prior_kernel(%arg0: i32, %arg1: i32, %arg2: memref<16x256xf32, #tpu.memory_space<vmem>>, %arg3: memref<8x256x768xbf16, #tpu.memory_space<vmem>>, %arg4: memref<8x1x768xf32, #tpu.memory_space<vmem>>, %arg5: memref<8x256x256xbf16, #tpu.memory_space<vmem>>, %arg6: memref<8x1x256xf32, #tpu.memory_space<vmem>>, %arg7: memref<8x1x256xf32, #tpu.memory_space<vmem>>, %arg8: memref<8x1x256xf32, #tpu.memory_space<vmem>>, %arg9: memref<8x256x512xbf16, #tpu.memory_space<vmem>>, %arg10: memref<8x1x512xf32, #tpu.memory_space<vmem>>, %arg11: memref<8x512x256xbf16, #tpu.memory_space<vmem>>, %arg12: memref<8x1x256xf32, #tpu.memory_space<vmem>>, %arg13: memref<8x1x256xf32, #tpu.memory_space<vmem>>, %arg14: memref<8x1x256xf32, #tpu.memory_space<vmem>>, %arg15: memref<256x256xbf16, #tpu.memory_space<vmem>>, %arg16: memref<1x256xf32, #tpu.memory_space<vmem>>, %arg17: memref<256x256xbf16, #tpu.memory_space<vmem>>, %arg18: memref<1x256xf32, #tpu.memory_space<vmem>>, %arg19: memref<256x512xbf16, #tpu.memory_space<vmem>>, %arg20: memref<1x512xf32, #tpu.memory_space<vmem>>, %arg21: memref<16x512xf32, #tpu.memory_space<vmem>>, %arg22: memref<16x256xf32, #tpu.memory_space<vmem>>, %arg23: memref<16x16xf32, #tpu.memory_space<vmem>>) attributes {dimension_semantics = [#tpu.dimension_semantics<parallel>, #tpu.dimension_semantics<arbitrary>], iteration_bounds = array<i64: 2, 8>, scalar_prefetch = 0 : i64, scratch_operands = 2 : i64, tpu.core_type = #tpu.core_type<tc>, window_params = [{transform_indices = @transform_0, window_bounds = array<i64: 16, 256>}, {pipeline_mode = #tpu.pipeline_mode<synchronous>, transform_indices = @transform_1, window_bounds = array<i64: 8, 256, 768>}, {pipeline_mode = #tpu.pipeline_mode<synchronous>, transform_indices = @transform_2, window_bounds = array<i64: 8, 1, 768>}, {pipeline_mode = #tpu.pipeline_mode<synchronous>, transform_indices = @transform_3, window_bounds = array<i64: 8, 256, 256>}, {pipeline_mode = #tpu.pipeline_mode<synchronous>, transform_indices = @transform_4, window_bounds = array<i64: 8, 1, 256>}, {pipeline_mode = #tpu.pipeline_mode<synchronous>, transform_indices = @transform_5, window_bounds = array<i64: 8, 1, 256>}, {pipeline_mode = #tpu.pipeline_mode<synchronous>, transform_indices = @transform_6, window_bounds = array<i64: 8, 1, 256>}, {pipeline_mode = #tpu.pipeline_mode<synchronous>, transform_indices = @transform_7, window_bounds = array<i64: 8, 256, 512>}, {pipeline_mode = #tpu.pipeline_mode<synchronous>, transform_indices = @transform_8, window_bounds = array<i64: 8, 1, 512>}, {pipeline_mode = #tpu.pipeline_mode<synchronous>, transform_indices = @transform_9, window_bounds = array<i64: 8, 512, 256>}, {pipeline_mode = #tpu.pipeline_mode<synchronous>, transform_indices = @transform_10, window_bounds = array<i64: 8, 1, 256>}, {pipeline_mode = #tpu.pipeline_mode<synchronous>, transform_indices = @transform_11, window_bounds = array<i64: 8, 1, 256>}, {pipeline_mode = #tpu.pipeline_mode<synchronous>, transform_indices = @transform_12, window_bounds = array<i64: 8, 1, 256>}, {pipeline_mode = #tpu.pipeline_mode<synchronous>, transform_indices = @transform_13, window_bounds = array<i64: 256, 256>}, {pipeline_mode = #tpu.pipeline_mode<synchronous>, transform_indices = @transform_14, window_bounds = array<i64: 1, 256>}, {pipeline_mode = #tpu.pipeline_mode<synchronous>, transform_indices = @transform_15, window_bounds = array<i64: 256, 256>}, {pipeline_mode = #tpu.pipeline_mode<synchronous>, transform_indices = @transform_16, window_bounds = array<i64: 1, 256>}, {pipeline_mode = #tpu.pipeline_mode<synchronous>, transform_indices = @transform_17, window_bounds = array<i64: 256, 512>}, {pipeline_mode = #tpu.pipeline_mode<synchronous>, transform_indices = @transform_18, window_bounds = array<i64: 1, 512>}, {transform_indices = @transform_19, window_bounds = array<i64: 16, 512>}]} {
    %c0_i32 = arith.constant 0 : i32
    %0 = arith.cmpi eq, %arg1, %c0_i32 : i32
    %1 = arith.extui %0 : i1 to i32
    %c0_i32_0 = arith.constant 0 : i32
    %2 = arith.cmpi ne, %1, %c0_i32_0 : i32
    scf.if %2 {
      %c0_63 = arith.constant 0 : index
      %c0_64 = arith.constant 0 : index
      %193 = vector.load %arg2[%c0_63, %c0_64] : memref<16x256xf32, #tpu.memory_space<vmem>>, vector<16x256xf32>
      %c0_65 = arith.constant 0 : index
      %c0_66 = arith.constant 0 : index
      %194 = vector.load %arg22[%c0_65, %c0_66] : memref<16x256xf32, #tpu.memory_space<vmem>>, vector<16x256xf32>
      tpu.vector_store %arg22[%c0_65, %c0_66], %193 {strides = array<i32>} : memref<16x256xf32, #tpu.memory_space<vmem>>, vector<16x256xf32>,
      %195 = tpu.iota {dimensions = array<i32: 0>} : vector<16x16xi32>
      %196 = tpu.iota {dimensions = array<i32: 1>} : vector<16x16xi32>
      %197 = arith.cmpi sle, %196, %195 : vector<16x16xi32>
      %cst_67 = arith.constant 0.000000e+00 : f32
      %cst_68 = arith.constant -1.000000e+30 : f32
      %198 = vector.broadcast %cst_67 : f32 to vector<16x16xf32>
      %199 = vector.broadcast %cst_68 : f32 to vector<16x16xf32>
      %200 = arith.select %197, %198, %199 : vector<16x16xi1>, vector<16x16xf32>
      %c0_69 = arith.constant 0 : index
      %c0_70 = arith.constant 0 : index
      %201 = vector.load %arg23[%c0_69, %c0_70] : memref<16x16xf32, #tpu.memory_space<vmem>>, vector<16x16xf32>
      tpu.vector_store %arg23[%c0_69, %c0_70], %200 {strides = array<i32>} : memref<16x16xf32, #tpu.memory_space<vmem>>, vector<16x16xf32>,
    } else {
    }
    %c0 = arith.constant 0 : index
    %c0_1 = arith.constant 0 : index
    %3 = vector.load %arg22[%c0, %c0_1] : memref<16x256xf32, #tpu.memory_space<vmem>>, vector<16x256xf32>
    %4 = arith.truncf %3 : vector<16x256xf32> to vector<16x256xbf16>
    %5 = arith.index_cast %arg1 : i32 to index
    %c0_2 = arith.constant 0 : index
    %c0_3 = arith.constant 0 : index
    %6 = vector.load %arg3[%5, %c0_2, %c0_3] : memref<8x256x768xbf16, #tpu.memory_space<vmem>>, vector<1x256x768xbf16>
    %7 = vector.shape_cast %6 : vector<1x256x768xbf16> to vector<256x768xbf16>
    %cst = arith.constant dense<0.000000e+00> : vector<16x768xf32>
    %8 = tpu.matmul %4, %7, %cst {dimension_numbers = #tpu.dot_dimension_numbers<[1], [0], [0], [1], [0, 0, 1, 1], [], []>} : vector<16x256xbf16>, vector<256x768xbf16>, vector<16x768xf32> -> vector<16x768xf32>
    %9 = arith.index_cast %arg1 : i32 to index
    %c0_4 = arith.constant 0 : index
    %c0_5 = arith.constant 0 : index
    %10 = vector.load %arg4[%9, %c0_4, %c0_5] : memref<8x1x768xf32, #tpu.memory_space<vmem>>, vector<1x1x768xf32>
    %11 = vector.shape_cast %10 : vector<1x1x768xf32> to vector<1x768xf32>
    %12 = vector.broadcast %11 : vector<1x768xf32> to vector<16x768xf32>
    %13 = arith.addf %8, %12 : vector<16x768xf32>
    %14 = vector.extract_strided_slice %13 {offsets = [0, 0], sizes = [16, 256], strides = [1, 1]} : vector<16x768xf32> to vector<16x256xf32>
    %cst_6 = arith.constant 1.250000e-01 : f32
    %15 = vector.broadcast %cst_6 : f32 to vector<16x256xf32>
    %16 = arith.mulf %14, %15 : vector<16x256xf32>
    %17 = arith.truncf %16 : vector<16x256xf32> to vector<16x256xbf16>
    %18 = vector.shape_cast %17 : vector<16x256xbf16> to vector<1x16x256xbf16>
    %19 = vector.extract_strided_slice %13 {offsets = [0, 256], sizes = [16, 256], strides = [1, 1]} : vector<16x768xf32> to vector<16x256xf32>
    %20 = arith.truncf %19 : vector<16x256xf32> to vector<16x256xbf16>
    %21 = vector.shape_cast %20 : vector<16x256xbf16> to vector<1x16x256xbf16>
    %22 = vector.extract_strided_slice %13 {offsets = [0, 512], sizes = [16, 256], strides = [1, 1]} : vector<16x768xf32> to vector<16x256xf32>
    %23 = arith.truncf %22 : vector<16x256xf32> to vector<16x256xbf16>
    %24 = vector.shape_cast %23 : vector<16x256xbf16> to vector<1x16x256xbf16>
    %c0_7 = arith.constant 0 : index
    %c0_8 = arith.constant 0 : index
    %25 = vector.load %arg23[%c0_7, %c0_8] : memref<16x16xf32, #tpu.memory_space<vmem>>, vector<16x16xf32>
    %26 = vector.shape_cast %25 : vector<16x16xf32> to vector<1x16x16xf32>
    %27 = vector.extract_strided_slice %18 {offsets = [0, 0, 0], sizes = [1, 16, 64], strides = [1, 1, 1]} : vector<1x16x256xbf16> to vector<1x16x64xbf16>
    %28 = vector.extract_strided_slice %21 {offsets = [0, 0, 0], sizes = [1, 16, 64], strides = [1, 1, 1]} : vector<1x16x256xbf16> to vector<1x16x64xbf16>
    %29 = vector.extract_strided_slice %24 {offsets = [0, 0, 0], sizes = [1, 16, 64], strides = [1, 1, 1]} : vector<1x16x256xbf16> to vector<1x16x64xbf16>
    "tpu.trace_start"() <{level = 10 : i32, message = "bqd,bkd->bqk"}> : () -> ()
    %cst_9 = arith.constant dense<0.000000e+00> : vector<1x16x16xf32>
    %30 = tpu.matmul %27, %28, %cst_9 {dimension_numbers = #tpu.dot_dimension_numbers<[2], [2], [1], [1], [0, 0, 0, 1, 1, 1], [0], [0]>} : vector<1x16x64xbf16>, vector<1x16x64xbf16>, vector<1x16x16xf32> -> vector<1x16x16xf32>
    "tpu.trace_stop"() : () -> ()
    %31 = arith.addf %30, %26 : vector<1x16x16xf32>
    %cst_10 = arith.constant dense<0xFF800000> : vector<1x16xf32>
    %32 = vector.multi_reduction <maximumf>, %31, %cst_10 [2] : vector<1x16x16xf32> to vector<1x16xf32>
    %33 = vector.shape_cast %32 : vector<1x16xf32> to vector<1x16x1xf32>
    %34 = vector.broadcast %33 : vector<1x16x1xf32> to vector<1x16x16xf32>
    %35 = arith.subf %31, %34 : vector<1x16x16xf32>
    %36 = math.exp %35 : vector<1x16x16xf32>
    %cst_11 = arith.constant dense<0.000000e+00> : vector<1x16xf32>
    %37 = vector.multi_reduction <add>, %36, %cst_11 [2] : vector<1x16x16xf32> to vector<1x16xf32>
    %38 = vector.shape_cast %37 : vector<1x16xf32> to vector<1x16x1xf32>
    %39 = tpu.reciprocal %38 {approx = true} : vector<1x16x1xf32> -> vector<1x16x1xf32>
    %40 = vector.broadcast %39 : vector<1x16x1xf32> to vector<1x16x16xf32>
    %41 = arith.mulf %36, %40 : vector<1x16x16xf32>
    %42 = arith.truncf %41 : vector<1x16x16xf32> to vector<1x16x16xbf16>
    "tpu.trace_start"() <{level = 10 : i32, message = "bqk,bkd->bqd"}> : () -> ()
    %cst_12 = arith.constant dense<0.000000e+00> : vector<1x16x64xf32>
    %43 = tpu.matmul %42, %29, %cst_12 {dimension_numbers = #tpu.dot_dimension_numbers<[2], [1], [1], [2], [0, 0, 0, 1, 1, 2], [0], [0]>} : vector<1x16x16xbf16>, vector<1x16x64xbf16>, vector<1x16x64xf32> -> vector<1x16x64xf32>
    "tpu.trace_stop"() : () -> ()
    %44 = vector.extract_strided_slice %18 {offsets = [0, 0, 64], sizes = [1, 16, 64], strides = [1, 1, 1]} : vector<1x16x256xbf16> to vector<1x16x64xbf16>
    %45 = vector.extract_strided_slice %21 {offsets = [0, 0, 64], sizes = [1, 16, 64], strides = [1, 1, 1]} : vector<1x16x256xbf16> to vector<1x16x64xbf16>
    %46 = vector.extract_strided_slice %24 {offsets = [0, 0, 64], sizes = [1, 16, 64], strides = [1, 1, 1]} : vector<1x16x256xbf16> to vector<1x16x64xbf16>
    "tpu.trace_start"() <{level = 10 : i32, message = "bqd,bkd->bqk"}> : () -> ()
    %cst_13 = arith.constant dense<0.000000e+00> : vector<1x16x16xf32>
    %47 = tpu.matmul %44, %45, %cst_13 {dimension_numbers = #tpu.dot_dimension_numbers<[2], [2], [1], [1], [0, 0, 0, 1, 1, 1], [0], [0]>} : vector<1x16x64xbf16>, vector<1x16x64xbf16>, vector<1x16x16xf32> -> vector<1x16x16xf32>
    "tpu.trace_stop"() : () -> ()
    %48 = arith.addf %47, %26 : vector<1x16x16xf32>
    %cst_14 = arith.constant dense<0xFF800000> : vector<1x16xf32>
    %49 = vector.multi_reduction <maximumf>, %48, %cst_14 [2] : vector<1x16x16xf32> to vector<1x16xf32>
    %50 = vector.shape_cast %49 : vector<1x16xf32> to vector<1x16x1xf32>
    %51 = vector.broadcast %50 : vector<1x16x1xf32> to vector<1x16x16xf32>
    %52 = arith.subf %48, %51 : vector<1x16x16xf32>
    %53 = math.exp %52 : vector<1x16x16xf32>
    %cst_15 = arith.constant dense<0.000000e+00> : vector<1x16xf32>
    %54 = vector.multi_reduction <add>, %53, %cst_15 [2] : vector<1x16x16xf32> to vector<1x16xf32>
    %55 = vector.shape_cast %54 : vector<1x16xf32> to vector<1x16x1xf32>
    %56 = tpu.reciprocal %55 {approx = true} : vector<1x16x1xf32> -> vector<1x16x1xf32>
    %57 = vector.broadcast %56 : vector<1x16x1xf32> to vector<1x16x16xf32>
    %58 = arith.mulf %53, %57 : vector<1x16x16xf32>
    %59 = arith.truncf %58 : vector<1x16x16xf32> to vector<1x16x16xbf16>
    "tpu.trace_start"() <{level = 10 : i32, message = "bqk,bkd->bqd"}> : () -> ()
    %cst_16 = arith.constant dense<0.000000e+00> : vector<1x16x64xf32>
    %60 = tpu.matmul %59, %46, %cst_16 {dimension_numbers = #tpu.dot_dimension_numbers<[2], [1], [1], [2], [0, 0, 0, 1, 1, 2], [0], [0]>} : vector<1x16x16xbf16>, vector<1x16x64xbf16>, vector<1x16x64xf32> -> vector<1x16x64xf32>
    "tpu.trace_stop"() : () -> ()
    %61 = vector.extract_strided_slice %18 {offsets = [0, 0, 128], sizes = [1, 16, 64], strides = [1, 1, 1]} : vector<1x16x256xbf16> to vector<1x16x64xbf16>
    %62 = vector.extract_strided_slice %21 {offsets = [0, 0, 128], sizes = [1, 16, 64], strides = [1, 1, 1]} : vector<1x16x256xbf16> to vector<1x16x64xbf16>
    %63 = vector.extract_strided_slice %24 {offsets = [0, 0, 128], sizes = [1, 16, 64], strides = [1, 1, 1]} : vector<1x16x256xbf16> to vector<1x16x64xbf16>
    "tpu.trace_start"() <{level = 10 : i32, message = "bqd,bkd->bqk"}> : () -> ()
    %cst_17 = arith.constant dense<0.000000e+00> : vector<1x16x16xf32>
    %64 = tpu.matmul %61, %62, %cst_17 {dimension_numbers = #tpu.dot_dimension_numbers<[2], [2], [1], [1], [0, 0, 0, 1, 1, 1], [0], [0]>} : vector<1x16x64xbf16>, vector<1x16x64xbf16>, vector<1x16x16xf32> -> vector<1x16x16xf32>
    "tpu.trace_stop"() : () -> ()
    %65 = arith.addf %64, %26 : vector<1x16x16xf32>
    %cst_18 = arith.constant dense<0xFF800000> : vector<1x16xf32>
    %66 = vector.multi_reduction <maximumf>, %65, %cst_18 [2] : vector<1x16x16xf32> to vector<1x16xf32>
    %67 = vector.shape_cast %66 : vector<1x16xf32> to vector<1x16x1xf32>
    %68 = vector.broadcast %67 : vector<1x16x1xf32> to vector<1x16x16xf32>
    %69 = arith.subf %65, %68 : vector<1x16x16xf32>
    %70 = math.exp %69 : vector<1x16x16xf32>
    %cst_19 = arith.constant dense<0.000000e+00> : vector<1x16xf32>
    %71 = vector.multi_reduction <add>, %70, %cst_19 [2] : vector<1x16x16xf32> to vector<1x16xf32>
    %72 = vector.shape_cast %71 : vector<1x16xf32> to vector<1x16x1xf32>
    %73 = tpu.reciprocal %72 {approx = true} : vector<1x16x1xf32> -> vector<1x16x1xf32>
    %74 = vector.broadcast %73 : vector<1x16x1xf32> to vector<1x16x16xf32>
    %75 = arith.mulf %70, %74 : vector<1x16x16xf32>
    %76 = arith.truncf %75 : vector<1x16x16xf32> to vector<1x16x16xbf16>
    "tpu.trace_start"() <{level = 10 : i32, message = "bqk,bkd->bqd"}> : () -> ()
    %cst_20 = arith.constant dense<0.000000e+00> : vector<1x16x64xf32>
    %77 = tpu.matmul %76, %63, %cst_20 {dimension_numbers = #tpu.dot_dimension_numbers<[2], [1], [1], [2], [0, 0, 0, 1, 1, 2], [0], [0]>} : vector<1x16x16xbf16>, vector<1x16x64xbf16>, vector<1x16x64xf32> -> vector<1x16x64xf32>
    "tpu.trace_stop"() : () -> ()
    %78 = vector.extract_strided_slice %18 {offsets = [0, 0, 192], sizes = [1, 16, 64], strides = [1, 1, 1]} : vector<1x16x256xbf16> to vector<1x16x64xbf16>
    %79 = vector.extract_strided_slice %21 {offsets = [0, 0, 192], sizes = [1, 16, 64], strides = [1, 1, 1]} : vector<1x16x256xbf16> to vector<1x16x64xbf16>
    %80 = vector.extract_strided_slice %24 {offsets = [0, 0, 192], sizes = [1, 16, 64], strides = [1, 1, 1]} : vector<1x16x256xbf16> to vector<1x16x64xbf16>
    "tpu.trace_start"() <{level = 10 : i32, message = "bqd,bkd->bqk"}> : () -> ()
    %cst_21 = arith.constant dense<0.000000e+00> : vector<1x16x16xf32>
    %81 = tpu.matmul %78, %79, %cst_21 {dimension_numbers = #tpu.dot_dimension_numbers<[2], [2], [1], [1], [0, 0, 0, 1, 1, 1], [0], [0]>} : vector<1x16x64xbf16>, vector<1x16x64xbf16>, vector<1x16x16xf32> -> vector<1x16x16xf32>
    "tpu.trace_stop"() : () -> ()
    %82 = arith.addf %81, %26 : vector<1x16x16xf32>
    %cst_22 = arith.constant dense<0xFF800000> : vector<1x16xf32>
    %83 = vector.multi_reduction <maximumf>, %82, %cst_22 [2] : vector<1x16x16xf32> to vector<1x16xf32>
    %84 = vector.shape_cast %83 : vector<1x16xf32> to vector<1x16x1xf32>
    %85 = vector.broadcast %84 : vector<1x16x1xf32> to vector<1x16x16xf32>
    %86 = arith.subf %82, %85 : vector<1x16x16xf32>
    %87 = math.exp %86 : vector<1x16x16xf32>
    %cst_23 = arith.constant dense<0.000000e+00> : vector<1x16xf32>
    %88 = vector.multi_reduction <add>, %87, %cst_23 [2] : vector<1x16x16xf32> to vector<1x16xf32>
    %89 = vector.shape_cast %88 : vector<1x16xf32> to vector<1x16x1xf32>
    %90 = tpu.reciprocal %89 {approx = true} : vector<1x16x1xf32> -> vector<1x16x1xf32>
    %91 = vector.broadcast %90 : vector<1x16x1xf32> to vector<1x16x16xf32>
    %92 = arith.mulf %87, %91 : vector<1x16x16xf32>
    %93 = arith.truncf %92 : vector<1x16x16xf32> to vector<1x16x16xbf16>
    "tpu.trace_start"() <{level = 10 : i32, message = "bqk,bkd->bqd"}> : () -> ()
    %cst_24 = arith.constant dense<0.000000e+00> : vector<1x16x64xf32>
    %94 = tpu.matmul %93, %80, %cst_24 {dimension_numbers = #tpu.dot_dimension_numbers<[2], [1], [1], [2], [0, 0, 0, 1, 1, 2], [0], [0]>} : vector<1x16x16xbf16>, vector<1x16x64xbf16>, vector<1x16x64xf32> -> vector<1x16x64xf32>
    "tpu.trace_stop"() : () -> ()
    %95 = tpu.concatenate %43, %60, %77, %94 in 2 : vector<1x16x64xf32>, vector<1x16x64xf32>, vector<1x16x64xf32>, vector<1x16x64xf32> -> vector<1x16x256xf32>
    %96 = vector.shape_cast %95 : vector<1x16x256xf32> to vector<16x256xf32>
    %97 = arith.truncf %96 : vector<16x256xf32> to vector<16x256xbf16>
    %98 = arith.index_cast %arg1 : i32 to index
    %c0_25 = arith.constant 0 : index
    %c0_26 = arith.constant 0 : index
    %99 = vector.load %arg5[%98, %c0_25, %c0_26] : memref<8x256x256xbf16, #tpu.memory_space<vmem>>, vector<1x256x256xbf16>
    %100 = vector.shape_cast %99 : vector<1x256x256xbf16> to vector<256x256xbf16>
    %cst_27 = arith.constant dense<0.000000e+00> : vector<16x256xf32>
    %101 = tpu.matmul %97, %100, %cst_27 {dimension_numbers = #tpu.dot_dimension_numbers<[1], [0], [0], [1], [0, 0, 1, 1], [], []>} : vector<16x256xbf16>, vector<256x256xbf16>, vector<16x256xf32> -> vector<16x256xf32>
    %102 = arith.index_cast %arg1 : i32 to index
    %c0_28 = arith.constant 0 : index
    %c0_29 = arith.constant 0 : index
    %103 = vector.load %arg6[%102, %c0_28, %c0_29] : memref<8x1x256xf32, #tpu.memory_space<vmem>>, vector<1x1x256xf32>
    %104 = vector.shape_cast %103 : vector<1x1x256xf32> to vector<1x256xf32>
    %105 = vector.broadcast %104 : vector<1x256xf32> to vector<16x256xf32>
    %106 = arith.addf %101, %105 : vector<16x256xf32>
    %107 = arith.addf %106, %3 : vector<16x256xf32>
    %108 = arith.index_cast %arg1 : i32 to index
    %c0_30 = arith.constant 0 : index
    %c0_31 = arith.constant 0 : index
    %109 = vector.load %arg7[%108, %c0_30, %c0_31] : memref<8x1x256xf32, #tpu.memory_space<vmem>>, vector<1x1x256xf32>
    %110 = vector.shape_cast %109 : vector<1x1x256xf32> to vector<1x256xf32>
    %111 = arith.index_cast %arg1 : i32 to index
    %c0_32 = arith.constant 0 : index
    %c0_33 = arith.constant 0 : index
    %112 = vector.load %arg8[%111, %c0_32, %c0_33] : memref<8x1x256xf32, #tpu.memory_space<vmem>>, vector<1x1x256xf32>
    %113 = vector.shape_cast %112 : vector<1x1x256xf32> to vector<1x256xf32>
    %cst_34 = arith.constant dense<0.000000e+00> : vector<16xf32>
    %114 = vector.multi_reduction <add>, %107, %cst_34 [1] : vector<16x256xf32> to vector<16xf32>
    %115 = vector.shape_cast %114 : vector<16xf32> to vector<16x1xf32>
    %cst_35 = arith.constant 2.560000e+02 : f32
    %116 = vector.broadcast %cst_35 : f32 to vector<16x1xf32>
    %117 = arith.divf %115, %116 : vector<16x1xf32>
    %118 = vector.broadcast %117 : vector<16x1xf32> to vector<16x256xf32>
    %119 = arith.subf %107, %118 : vector<16x256xf32>
    %120 = arith.mulf %119, %119 : vector<16x256xf32>
    %cst_36 = arith.constant dense<0.000000e+00> : vector<16xf32>
    %121 = vector.multi_reduction <add>, %120, %cst_36 [1] : vector<16x256xf32> to vector<16xf32>
    %122 = vector.shape_cast %121 : vector<16xf32> to vector<16x1xf32>
    %cst_37 = arith.constant 2.560000e+02 : f32
    %123 = vector.broadcast %cst_37 : f32 to vector<16x1xf32>
    %124 = arith.divf %122, %123 : vector<16x1xf32>
    %125 = vector.broadcast %117 : vector<16x1xf32> to vector<16x256xf32>
    %126 = arith.subf %107, %125 : vector<16x256xf32>
    %cst_38 = arith.constant 9.99999974E-6 : f32
    %127 = vector.broadcast %cst_38 : f32 to vector<16x1xf32>
    %128 = arith.addf %124, %127 : vector<16x1xf32>
    %129 = math.rsqrt %128 : vector<16x1xf32>
    %130 = vector.broadcast %129 : vector<16x1xf32> to vector<16x256xf32>
    %131 = arith.mulf %126, %130 : vector<16x256xf32>
    %132 = vector.broadcast %110 : vector<1x256xf32> to vector<16x256xf32>
    %133 = arith.mulf %131, %132 : vector<16x256xf32>
    %134 = vector.broadcast %113 : vector<1x256xf32> to vector<16x256xf32>
    %135 = arith.addf %133, %134 : vector<16x256xf32>
    %136 = arith.truncf %135 : vector<16x256xf32> to vector<16x256xbf16>
    %137 = arith.index_cast %arg1 : i32 to index
    %c0_39 = arith.constant 0 : index
    %c0_40 = arith.constant 0 : index
    %138 = vector.load %arg9[%137, %c0_39, %c0_40] : memref<8x256x512xbf16, #tpu.memory_space<vmem>>, vector<1x256x512xbf16>
    %139 = vector.shape_cast %138 : vector<1x256x512xbf16> to vector<256x512xbf16>
    %cst_41 = arith.constant dense<0.000000e+00> : vector<16x512xf32>
    %140 = tpu.matmul %136, %139, %cst_41 {dimension_numbers = #tpu.dot_dimension_numbers<[1], [0], [0], [1], [0, 0, 1, 1], [], []>} : vector<16x256xbf16>, vector<256x512xbf16>, vector<16x512xf32> -> vector<16x512xf32>
    %141 = arith.index_cast %arg1 : i32 to index
    %c0_42 = arith.constant 0 : index
    %c0_43 = arith.constant 0 : index
    %142 = vector.load %arg10[%141, %c0_42, %c0_43] : memref<8x1x512xf32, #tpu.memory_space<vmem>>, vector<1x1x512xf32>
    %143 = vector.shape_cast %142 : vector<1x1x512xf32> to vector<1x512xf32>
    %144 = vector.broadcast %143 : vector<1x512xf32> to vector<16x512xf32>
    %145 = arith.addf %140, %144 : vector<16x512xf32>
    %cst_44 = arith.constant 0.000000e+00 : f32
    %146 = vector.broadcast %cst_44 : f32 to vector<16x512xf32>
    %147 = arith.maximumf %145, %146 : vector<16x512xf32>
    %148 = arith.truncf %147 : vector<16x512xf32> to vector<16x512xbf16>
    %149 = arith.index_cast %arg1 : i32 to index
    %c0_45 = arith.constant 0 : index
    %c0_46 = arith.constant 0 : index
    %150 = vector.load %arg11[%149, %c0_45, %c0_46] : memref<8x512x256xbf16, #tpu.memory_space<vmem>>, vector<1x512x256xbf16>
    %151 = vector.shape_cast %150 : vector<1x512x256xbf16> to vector<512x256xbf16>
    %cst_47 = arith.constant dense<0.000000e+00> : vector<16x256xf32>
    %152 = tpu.matmul %148, %151, %cst_47 {dimension_numbers = #tpu.dot_dimension_numbers<[1], [0], [0], [1], [0, 0, 1, 1], [], []>} : vector<16x512xbf16>, vector<512x256xbf16>, vector<16x256xf32> -> vector<16x256xf32>
    %153 = arith.index_cast %arg1 : i32 to index
    %c0_48 = arith.constant 0 : index
    %c0_49 = arith.constant 0 : index
    %154 = vector.load %arg12[%153, %c0_48, %c0_49] : memref<8x1x256xf32, #tpu.memory_space<vmem>>, vector<1x1x256xf32>
    %155 = vector.shape_cast %154 : vector<1x1x256xf32> to vector<1x256xf32>
    %156 = vector.broadcast %155 : vector<1x256xf32> to vector<16x256xf32>
    %157 = arith.addf %152, %156 : vector<16x256xf32>
    %cst_50 = arith.constant 0.000000e+00 : f32
    %158 = vector.broadcast %cst_50 : f32 to vector<16x256xf32>
    %159 = arith.maximumf %157, %158 : vector<16x256xf32>
    %160 = arith.addf %159, %135 : vector<16x256xf32>
    %161 = arith.index_cast %arg1 : i32 to index
    %c0_51 = arith.constant 0 : index
    %c0_52 = arith.constant 0 : index
    %162 = vector.load %arg13[%161, %c0_51, %c0_52] : memref<8x1x256xf32, #tpu.memory_space<vmem>>, vector<1x1x256xf32>
    %163 = vector.shape_cast %162 : vector<1x1x256xf32> to vector<1x256xf32>
    %164 = arith.index_cast %arg1 : i32 to index
    %c0_53 = arith.constant 0 : index
    %c0_54 = arith.constant 0 : index
    %165 = vector.load %arg14[%164, %c0_53, %c0_54] : memref<8x1x256xf32, #tpu.memory_space<vmem>>, vector<1x1x256xf32>
    %166 = vector.shape_cast %165 : vector<1x1x256xf32> to vector<1x256xf32>
    %cst_55 = arith.constant dense<0.000000e+00> : vector<16xf32>
    %167 = vector.multi_reduction <add>, %160, %cst_55 [1] : vector<16x256xf32> to vector<16xf32>
    %168 = vector.shape_cast %167 : vector<16xf32> to vector<16x1xf32>
    %cst_56 = arith.constant 2.560000e+02 : f32
    %169 = vector.broadcast %cst_56 : f32 to vector<16x1xf32>
    %170 = arith.divf %168, %169 : vector<16x1xf32>
    %171 = vector.broadcast %170 : vector<16x1xf32> to vector<16x256xf32>
    %172 = arith.subf %160, %171 : vector<16x256xf32>
    %173 = arith.mulf %172, %172 : vector<16x256xf32>
    %cst_57 = arith.constant dense<0.000000e+00> : vector<16xf32>
    %174 = vector.multi_reduction <add>, %173, %cst_57 [1] : vector<16x256xf32> to vector<16xf32>
    %175 = vector.shape_cast %174 : vector<16xf32> to vector<16x1xf32>
    %cst_58 = arith.constant 2.560000e+02 : f32
    %176 = vector.broadcast %cst_58 : f32 to vector<16x1xf32>
    %177 = arith.divf %175, %176 : vector<16x1xf32>
    %178 = vector.broadcast %170 : vector<16x1xf32> to vector<16x256xf32>
    %179 = arith.subf %160, %178 : vector<16x256xf32>
    %cst_59 = arith.constant 9.99999974E-6 : f32
    %180 = vector.broadcast %cst_59 : f32 to vector<16x1xf32>
    %181 = arith.addf %177, %180 : vector<16x1xf32>
    %182 = math.rsqrt %181 : vector<16x1xf32>
    %183 = vector.broadcast %182 : vector<16x1xf32> to vector<16x256xf32>
    %184 = arith.mulf %179, %183 : vector<16x256xf32>
    %185 = vector.broadcast %163 : vector<1x256xf32> to vector<16x256xf32>
    %186 = arith.mulf %184, %185 : vector<16x256xf32>
    %187 = vector.broadcast %166 : vector<1x256xf32> to vector<16x256xf32>
    %188 = arith.addf %186, %187 : vector<16x256xf32>
    %c0_60 = arith.constant 0 : index
    %c0_61 = arith.constant 0 : index
    %189 = vector.load %arg22[%c0_60, %c0_61] : memref<16x256xf32, #tpu.memory_space<vmem>>, vector<16x256xf32>
    tpu.vector_store %arg22[%c0_60, %c0_61], %188 {strides = array<i32>} : memref<16x256xf32, #tpu.memory_space<vmem>>, vector<16x256xf32>,
    %c7_i32 = arith.constant 7 : i32
    %190 = arith.cmpi eq, %arg1, %c7_i32 : i32
    %191 = arith.extui %190 : i1 to i32
    %c0_i32_62 = arith.constant 0 : i32
    %192 = arith.cmpi ne, %191, %c0_i32_62 : i32
    scf.if %192 {
      %193 = arith.truncf %188 : vector<16x256xf32> to vector<16x256xbf16>
      %c0_63 = arith.constant 0 : index
      %c0_64 = arith.constant 0 : index
      %194 = vector.load %arg15[%c0_63, %c0_64] : memref<256x256xbf16, #tpu.memory_space<vmem>>, vector<256x256xbf16>
      %cst_65 = arith.constant dense<0.000000e+00> : vector<16x256xf32>
      %195 = tpu.matmul %193, %194, %cst_65 {dimension_numbers = #tpu.dot_dimension_numbers<[1], [0], [0], [1], [0, 0, 1, 1], [], []>} : vector<16x256xbf16>, vector<256x256xbf16>, vector<16x256xf32> -> vector<16x256xf32>
      %c0_66 = arith.constant 0 : index
      %c0_67 = arith.constant 0 : index
      %196 = vector.load %arg16[%c0_66, %c0_67] : memref<1x256xf32, #tpu.memory_space<vmem>>, vector<1x256xf32>
      %197 = vector.broadcast %196 : vector<1x256xf32> to vector<16x256xf32>
      %198 = arith.addf %195, %197 : vector<16x256xf32>
      %cst_68 = arith.constant 0.000000e+00 : f32
      %199 = vector.broadcast %cst_68 : f32 to vector<16x256xf32>
      %200 = arith.maximumf %198, %199 : vector<16x256xf32>
      %201 = arith.truncf %200 : vector<16x256xf32> to vector<16x256xbf16>
      %c0_69 = arith.constant 0 : index
      %c0_70 = arith.constant 0 : index
      %202 = vector.load %arg17[%c0_69, %c0_70] : memref<256x256xbf16, #tpu.memory_space<vmem>>, vector<256x256xbf16>
      %cst_71 = arith.constant dense<0.000000e+00> : vector<16x256xf32>
      %203 = tpu.matmul %201, %202, %cst_71 {dimension_numbers = #tpu.dot_dimension_numbers<[1], [0], [0], [1], [0, 0, 1, 1], [], []>} : vector<16x256xbf16>, vector<256x256xbf16>, vector<16x256xf32> -> vector<16x256xf32>
      %c0_72 = arith.constant 0 : index
      %c0_73 = arith.constant 0 : index
      %204 = vector.load %arg18[%c0_72, %c0_73] : memref<1x256xf32, #tpu.memory_space<vmem>>, vector<1x256xf32>
      %205 = vector.broadcast %204 : vector<1x256xf32> to vector<16x256xf32>
      %206 = arith.addf %203, %205 : vector<16x256xf32>
      %cst_74 = arith.constant 0.000000e+00 : f32
      %207 = vector.broadcast %cst_74 : f32 to vector<16x256xf32>
      %208 = arith.maximumf %206, %207 : vector<16x256xf32>
      %209 = arith.truncf %208 : vector<16x256xf32> to vector<16x256xbf16>
      %c0_75 = arith.constant 0 : index
      %c0_76 = arith.constant 0 : index
      %210 = vector.load %arg19[%c0_75, %c0_76] : memref<256x512xbf16, #tpu.memory_space<vmem>>, vector<256x512xbf16>
      %cst_77 = arith.constant dense<0.000000e+00> : vector<16x512xf32>
      %211 = tpu.matmul %209, %210, %cst_77 {dimension_numbers = #tpu.dot_dimension_numbers<[1], [0], [0], [1], [0, 0, 1, 1], [], []>} : vector<16x256xbf16>, vector<256x512xbf16>, vector<16x512xf32> -> vector<16x512xf32>
      %c0_78 = arith.constant 0 : index
      %c0_79 = arith.constant 0 : index
      %212 = vector.load %arg20[%c0_78, %c0_79] : memref<1x512xf32, #tpu.memory_space<vmem>>, vector<1x512xf32>
      %213 = vector.broadcast %212 : vector<1x512xf32> to vector<16x512xf32>
      %214 = arith.addf %211, %213 : vector<16x512xf32>
      %c0_80 = arith.constant 0 : index
      %c0_81 = arith.constant 0 : index
      %215 = vector.load %arg21[%c0_80, %c0_81] : memref<16x512xf32, #tpu.memory_space<vmem>>, vector<16x512xf32>
      tpu.vector_store %arg21[%c0_80, %c0_81], %214 {strides = array<i32>} : memref<16x512xf32, #tpu.memory_space<vmem>>, vector<16x512xf32>,
    } else {
    }
    return
  }
  func.func @transform_0(%arg0: i32, %arg1: i32) -> (i32, i32) {
    %c0_i32 = arith.constant 0 : i32
    %c0_i32_0 = arith.constant 0 : i32
    return %arg0, %c0_i32 : i32, i32
  }
  func.func @transform_1(%arg0: i32, %arg1: i32) -> (i32, i32, i32) {
    %c0_i32 = arith.constant 0 : i32
    %c0_i32_0 = arith.constant 0 : i32
    %c0_i32_1 = arith.constant 0 : i32
    %c0_i32_2 = arith.constant 0 : i32
    return %c0_i32, %c0_i32_0, %c0_i32_1 : i32, i32, i32
  }
  func.func @transform_2(%arg0: i32, %arg1: i32) -> (i32, i32, i32) {
    %c0_i32 = arith.constant 0 : i32
    %c0_i32_0 = arith.constant 0 : i32
    %c0_i32_1 = arith.constant 0 : i32
    %c0_i32_2 = arith.constant 0 : i32
    return %c0_i32, %c0_i32_0, %c0_i32_1 : i32, i32, i32
  }
  func.func @transform_3(%arg0: i32, %arg1: i32) -> (i32, i32, i32) {
    %c0_i32 = arith.constant 0 : i32
    %c0_i32_0 = arith.constant 0 : i32
    %c0_i32_1 = arith.constant 0 : i32
    %c0_i32_2 = arith.constant 0 : i32
    return %c0_i32, %c0_i32_0, %c0_i32_1 : i32, i32, i32
  }
  func.func @transform_4(%arg0: i32, %arg1: i32) -> (i32, i32, i32) {
    %c0_i32 = arith.constant 0 : i32
    %c0_i32_0 = arith.constant 0 : i32
    %c0_i32_1 = arith.constant 0 : i32
    %c0_i32_2 = arith.constant 0 : i32
    return %c0_i32, %c0_i32_0, %c0_i32_1 : i32, i32, i32
  }
  func.func @transform_5(%arg0: i32, %arg1: i32) -> (i32, i32, i32) {
    %c0_i32 = arith.constant 0 : i32
    %c0_i32_0 = arith.constant 0 : i32
    %c0_i32_1 = arith.constant 0 : i32
    %c0_i32_2 = arith.constant 0 : i32
    return %c0_i32, %c0_i32_0, %c0_i32_1 : i32, i32, i32
  }
  func.func @transform_6(%arg0: i32, %arg1: i32) -> (i32, i32, i32) {
    %c0_i32 = arith.constant 0 : i32
    %c0_i32_0 = arith.constant 0 : i32
    %c0_i32_1 = arith.constant 0 : i32
    %c0_i32_2 = arith.constant 0 : i32
    return %c0_i32, %c0_i32_0, %c0_i32_1 : i32, i32, i32
  }
  func.func @transform_7(%arg0: i32, %arg1: i32) -> (i32, i32, i32) {
    %c0_i32 = arith.constant 0 : i32
    %c0_i32_0 = arith.constant 0 : i32
    %c0_i32_1 = arith.constant 0 : i32
    %c0_i32_2 = arith.constant 0 : i32
    return %c0_i32, %c0_i32_0, %c0_i32_1 : i32, i32, i32
  }
  func.func @transform_8(%arg0: i32, %arg1: i32) -> (i32, i32, i32) {
    %c0_i32 = arith.constant 0 : i32
    %c0_i32_0 = arith.constant 0 : i32
    %c0_i32_1 = arith.constant 0 : i32
    %c0_i32_2 = arith.constant 0 : i32
    return %c0_i32, %c0_i32_0, %c0_i32_1 : i32, i32, i32
  }
  func.func @transform_9(%arg0: i32, %arg1: i32) -> (i32, i32, i32) {
    %c0_i32 = arith.constant 0 : i32
    %c0_i32_0 = arith.constant 0 : i32
    %c0_i32_1 = arith.constant 0 : i32
    %c0_i32_2 = arith.constant 0 : i32
    return %c0_i32, %c0_i32_0, %c0_i32_1 : i32, i32, i32
  }
  func.func @transform_10(%arg0: i32, %arg1: i32) -> (i32, i32, i32) {
    %c0_i32 = arith.constant 0 : i32
    %c0_i32_0 = arith.constant 0 : i32
    %c0_i32_1 = arith.constant 0 : i32
    %c0_i32_2 = arith.constant 0 : i32
    return %c0_i32, %c0_i32_0, %c0_i32_1 : i32, i32, i32
  }
  func.func @transform_11(%arg0: i32, %arg1: i32) -> (i32, i32, i32) {
    %c0_i32 = arith.constant 0 : i32
    %c0_i32_0 = arith.constant 0 : i32
    %c0_i32_1 = arith.constant 0 : i32
    %c0_i32_2 = arith.constant 0 : i32
    return %c0_i32, %c0_i32_0, %c0_i32_1 : i32, i32, i32
  }
  func.func @transform_12(%arg0: i32, %arg1: i32) -> (i32, i32, i32) {
    %c0_i32 = arith.constant 0 : i32
    %c0_i32_0 = arith.constant 0 : i32
    %c0_i32_1 = arith.constant 0 : i32
    %c0_i32_2 = arith.constant 0 : i32
    return %c0_i32, %c0_i32_0, %c0_i32_1 : i32, i32, i32
  }
  func.func @transform_13(%arg0: i32, %arg1: i32) -> (i32, i32) {
    %c0_i32 = arith.constant 0 : i32
    %c0_i32_0 = arith.constant 0 : i32
    %c0_i32_1 = arith.constant 0 : i32
    return %c0_i32, %c0_i32_0 : i32, i32
  }
  func.func @transform_14(%arg0: i32, %arg1: i32) -> (i32, i32) {
    %c0_i32 = arith.constant 0 : i32
    %c0_i32_0 = arith.constant 0 : i32
    %c0_i32_1 = arith.constant 0 : i32
    return %c0_i32, %c0_i32_0 : i32, i32
  }
  func.func @transform_15(%arg0: i32, %arg1: i32) -> (i32, i32) {
    %c0_i32 = arith.constant 0 : i32
    %c0_i32_0 = arith.constant 0 : i32
    %c0_i32_1 = arith.constant 0 : i32
    return %c0_i32, %c0_i32_0 : i32, i32
  }
  func.func @transform_16(%arg0: i32, %arg1: i32) -> (i32, i32) {
    %c0_i32 = arith.constant 0 : i32
    %c0_i32_0 = arith.constant 0 : i32
    %c0_i32_1 = arith.constant 0 : i32
    return %c0_i32, %c0_i32_0 : i32, i32
  }
  func.func @transform_17(%arg0: i32, %arg1: i32) -> (i32, i32) {
    %c0_i32 = arith.constant 0 : i32
    %c0_i32_0 = arith.constant 0 : i32
    %c0_i32_1 = arith.constant 0 : i32
    return %c0_i32, %c0_i32_0 : i32, i32
  }
  func.func @transform_18(%arg0: i32, %arg1: i32) -> (i32, i32) {
    %c0_i32 = arith.constant 0 : i32
    %c0_i32_0 = arith.constant 0 : i32
    %c0_i32_1 = arith.constant 0 : i32
    return %c0_i32, %c0_i32_0 : i32, i32
  }
  func.func @transform_19(%arg0: i32, %arg1: i32) -> (i32, i32) {
    %c0_i32 = arith.constant 0 : i32
    %c0_i32_0 = arith.constant 0 : i32
    return %arg0, %c0_i32 : i32, i32
  }
}

</mosaic_0001>

<bundles_post_ra>
// kernel: top_prior_forward.1
= control target key start
LH: loop header
LB: loop body
LE: loop exit
PB: predicated region body
PF: predicated region fallthrough
CT: control target
= control target key end

     0   :  { %s8144_s0 = inlined_call_operand.vmem [shape: f32[32,256], index: 0, kind: input, shape index: {}]   ;;  %s8145_s1 = inlined_call_operand.hbm [shape: bf16[8,256,768], index: 1, kind: input, shape index: {}]   ;;  %s8146_s2 = inlined_call_operand.hbm [shape: f32[8,1,768], index: 2, kind: input, shape index: {}]   ;;  %s8147_s3 = inlined_call_operand.hbm [shape: bf16[8,256,256], index: 3, kind: input, shape index: {}]   ;;  %s8148_s4 = inlined_call_operand.hbm [shape: f32[8,1,256], index: 4, kind: input, shape index: {}]   ;;  %s8149_s5 = inlined_call_operand.hbm [shape: f32[8,1,256], index: 5, kind: input, shape index: {}]   ;;  %s8150_s6 = inlined_call_operand.hbm [shape: f32[8,1,256], index: 6, kind: input, shape index: {}]   ;;  %s8151_s7 = inlined_call_operand.hbm [shape: bf16[8,256,512], index: 7, kind: input, shape index: {}]   ;;  %s8152_s8 = inlined_call_operand.hbm [shape: f32[8,1,512], index: 8, kind: input, shape index: {}]   ;;  %s8153_s9 = inlined_call_operand.hbm [shape: bf16[8,512,256], index: 9, kind: input, shape index: {}]   ;;  %s8154_s10 = inlined_call_operand.hbm [shape: f32[8,1,256], index: 10, kind: input, shape index: {}]   ;;  %s8155_s11 = inlined_call_operand.hbm [shape: f32[8,1,256], index: 11, kind: input, shape index: {}]   ;;  %s8156_s12 = inlined_call_operand.hbm [shape: f32[8,1,256], index: 12, kind: input, shape index: {}]   ;;  %s8157_s13 = inlined_call_operand.hbm [shape: bf16[256,256], index: 13, kind: input, shape index: {}]   ;;  %s8158_s14 = inlined_call_operand.hbm [shape: f32[1,256], index: 14, kind: input, shape index: {}]   ;;  %s8159_s15 = inlined_call_operand.hbm [shape: bf16[256,256], index: 15, kind: input, shape index: {}]   ;;  %s8160_s16 = inlined_call_operand.hbm [shape: f32[1,256], index: 16, kind: input, shape index: {}]   ;;  %s8161_s17 = inlined_call_operand.hbm [shape: bf16[256,512], index: 17, kind: input, shape index: {}]   ;;  %s8162_s18 = inlined_call_operand.hbm [shape: f32[1,512], index: 18, kind: input, shape index: {}]   ;;  %s8163_s19 = inlined_call_operand.hbm [shape: f32[32,512], index: 19, kind: output, shape index: {}]  }
   0x1   :  { %8200 = sst [smem:[#allocation60_spill]] %s8144_s0 }
   0x2   :  { %8201 = sst [smem:[#allocation61_spill]] %s8145_s1 }
   0x3   :  { %8202 = sst [smem:[#allocation62_spill]] %s8146_s2 }
   0x4   :  { %8203 = sst [smem:[#allocation63_spill]] %s8147_s3 }
   0x5   :  { %8204 = sst [smem:[#allocation64_spill]] %s8148_s4 }
   0x6   :  { %8205 = sst [smem:[#allocation65_spill]] %s8150_s6 }
   0x7   :  { %8206 = sst [smem:[#allocation66_spill]] %s8152_s8 }
   0x8   :  { %8207 = sst [smem:[#allocation67_spill]] %s8154_s10 }
   0x9   :  { %8208 = sst [smem:[#allocation68_spill]] %s8161_s17 }
   0xa   :  { %8209 = sst [smem:[#allocation69_spill]] %s8162_s18 }
   0xb   :  { %8210 = sst [smem:[#allocation70_spill]] %s8163_s19 }
   0xc   :  { %24 = vsyncpa [#allocation5], 0 }
   0xd   :  { %25 = vsyncpa [#allocation8], 0 }
   0xe   :  { %26 = vsyncpa [#allocation11], 0 }
   0xf   :  { %27 = vsyncpa [#allocation14], 0 }
  0x10   :  { %28 = vsyncpa [#allocation17], 0 }
  0x11   :  { %29 = vsyncpa [#allocation20], 0 }
  0x12   :  { %30 = vsyncpa [#allocation23], 0 }
  0x13   :  { %31 = vsyncpa [#allocation26], 0 }
  0x14   :  { %32 = vsyncpa [#allocation29], 0 }
  0x15   :  { %33 = vsyncpa [#allocation32], 0 }
  0x16   :  { %34 = vsyncpa [#allocation6], 0 }
  0x17   :  { %36 = vsyncpa [#allocation6 + $0x1], 0  ;;  %s7062_s0 = smov 0   ;;  %s7064_s30 = smov 0  }
  0x18   :  { %s7066_s20 = smov 0   ;;  %s7068_s21 = smov 0  }
  0x19   :  { %s7070_s1 = smov 0   ;;  %s7072_s22 = smov 0  }
  0x1a   :  { %s7074_s2 = smov 0   ;;  %s7076_s23 = smov 0  }
  0x1b LB: > { %8211 = sst [smem:[#allocation45_spill]] %s6895_s0  ;;  %s4855_s24 = sadd.s32 4294967295, %s6923_s23   ;;  %s6923_s23 = sphi %s7076_s23, %s42_s23   ;;  %s6919_s2 = sphi %s7074_s2, %s8272_s2   ;;  %s6915_s22 = sphi %s7072_s22, %s8271_s22   ;;  %s6911_s1 = sphi %s7070_s1, %s8270_s1   ;;  %s6907_s21 = sphi %s7068_s21, %s8269_s21   ;;  %s6903_s20 = sphi %s7066_s20, %s8268_s20   ;;  %s6899_s30 = sphi %s7064_s30, %s8267_s30   ;;  %s6895_s0 = sphi %s7062_s0, %s8266_s0  }
  0x1c   : > { %8212 = sst [smem:[#allocation46_spill]] %s6899_s30  ;;  %s4856_s25 = sadd.s32 4294967294, %s6923_s23  }
  0x1d   : > { %8213 = sst [smem:[#allocation47_spill]] %s6903_s20  ;;  %s51_s3 = sadd.s32 1, %s6915_s22 }
  0x1e   : > { %8214 = sst [smem:[#allocation48_spill]] %s6907_s21  ;;  %s54_s26 = sadd.s32 1, %s6919_s2 }
  0x1f   : > { %8215 = sst [smem:[#allocation49_spill]] %s6911_s1  ;;  %p52_p0 = scmp.ge.s32.totalorder %s51_s3, 8 }
  0x20   : > { %8216 = sst [smem:[#allocation50_spill]] %s6915_s22  ;;  %s465_s27 = sadd.s32 1, %s6903_s20 }
  0x21   : > { %8217 = sst [smem:[#allocation51_spill]] %s6919_s2  ;;  %p475_p1 = scmp.ne.s32.totalorder %s6903_s20, %s6899_s30 }
  0x22   : > { %8218 = sst [smem:[#allocation52_spill]] %s6923_s23  ;;  %p476_p2 = scmp.eq.s32.totalorder %s4855_s24, 15 }
  0x23   : > { %s8274_s3 = smov (%p52_p0, %s51_s3), 0  ;;  %s8276_s26 = smov (!%p52_p0, %s54_s26), %s6919_s2 }
  0x24   : > { %8219 = sst [smem:[#allocation53_spill]] %s8274_s3  ;;  %p7112_p3 = por %p476_p2, %p475_p1 }
  0x25   : > { %p481_p4 = scmp.ne.s32.totalorder %s6899_s30, %s6895_s0  ;;  %p56_p5 = scmp.ge.s32.totalorder %s8276_s26, 2 }
  0x26   : > { %s8220_s28 = scalar_select %p7112_p3, 1, 0 }
  0x27   : > { %p482_p6 = scmp.eq.s32.totalorder %s4856_s25, 15  ;;  %p4857_p7 = scmp.ge.s32.totalorder %s6923_s23, 1 }
  0x28   : > { %8221 = sst [smem:[#allocation54_spill]] %s8220_s28  ;;  %p489_p8 = scmp.lt.s32.totalorder %s6923_s23, 17 }
  0x29   : > { %s8278_s26 = smov (%p56_p5, %s8276_s26), 0  ;;  %p7122_p9 = por %p482_p6, %p481_p4 }
  0x2a   : > { %8222 = sst [smem:[#allocation55_spill]] %s8278_s26  ;;  %p7126_p10 = pnand %p4857_p7, %p489_p8 }
  0x2b   : > { %s8223_s29 = scalar_select %p7122_p9, 1, 0 }
  0x2c   : > { %s8225_s22 = scalar_select %p7126_p10, 1, 0 }
  0x2d   : > { %8224 = sst [smem:[#allocation56_spill]] %s8223_s29  ;;  %s462_s3 = ssub.s32 %s6919_s2, %s8278_s26 }
  0x2e   : > { %8226 = sst [smem:[#allocation57_spill]] %s8225_s22  ;;  %p463_p11 = scmp.eq.s32.totalorder %s462_s3, 0 }
  0x2f   : > { %p5461_p12 = pneg %p7126_p10  ;;  %p7134_p13 = scmp.eq.s32.totalorder %s4855_s24, 0 }
  0x30   : > { %s7139_s0 = scalar_select %p463_p11, %s6903_s20, %s465_s27  }
  0x31   : > { %s8227_s25 = scalar_select %p7134_p13, 1, 0 }
  0x32   : > { %8229 = sst [smem:[#allocation59_spill]] %s7139_s0  ;;  %p7143_p0 = pnand %p7134_p13, %p5461_p12 }
  0x33   : > { %8228 = sst [smem:[#allocation58_spill]] %s8227_s25  ;;  %s6925_s29 = smov [#allocation7]  }
  0x34   : > { %s514_s19 = sshll.u32 %s6925_s29, 4  ;;  %s8231_s2 = sld [smem:[#allocation62_spill]]  ;;  %s515_s19 = int_to_ptr.vmem [resolvable:$true] %s514_s19 }
  0x35   : > { %p7155_p2 = pneg %p7143_p0 }
  0x3a   : > { %s8232_s28 = smov %s8231_s2  ;;  %s6285_s21 = scalar_lea.hbm %s8231_s2, 768 }
  0x3b   : > { %p6286_p1 = scmp.ne.s32.totalorder %s8232_s28, %s6285_s21  ;;  %p6292_p6 = scmp.lt.u32.totalorder %s6285_s21, %s8232_s28 }
  0x3d   : > { %p6288_p4 = pnand %p7155_p2, %p6286_p1 }
  0x3f   : > { %p6289_p5 = pneg %p6288_p4 }
  0x41   : > { %p6294_p7 = pnand %p6292_p6, %p6289_p5 }
  0x43   : > { %6297 = shalt.err (!%p6294_p7)
}
  0x44   : > { %s6298_s2 = scalar_lea.vmem %s515_s19, 768  ;;  %p6306_p9 = scmp.lt.s32.totalorder %s515_s19, %s515_s19 }
  0x45   : > { %p6299_p8 = scmp.ne.s32.totalorder %s515_s19, %s6298_s2  ;;  %p6307_p3 = scmp.lt.s32.totalorder %s6298_s2, %s6298_s2 }
  0x47   : > { %p6301_p11 = pnand %p6299_p8, %p7155_p2  ;;  %p6308_p13 = por %p6307_p3, %p6306_p9 }
  0x49   : > { %p6302_p12 = pneg %p6301_p11 }
  0x4b   : > { %p6309_p10 = pnand %p6308_p13, %p6302_p12 }
  0x4d   : > { %6312 = shalt.err (!%p6309_p10)
}
  0x4e   : > { %s6926_s1 = smov 96   ;;  %s6927_s26 = smov 6  }
  0x4f   : > { %5467 = dma.hbm_to_vmem [thread:$0]  (!%p7143_p0), %s8232_s28, 768, %s515_s19, [#allocation8], %s6926_s1, %s6926_s1, %s6927_s26  }
  0x50   : > { %s6928_s3 = smov [#allocation10]   ;;  %s8234_s4 = sld [smem:[#allocation64_spill]] }
  0x51   : > { %s540_s24 = sshll.u32 %s6928_s3, 4  ;;  %s541_s24 = int_to_ptr.vmem [resolvable:$true] %s540_s24 }
  0x56   : > { %s6313_s30 = scalar_lea.hbm %s8234_s4, 256 }
  0x57   : > { %p6314_p3 = scmp.ne.s32.totalorder %s8234_s4, %s6313_s30  ;;  %p6320_p13 = scmp.lt.u32.totalorder %s6313_s30, %s8234_s4 }
  0x59   : > { %p6316_p9 = pnand %p6314_p3, %p7155_p2 }
  0x5b   : > { %p6317_p10 = pneg %p6316_p9 }
  0x5d   : > { %p6322_p1 = pnand %p6320_p13, %p6317_p10 }
  0x5f   : > { %6325 = shalt.err (!%p6322_p1)
}
  0x60   : > { %s6326_s19 = scalar_lea.vmem %s541_s24, 256  ;;  %p6334_p7 = scmp.lt.s32.totalorder %s541_s24, %s541_s24 }
  0x61   : > { %p6327_p4 = scmp.ne.s32.totalorder %s541_s24, %s6326_s19  ;;  %p6335_p8 = scmp.lt.s32.totalorder %s6326_s19, %s6326_s19 }
  0x63   : > { %p6329_p5 = pnand %p6327_p4, %p7155_p2  ;;  %p6336_p11 = por %p6335_p8, %p6334_p7 }
  0x65   : > { %p6330_p6 = pneg %p6329_p5 }
  0x67   : > { %p6337_p12 = pnand %p6336_p11, %p6330_p6 }
  0x69   : > { %6340 = shalt.err (!%p6337_p12)
}
  0x6a   : > { %s8191_s20 = smov 32   ;;  %s8193_s25 = smov 2  }
  0x6b   : > { %5473 = dma.hbm_to_vmem [thread:$0]  (!%p7143_p0), %s8234_s4, 256, %s541_s24, [#allocation11], %s8191_s20, %s8191_s20, %s8193_s25  }
  0x6c   : > { %s6931_s22 = smov [#allocation13]   ;;  %s6932_s26 = smov [#allocation16]  }
  0x6d   : > { %s566_s1 = sshll.u32 %s6931_s22, 4  ;;  %s592_s0 = sshll.u32 %s6932_s26, 4  ;;  %s567_s1 = int_to_ptr.vmem [resolvable:$true] %s566_s1  ;;  %s593_s0 = int_to_ptr.vmem [resolvable:$true] %s592_s0 }
  0x6e   : > { %s8235_s6 = sld [smem:[#allocation65_spill]] }
  0x74   : > { %s6341_s29 = scalar_lea.hbm %s8235_s6, 256 }
  0x75   : > { %p6342_p3 = scmp.ne.s32.totalorder %s8235_s6, %s6341_s29  ;;  %p6348_p13 = scmp.lt.u32.totalorder %s6341_s29, %s8235_s6 }
  0x77   : > { %p6344_p9 = pnand %p6342_p3, %p7155_p2 }
  0x79   : > { %p6345_p10 = pneg %p6344_p9 }
  0x7b   : > { %p6350_p1 = pnand %p6348_p13, %p6345_p10 }
  0x7d   : > { %6353 = shalt.err (!%p6350_p1)
}
  0x7e   : > { %s6354_s24 = scalar_lea.vmem %s567_s1, 256  ;;  %p6362_p7 = scmp.lt.s32.totalorder %s567_s1, %s567_s1 }
  0x7f   : > { %p6355_p4 = scmp.ne.s32.totalorder %s567_s1, %s6354_s24  ;;  %p6363_p8 = scmp.lt.s32.totalorder %s6354_s24, %s6354_s24 }
  0x81   : > { %p6357_p5 = pnand %p6355_p4, %p7155_p2  ;;  %p6364_p11 = por %p6363_p8, %p6362_p7 }
  0x83   : > { %p6358_p6 = pneg %p6357_p5 }
  0x85   : > { %p6365_p12 = pnand %p6364_p11, %p6358_p6 }
  0x87   : > { %6368 = shalt.err (!%p6365_p12)
}
  0x88   : > { %5479 = dma.hbm_to_vmem [thread:$0]  (!%p7143_p0), %s8235_s6, 256, %s567_s1, [#allocation14], %s8191_s20, %s8191_s20, %s8193_s25  }
  0x89   : > { %s8236_s8 = sld [smem:[#allocation66_spill]] }
  0x8f   : > { %s6369_s22 = scalar_lea.hbm %s8236_s8, 512 }
  0x90   : > { %p6370_p3 = scmp.ne.s32.totalorder %s8236_s8, %s6369_s22  ;;  %p6376_p13 = scmp.lt.u32.totalorder %s6369_s22, %s8236_s8 }
  0x92   : > { %p6372_p9 = pnand %p6370_p3, %p7155_p2 }
  0x94   : > { %p6373_p10 = pneg %p6372_p9 }
  0x96   : > { %p6378_p1 = pnand %p6376_p13, %p6373_p10 }
  0x98   : > { %6381 = shalt.err (!%p6378_p1)
}
  0x99   : > { %s6382_s2 = scalar_lea.vmem %s593_s0, 512  ;;  %p6390_p7 = scmp.lt.s32.totalorder %s593_s0, %s593_s0 }
  0x9a   : > { %p6383_p4 = scmp.ne.s32.totalorder %s593_s0, %s6382_s2  ;;  %p6391_p8 = scmp.lt.s32.totalorder %s6382_s2, %s6382_s2 }
  0x9c   : > { %p6385_p5 = pnand %p6383_p4, %p7155_p2  ;;  %p6392_p11 = por %p6391_p8, %p6390_p7 }
  0x9e   : > { %p6386_p6 = pneg %p6385_p5 }
  0xa0   : > { %p6393_p12 = pnand %p6392_p11, %p6386_p6 }
  0xa2   : > { %6396 = shalt.err (!%p6393_p12)
}
  0xa3   : > { %s6933_s1 = smov 64   ;;  %s6934_s19 = smov 4  }
  0xa4   : > { %5485 = dma.hbm_to_vmem [thread:$0]  (!%p7143_p0), %s8236_s8, 512, %s593_s0, [#allocation17], %s6933_s1, %s6933_s1, %s6934_s19  }
  0xa5   : > { %s6935_s28 = smov [#allocation19]   ;;  %s6936_s30 = smov [#allocation22]  }
  0xa6   : > { %s618_s18 = sshll.u32 %s6935_s28, 4  ;;  %s644_s22 = sshll.u32 %s6936_s30, 4  ;;  %s619_s18 = int_to_ptr.vmem [resolvable:$true] %s618_s18  ;;  %s645_s22 = int_to_ptr.vmem [resolvable:$true] %s644_s22 }
  0xa7   : > { %s8237_s10 = sld [smem:[#allocation67_spill]] }
  0xad   : > { %s6397_s3 = scalar_lea.hbm %s8237_s10, 256 }
  0xae   : > { %p6398_p3 = scmp.ne.s32.totalorder %s8237_s10, %s6397_s3  ;;  %p6404_p13 = scmp.lt.u32.totalorder %s6397_s3, %s8237_s10 }
  0xb0   : > { %p6400_p9 = pnand %p6398_p3, %p7155_p2 }
  0xb2   : > { %p6401_p10 = pneg %p6400_p9 }
  0xb4   : > { %p6406_p1 = pnand %p6404_p13, %p6401_p10 }
  0xb6   : > { %6409 = shalt.err (!%p6406_p1)
}
  0xb7   : > { %s6410_s0 = scalar_lea.vmem %s619_s18, 256  ;;  %p6418_p7 = scmp.lt.s32.totalorder %s619_s18, %s619_s18 }
  0xb8   : > { %p6411_p4 = scmp.ne.s32.totalorder %s619_s18, %s6410_s0  ;;  %p6419_p8 = scmp.lt.s32.totalorder %s6410_s0, %s6410_s0 }
  0xba   : > { %p6413_p5 = pnand %p6411_p4, %p7155_p2  ;;  %p6420_p11 = por %p6419_p8, %p6418_p7 }
  0xbc   : > { %p6414_p6 = pneg %p6413_p5 }
  0xbe   : > { %p6421_p12 = pnand %p6420_p11, %p6414_p6 }
  0xc0   : > { %6424 = shalt.err (!%p6421_p12)
}
  0xc1   : > { %s8238_s1 = smov 2   ;;  %s8239_s19 = smov 32  }
  0xc2   : > { %5491 = dma.hbm_to_vmem [thread:$0]  (!%p7143_p0), %s8237_s10, 256, %s619_s18, [#allocation20], %s8239_s19, %s8239_s19, %s8238_s1  }
  0xc3   : > { %s6425_s28 = scalar_lea.hbm %s8156_s12, 256 }
  0xc4   : > { %p6426_p3 = scmp.ne.s32.totalorder %s8156_s12, %s6425_s28  ;;  %p6432_p13 = scmp.lt.u32.totalorder %s6425_s28, %s8156_s12 }
  0xc6   : > { %p6428_p9 = pnand %p6426_p3, %p7155_p2 }
  0xc8   : > { %p6429_p10 = pneg %p6428_p9 }
  0xca   : > { %p6434_p1 = pnand %p6432_p13, %p6429_p10 }
  0xcc   : > { %6437 = shalt.err (!%p6434_p1)
}
  0xcd   : > { %s6438_s29 = scalar_lea.vmem %s645_s22, 256  ;;  %p6446_p7 = scmp.lt.s32.totalorder %s645_s22, %s645_s22 }
  0xce   : > { %p6439_p4 = scmp.ne.s32.totalorder %s645_s22, %s6438_s29  ;;  %p6447_p8 = scmp.lt.s32.totalorder %s6438_s29, %s6438_s29 }
  0xd0   : > { %p6441_p5 = pnand %p6439_p4, %p7155_p2  ;;  %p6448_p11 = por %p6447_p8, %p6446_p7 }
  0xd2   : > { %p6442_p6 = pneg %p6441_p5 }
  0xd4   : > { %p6449_p12 = pnand %p6448_p11, %p6442_p6 }
  0xd6   : > { %6452 = shalt.err (!%p6449_p12)
}
  0xd7   : > { %5497 = dma.hbm_to_vmem [thread:$0]  (!%p7143_p0), %s8156_s12, 256, %s645_s22, [#allocation23], %s8239_s19, %s8239_s19, %s8238_s1  }
  0xd8   : > { %s6937_s0 = smov [#allocation25]   ;;  %s6938_s25 = smov [#allocation28]  }
  0xd9   : > { %s671_s20 = sshll.u32 %s6937_s0, 4  ;;  %s695_s24 = sshll.u32 %s6938_s25, 4  ;;  %s672_s20 = int_to_ptr.vmem [resolvable:$true] %s671_s20  ;;  %s696_s24 = int_to_ptr.vmem [resolvable:$true] %s695_s24 }
  0xda   : > { %s6453_s30 = scalar_lea.hbm %s8158_s14, 32 }
  0xdb   : > { %p6454_p3 = scmp.ne.s32.totalorder %s8158_s14, %s6453_s30  ;;  %p6460_p13 = scmp.lt.u32.totalorder %s6453_s30, %s8158_s14 }
  0xdd   : > { %p6456_p9 = pnand %p6454_p3, %p7155_p2 }
  0xdf   : > { %p6457_p10 = pneg %p6456_p9 }
  0xe1   : > { %p6462_p1 = pnand %p6460_p13, %p6457_p10 }
  0xe3   : > { %6465 = shalt.err (!%p6462_p1)
}
  0xe4   : > { %s6466_s22 = scalar_lea.vmem %s672_s20, 32  ;;  %p6474_p7 = scmp.lt.s32.totalorder %s672_s20, %s672_s20 }
  0xe5   : > { %p6467_p4 = scmp.ne.s32.totalorder %s672_s20, %s6466_s22  ;;  %p6475_p8 = scmp.lt.s32.totalorder %s6466_s22, %s6466_s22 }
  0xe7   : > { %p6469_p5 = pnand %p6467_p4, %p7155_p2  ;;  %p6476_p11 = por %p6475_p8, %p6474_p7 }
  0xe9   : > { %p6470_p6 = pneg %p6469_p5 }
  0xeb   : > { %p6477_p12 = pnand %p6476_p11, %p6470_p6 }
  0xed   : > { %6480 = shalt.err (!%p6477_p12)
}
  0xee   : > { %5503 = dma.hbm_to_vmem [thread:$0]  (!%p7143_p0), %s8158_s14, 32, %s672_s20, [#allocation26]  }
  0xef   : > { %s6481_s17 = scalar_lea.hbm %s8160_s16, 32 }
  0xf0   : > { %p6482_p3 = scmp.ne.s32.totalorder %s8160_s16, %s6481_s17  ;;  %p6488_p13 = scmp.lt.u32.totalorder %s6481_s17, %s8160_s16 }
  0xf2   : > { %p6484_p9 = pnand %p6482_p3, %p7155_p2 }
  0xf4   : > { %p6485_p10 = pneg %p6484_p9 }
  0xf6   : > { %p6490_p1 = pnand %p6488_p13, %p6485_p10 }
  0xf8   : > { %6493 = shalt.err (!%p6490_p1)
}
  0xf9   : > { %s6494_s3 = scalar_lea.vmem %s696_s24, 32  ;;  %p6502_p7 = scmp.lt.s32.totalorder %s696_s24, %s696_s24 }
  0xfa   : > { %p6495_p4 = scmp.ne.s32.totalorder %s696_s24, %s6494_s3  ;;  %p6503_p8 = scmp.lt.s32.totalorder %s6494_s3, %s6494_s3 }
  0xfc   : > { %p6497_p5 = pnand %p6495_p4, %p7155_p2  ;;  %p6504_p11 = por %p6503_p8, %p6502_p7 }
  0xfe   : > { %p6498_p6 = pneg %p6497_p5 }
 0x100   : > { %p6505_p12 = pnand %p6504_p11, %p6498_p6 }
 0x102   : > { %6508 = shalt.err (!%p6505_p12)
}
 0x103   : > { %5509 = dma.hbm_to_vmem [thread:$0]  (!%p7143_p0), %s8160_s16, 32, %s696_s24, [#allocation29]  }
 0x104   : > { %s6939_s22 = smov [#allocation4]   ;;  %s8240_s25 = sld [smem:[#allocation61_spill]] }
 0x105   : > { %s501_s18 = sshll.u32 %s6939_s22, 4  ;;  %s502_s18 = int_to_ptr.vmem [resolvable:$true] %s501_s18 }
 0x10a   : > { %s6509_s17 = scalar_lea.hbm %s8240_s25, 98304 }
 0x10b   : > { %p6510_p3 = scmp.ne.s32.totalorder %s8240_s25, %s6509_s17  ;;  %p6516_p13 = scmp.lt.u32.totalorder %s6509_s17, %s8240_s25 }
 0x10d   : > { %p6512_p9 = pnand %p6510_p3, %p7155_p2 }
 0x10f   : > { %p6513_p10 = pneg %p6512_p9 }
 0x111   : > { %p6518_p1 = pnand %p6516_p13, %p6513_p10 }
 0x113   : > { %6521 = shalt.err (!%p6518_p1)
}
 0x114   : > { %s6522_s24 = scalar_lea.vmem %s502_s18, 98304  ;;  %p6530_p7 = scmp.lt.s32.totalorder %s502_s18, %s502_s18 }
 0x115   : > { %p6523_p4 = scmp.ne.s32.totalorder %s502_s18, %s6522_s24  ;;  %p6531_p8 = scmp.lt.s32.totalorder %s6522_s24, %s6522_s24 }
 0x117   : > { %p6525_p5 = pnand %p6523_p4, %p7155_p2  ;;  %p6532_p11 = por %p6531_p8, %p6530_p7 }
 0x119   : > { %p6526_p6 = pneg %p6525_p5 }
 0x11b   : > { %p6533_p12 = pnand %p6532_p11, %p6526_p6 }
 0x11d   : > { %6536 = shalt.err (!%p6533_p12)
}
 0x11e   : > { %s6940_s3 = smov 384   ;;  %s6941_s20 = smov 24  }
 0x11f   : > { %5464 = dma.hbm_to_vmem [thread:$0]  (!%p7143_p0), %s8240_s25, 98304, %s502_s18, [#allocation5], %s6940_s3, %s6940_s3, %s6941_s20  }
 0x120   : > { %s6942_s2 = smov [#allocation9]   ;;  %s8241_s30 = sld [smem:[#allocation63_spill]] }
 0x121   : > { %s527_s0 = sshll.u32 %s6942_s2, 4  ;;  %s528_s0 = int_to_ptr.vmem [resolvable:$true] %s527_s0 }
 0x126   : > { %s8242_s26 = smov %s8241_s30  ;;  %s6537_s21 = scalar_lea.hbm %s8241_s30, 32768 }
 0x127   : > { %p6538_p3 = scmp.ne.s32.totalorder %s8242_s26, %s6537_s21  ;;  %p6544_p13 = scmp.lt.u32.totalorder %s6537_s21, %s8242_s26 }
 0x129   : > { %p6540_p9 = pnand %p6538_p3, %p7155_p2 }
 0x12b   : > { %p6541_p10 = pneg %p6540_p9 }
 0x12d   : > { %p6546_p1 = pnand %p6544_p13, %p6541_p10 }
 0x12f   : > { %6549 = shalt.err (!%p6546_p1)
}
 0x130   : > { %s6550_s18 = scalar_lea.vmem %s528_s0, 32768  ;;  %p6558_p7 = scmp.lt.s32.totalorder %s528_s0, %s528_s0 }
 0x131   : > { %p6551_p4 = scmp.ne.s32.totalorder %s528_s0, %s6550_s18  ;;  %p6559_p8 = scmp.lt.s32.totalorder %s6550_s18, %s6550_s18 }
 0x133   : > { %p6553_p5 = pnand %p6551_p4, %p7155_p2  ;;  %p6560_p11 = por %p6559_p8, %p6558_p7 }
 0x135   : > { %p6554_p6 = pneg %p6553_p5 }
 0x137   : > { %p6561_p12 = pnand %p6560_p11, %p6554_p6 }
 0x139   : > { %6564 = shalt.err (!%p6561_p12)
}
 0x13a   : > { %s8195_s4 = smov 128   ;;  %s8197_s3 = smov 8  }
 0x13b   : > { %5470 = dma.hbm_to_vmem [thread:$0]  (!%p7143_p0), %s8242_s26, 32768, %s528_s0, [#allocation8], %s8195_s4, %s8195_s4, %s8197_s3  }
 0x13c   : > { %s6945_s20 = smov [#allocation12]   ;;  %s6946_s22 = smov [#allocation15]  }
 0x13d   : > { %s553_s29 = sshll.u32 %s6945_s20, 4  ;;  %s579_s2 = sshll.u32 %s6946_s22, 4  ;;  %s554_s29 = int_to_ptr.vmem [resolvable:$true] %s553_s29  ;;  %s580_s2 = int_to_ptr.vmem [resolvable:$true] %s579_s2 }
 0x13e   : > { %s6565_s30 = scalar_lea.hbm %s8149_s5, 256 }
 0x13f   : > { %p6566_p3 = scmp.ne.s32.totalorder %s8149_s5, %s6565_s30  ;;  %p6572_p13 = scmp.lt.u32.totalorder %s6565_s30, %s8149_s5 }
 0x141   : > { %p6568_p9 = pnand %p6566_p3, %p7155_p2 }
 0x143   : > { %p6569_p10 = pneg %p6568_p9 }
 0x145   : > { %p6574_p1 = pnand %p6572_p13, %p6569_p10 }
 0x147   : > { %6577 = shalt.err (!%p6574_p1)
}
 0x148   : > { %s6578_s0 = scalar_lea.vmem %s554_s29, 256  ;;  %p6586_p7 = scmp.lt.s32.totalorder %s554_s29, %s554_s29 }
 0x149   : > { %p6579_p4 = scmp.ne.s32.totalorder %s554_s29, %s6578_s0  ;;  %p6587_p8 = scmp.lt.s32.totalorder %s6578_s0, %s6578_s0 }
 0x14b   : > { %p6581_p5 = pnand %p6579_p4, %p7155_p2  ;;  %p6588_p11 = por %p6587_p8, %p6586_p7 }
 0x14d   : > { %p6582_p6 = pneg %p6581_p5 }
 0x14f   : > { %p6589_p12 = pnand %p6588_p11, %p6582_p6 }
 0x151   : > { %6592 = shalt.err (!%p6589_p12)
}
 0x152   : > { %5476 = dma.hbm_to_vmem [thread:$0]  (!%p7143_p0), %s8149_s5, 256, %s554_s29, [#allocation11], %s8239_s19, %s8239_s19, %s8238_s1  }
 0x153   : > { %s6593_s22 = scalar_lea.hbm %s8151_s7, 65536 }
 0x154   : > { %p6594_p3 = scmp.ne.s32.totalorder %s8151_s7, %s6593_s22  ;;  %p6600_p13 = scmp.lt.u32.totalorder %s6593_s22, %s8151_s7 }
 0x156   : > { %p6596_p9 = pnand %p6594_p3, %p7155_p2 }
 0x158   : > { %p6597_p10 = pneg %p6596_p9 }
 0x15a   : > { %p6602_p1 = pnand %p6600_p13, %p6597_p10 }
 0x15c   : > { %6605 = shalt.err (!%p6602_p1)
}
 0x15d   : > { %s6606_s24 = scalar_lea.vmem %s580_s2, 65536  ;;  %p6614_p7 = scmp.lt.s32.totalorder %s580_s2, %s580_s2 }
 0x15e   : > { %p6607_p4 = scmp.ne.s32.totalorder %s580_s2, %s6606_s24  ;;  %p6615_p8 = scmp.lt.s32.totalorder %s6606_s24, %s6606_s24 }
 0x160   : > { %p6609_p5 = pnand %p6607_p4, %p7155_p2  ;;  %p6616_p11 = por %p6615_p8, %p6614_p7 }
 0x162   : > { %p6610_p6 = pneg %p6609_p5 }
 0x164   : > { %p6617_p12 = pnand %p6616_p11, %p6610_p6 }
 0x166   : > { %6620 = shalt.err (!%p6617_p12)
}
 0x167   : > { %s8199_s29 = smov 256   ;;  %s6948_s18 = smov 16  }
 0x168   : > { %5482 = dma.hbm_to_vmem [thread:$0]  (!%p7143_p0), %s8151_s7, 65536, %s580_s2, [#allocation14], %s8199_s29, %s8199_s29, %s6948_s18  }
 0x169   : > { %s6949_s6 = smov [#allocation18]   ;;  %s6950_s20 = smov [#allocation21]  }
 0x16a   : > { %s605_s8 = sshll.u32 %s6949_s6, 4  ;;  %s631_s22 = sshll.u32 %s6950_s20, 4  ;;  %s606_s8 = int_to_ptr.vmem [resolvable:$true] %s605_s8  ;;  %s632_s22 = int_to_ptr.vmem [resolvable:$true] %s631_s22 }
 0x16b   : > { %s6621_s30 = scalar_lea.hbm %s8153_s9, 65536 }
 0x16c   : > { %p6622_p3 = scmp.ne.s32.totalorder %s8153_s9, %s6621_s30  ;;  %p6628_p13 = scmp.lt.u32.totalorder %s6621_s30, %s8153_s9 }
 0x16e   : > { %p6624_p9 = pnand %p6622_p3, %p7155_p2 }
 0x170   : > { %p6625_p10 = pneg %p6624_p9 }
 0x172   : > { %p6630_p1 = pnand %p6628_p13, %p6625_p10 }
 0x174   : > { %6633 = shalt.err (!%p6630_p1)
}
 0x175   : > { %s6634_s2 = scalar_lea.vmem %s606_s8, 65536  ;;  %p6642_p7 = scmp.lt.s32.totalorder %s606_s8, %s606_s8 }
 0x176   : > { %p6635_p4 = scmp.ne.s32.totalorder %s606_s8, %s6634_s2  ;;  %p6643_p8 = scmp.lt.s32.totalorder %s6634_s2, %s6634_s2 }
 0x178   : > { %p6637_p5 = pnand %p6635_p4, %p7155_p2  ;;  %p6644_p11 = por %p6643_p8, %p6642_p7 }
 0x17a   : > { %p6638_p6 = pneg %p6637_p5 }
 0x17c   : > { %p6645_p12 = pnand %p6644_p11, %p6638_p6 }
 0x17e   : > { %6648 = shalt.err (!%p6645_p12)
}
 0x17f   : > { %s8243_s0 = smov 8   ;;  %s8244_s10 = smov 128  }
 0x180   : > { %5488 = dma.hbm_to_vmem [thread:$0]  (!%p7143_p0), %s8153_s9, 65536, %s606_s8, [#allocation17], %s8244_s10, %s8244_s10, %s8243_s0  }
 0x181   : > { %s6649_s17 = scalar_lea.hbm %s8155_s11, 256 }
 0x182   : > { %p6650_p3 = scmp.ne.s32.totalorder %s8155_s11, %s6649_s17  ;;  %p6656_p13 = scmp.lt.u32.totalorder %s6649_s17, %s8155_s11 }
 0x184   : > { %p6652_p9 = pnand %p6650_p3, %p7155_p2 }
 0x186   : > { %p6653_p10 = pneg %p6652_p9 }
 0x188   : > { %p6658_p1 = pnand %p6656_p13, %p6653_p10 }
 0x18a   : > { %6661 = shalt.err (!%p6658_p1)
}
 0x18b   : > { %s6662_s2 = scalar_lea.vmem %s632_s22, 256  ;;  %p6670_p7 = scmp.lt.s32.totalorder %s632_s22, %s632_s22 }
 0x18c   : > { %p6663_p4 = scmp.ne.s32.totalorder %s632_s22, %s6662_s2  ;;  %p6671_p8 = scmp.lt.s32.totalorder %s6662_s2, %s6662_s2 }
 0x18e   : > { %p6665_p5 = pnand %p6663_p4, %p7155_p2  ;;  %p6672_p11 = por %p6671_p8, %p6670_p7 }
 0x190   : > { %p6666_p6 = pneg %p6665_p5 }
 0x192   : > { %p6673_p12 = pnand %p6672_p11, %p6666_p6 }
 0x194   : > { %6676 = shalt.err (!%p6673_p12)
}
 0x195   : > { %5494 = dma.hbm_to_vmem [thread:$0]  (!%p7143_p0), %s8155_s11, 256, %s632_s22, [#allocation20], %s8239_s19, %s8239_s19, %s8238_s1  }
 0x196   : > { %s6951_s3 = smov [#allocation24]   ;;  %s6952_s20 = smov [#allocation27]  }
 0x197   : > { %s657_s6 = sshll.u32 %s6951_s3, 4  ;;  %s681_s17 = sshll.u32 %s6952_s20, 4  ;;  %s658_s6 = int_to_ptr.vmem [resolvable:$true] %s657_s6  ;;  %s682_s17 = int_to_ptr.vmem [resolvable:$true] %s681_s17 }
 0x198   : > { %s6677_s21 = scalar_lea.hbm %s8157_s13, 4096 }
 0x199   : > { %p6678_p3 = scmp.ne.s32.totalorder %s8157_s13, %s6677_s21  ;;  %p6684_p13 = scmp.lt.u32.totalorder %s6677_s21, %s8157_s13 }
 0x19b   : > { %p6680_p9 = pnand %p6678_p3, %p7155_p2 }
 0x19d   : > { %p6681_p10 = pneg %p6680_p9 }
 0x19f   : > { %p6686_p1 = pnand %p6684_p13, %p6681_p10 }
 0x1a1   : > { %6689 = shalt.err (!%p6686_p1)
}
 0x1a2   : > { %s6690_s1 = scalar_lea.vmem %s658_s6, 4096  ;;  %p6698_p7 = scmp.lt.s32.totalorder %s658_s6, %s658_s6 }
 0x1a3   : > { %p6691_p4 = scmp.ne.s32.totalorder %s658_s6, %s6690_s1  ;;  %p6699_p8 = scmp.lt.s32.totalorder %s6690_s1, %s6690_s1 }
 0x1a5   : > { %p6693_p5 = pnand %p6691_p4, %p7155_p2  ;;  %p6700_p11 = por %p6699_p8, %p6698_p7 }
 0x1a7   : > { %p6694_p6 = pneg %p6693_p5 }
 0x1a9   : > { %p6701_p12 = pnand %p6700_p11, %p6694_p6 }
 0x1ab   : > { %6704 = shalt.err (!%p6701_p12)
}
 0x1ac   : > { %5500 = dma.hbm_to_vmem [thread:$0]  (!%p7143_p0), %s8157_s13, 4096, %s658_s6, [#allocation23], %s8244_s10, %s8244_s10, %s8243_s0  }
 0x1ad   : > { %s6705_s3 = scalar_lea.hbm %s8159_s15, 4096 }
 0x1ae   : > { %p6706_p3 = scmp.ne.s32.totalorder %s8159_s15, %s6705_s3  ;;  %p6712_p13 = scmp.lt.u32.totalorder %s6705_s3, %s8159_s15 }
 0x1b0   : > { %p6708_p9 = pnand %p6706_p3, %p7155_p2 }
 0x1b2   : > { %p6709_p10 = pneg %p6708_p9 }
 0x1b4   : > { %p6714_p1 = pnand %p6712_p13, %p6709_p10 }
 0x1b6   : > { %6717 = shalt.err (!%p6714_p1)
}
 0x1b7   : > { %s6718_s24 = scalar_lea.vmem %s682_s17, 4096  ;;  %p6726_p7 = scmp.lt.s32.totalorder %s682_s17, %s682_s17 }
 0x1b8   : > { %p6719_p4 = scmp.ne.s32.totalorder %s682_s17, %s6718_s24  ;;  %p6727_p8 = scmp.lt.s32.totalorder %s6718_s24, %s6718_s24 }
 0x1ba   : > { %p6721_p5 = pnand %p6719_p4, %p7155_p2  ;;  %p6728_p11 = por %p6727_p8, %p6726_p7 }
 0x1bc   : > { %p6722_p6 = pneg %p6721_p5 }
 0x1be   : > { %p6729_p12 = pnand %p6728_p11, %p6722_p6 }
 0x1c0   : > { %6732 = shalt.err (!%p6729_p12)
}
 0x1c1   : > { %5506 = dma.hbm_to_vmem [thread:$0]  (!%p7143_p0), %s8159_s15, 4096, %s682_s17, [#allocation26], %s8244_s10, %s8244_s10, %s8243_s0  }
 0x1c2   : > { %s6953_s8 = smov [#allocation30]   ;;  %s6954_s19 = smov [#allocation31]  }
 0x1c3   : > { %s705_s1 = sshll.u32 %s6953_s8, 4  ;;  %s719_s29 = sshll.u32 %s6954_s19, 4  ;;  %s706_s1 = int_to_ptr.vmem [resolvable:$true] %s705_s1  ;;  %s720_s29 = int_to_ptr.vmem [resolvable:$true] %s719_s29 }
 0x1c4   : > { %s8245_s3 = sld [smem:[#allocation68_spill]] }
 0x1ca   : > { %s6733_s20 = scalar_lea.hbm %s8245_s3, 8192 }
 0x1cb   : > { %p6734_p3 = scmp.ne.s32.totalorder %s8245_s3, %s6733_s20  ;;  %p6740_p13 = scmp.lt.u32.totalorder %s6733_s20, %s8245_s3 }
 0x1cd   : > { %p6736_p9 = pnand %p6734_p3, %p7155_p2 }
 0x1cf   : > { %p6737_p10 = pneg %p6736_p9 }
 0x1d1   : > { %p6742_p1 = pnand %p6740_p13, %p6737_p10 }
 0x1d3   : > { %6745 = shalt.err (!%p6742_p1)
}
 0x1d4   : > { %s6746_s0 = scalar_lea.vmem %s706_s1, 8192  ;;  %p6754_p7 = scmp.lt.s32.totalorder %s706_s1, %s706_s1 }
 0x1d5   : > { %p6747_p4 = scmp.ne.s32.totalorder %s706_s1, %s6746_s0  ;;  %p6755_p8 = scmp.lt.s32.totalorder %s6746_s0, %s6746_s0 }
 0x1d7   : > { %p6749_p5 = pnand %p6747_p4, %p7155_p2  ;;  %p6756_p11 = por %p6755_p8, %p6754_p7 }
 0x1d9   : > { %p6750_p6 = pneg %p6749_p5 }
 0x1db   : > { %p6757_p12 = pnand %p6756_p11, %p6750_p6 }
 0x1dd   : > { %6760 = shalt.err (!%p6757_p12)
}
 0x1de   : > { %s8246_s10 = smov 256   ;;  %s8247_s19 = sld [smem:[#allocation69_spill]] }
 0x1df   : > { %5512 = dma.hbm_to_vmem [thread:$0]  (!%p7143_p0), %s8245_s3, 8192, %s706_s1, [#allocation29], %s8246_s10, %s8246_s10, %s6948_s18  }
 0x1e4   : > { %s6761_s22 = scalar_lea.hbm %s8247_s19, 64 }
 0x1e5   : > { %p6762_p3 = scmp.ne.s32.totalorder %s8247_s19, %s6761_s22  ;;  %p6768_p13 = scmp.lt.u32.totalorder %s6761_s22, %s8247_s19 }
 0x1e7   : > { %p6764_p9 = pnand %p6762_p3, %p7155_p2 }
 0x1e9   : > { %p6765_p10 = pneg %p6764_p9 }
 0x1eb   : > { %p6770_p1 = pnand %p6768_p13, %p6765_p10 }
 0x1ed   : > { %6773 = shalt.err (!%p6770_p1)
}
 0x1ee   : > { %s6774_s21 = scalar_lea.vmem %s720_s29, 64  ;;  %p6782_p7 = scmp.lt.s32.totalorder %s720_s29, %s720_s29 }
 0x1ef   : > { %p6775_p4 = scmp.ne.s32.totalorder %s720_s29, %s6774_s21  ;;  %p6783_p8 = scmp.lt.s32.totalorder %s6774_s21, %s6774_s21 }
 0x1f1   : > { %p6777_p5 = pnand %p6775_p4, %p7155_p2  ;;  %p6784_p11 = por %p6783_p8, %p6782_p7 }
 0x1f3   : > { %p6778_p6 = pneg %p6777_p5 }
 0x1f5   : > { %p6785_p12 = pnand %p6784_p11, %p6778_p6 }
 0x1f7   : > { %6788 = shalt.err (!%p6785_p12)
}
 0x1f8   : > { %5515 = dma.hbm_to_vmem [thread:$0]  (!%p7143_p0), %s8247_s19, 64, %s720_s29, [#allocation32]  }
 0x1f9   : > { %s8248_s24 = sld [smem:[#allocation57_spill]] }
 0x1ff   : > { %p8249_p3 = scmp.ne.s32.totalorder %s8248_s24, 0 }
 0x200   : > { %s8250_s0 = sld [smem:[#allocation58_spill]] (!%p8249_p3) }
 0x201   : > { %742 = sbr.rel (%p8249_p3) target bundleno = 4359 (0x1107), region = 96 }
 0x206   : > { %p8251_p9 = scmp.ne.s32.totalorder (!%p8249_p3), %s8250_s0, 0 }
 0x208   : > { %6850 = dma.done.wait (%p8251_p9), [#allocation5], 98304  }
 0x209   : > { %6852 = vsyncadd (%p8251_p9), [#allocation5], 4294868992 }
 0x20a   : > { %6854 = dma.done.wait (%p8251_p9), [#allocation8], 33536  }
 0x20b   : > { %6856 = vsyncadd (%p8251_p9), [#allocation8], 4294933760 }
 0x20c   : > { %6858 = dma.done.wait (%p8251_p9), [#allocation11], 512  }
 0x20d   : > { %6860 = vsyncadd (%p8251_p9), [#allocation11], 4294966784 }
 0x20e   : > { %6862 = dma.done.wait (%p8251_p9), [#allocation14], 65792  }
 0x20f   : > { %6864 = vsyncadd (%p8251_p9), [#allocation14], 4294901504 }
 0x210   : > { %6866 = dma.done.wait (%p8251_p9), [#allocation17], 66048  }
 0x211   : > { %6868 = vsyncadd (%p8251_p9), [#allocation17], 4294901248 }
 0x212   : > { %6870 = dma.done.wait (%p8251_p9), [#allocation20], 512  }
 0x213   : > { %6872 = vsyncadd (%p8251_p9), [#allocation20], 4294966784 }
 0x214   : > { %6874 = dma.done.wait (%p8251_p9), [#allocation23], 4352  }
 0x215   : > { %6876 = vsyncadd (%p8251_p9), [#allocation23], 4294962944 }
 0x216   : > { %6878 = dma.done.wait (%p8251_p9), [#allocation26], 4128  }
 0x217   : > { %6880 = vsyncadd (%p8251_p9), [#allocation26], 4294963168 }
 0x218   : > { %6882 = dma.done.wait (%p8251_p9), [#allocation29], 8224  }
 0x219   : > { %6884 = vsyncadd (%p8251_p9), [#allocation29], 4294959072 }
 0x21a   : > { %6886 = dma.done.wait (%p8251_p9), [#allocation32], 64  }
 0x21b   : > { %6888 = vsyncadd (%p8251_p9), [#allocation32], 4294967232  ;;  %s8252_s23 = sld [smem:[#allocation46_spill]]  ;;  %s8253_s27 = sld [smem:[#allocation49_spill]] }
 0x21c   : > { %s8254_s22 = sld [smem:[#allocation60_spill]]  ;;  %s8255_s28 = sld [smem:[#allocation48_spill]] }
 0x221   : > { %s864_s29 = sand.u32 1, %s8252_s23   ;;  %s4897_s10 = sshll.u32 %s8253_s27, 1 }
 0x222   : > { %s4896_s17 = sshll.u32 %s864_s29, 6  ;;  %p868_p0 = scmp.lt.s32.totalorder %s4897_s10, 3 }
 0x223   : > { %s7562_s20 = scalar_lea.vmem [#allocation33], %s4896_s17  ;;  %p4900_p2 = scmp.ne.s32.totalorder %s8255_s28, 0 }
 0x224   : > { %s8280_s10 = smov (!%p868_p0, %s4897_s10), 3  ;;  %v888_v3 = vlaneseq (!%p4900_p2)  ;;  %vm897_vm0 = vcmask (!%p4900_p2), 130048   ;;  %v6955_v8 = vmov (!%p4900_p2), -1e+30  }
 0x225   : > { %s5308_s6 = sshll.u32 %s8280_s10, 4  ;;  %879 = sbr.rel (%p4900_p2) target bundleno = 557 (0x22d), region = 172 }
 0x226   : > { %s872_s4 = scalar_lea.vmem %s8254_s22, %s5308_s6  ;;  %v889_v5 = vshrl.u32 (!%p4900_p2), %v888_v3, 7  ;;  %v892_v6 = vand.u32 (!%p4900_p2), 127, %v888_v3 }
 0x227   : > { %v880_v0 = vld [vmem:[%s872_s4] sm:$0xff] (!%p4900_p2)  ;;  %v881_v1 = vld [vmem:[%s872_s4 + $0x8] sm:$0xff] (!%p4900_p2)  ;;  %v882_v2 = vld [vmem:[%s872_s4 + $0x10] sm:$0xff] (!%p4900_p2) }
 0x228   : > { %884 = vst [vmem:[#allocation2] sm:$0xff] (!%p4900_p2), %v880_v0  ;;  %885 = vst [vmem:[#allocation2 + $0x8] sm:$0xff] (!%p4900_p2), %v881_v1  ;;  %v883_v4 = vld [vmem:[%s872_s4 + $0x18] sm:$0xff] (!%p4900_p2)  ;;  %vm893_vm1 = vcmp.le.s32.totalorder (!%p4900_p2), %v892_v6, %v889_v5  ;;  %v890_v7 = vadd.s32 (!%p4900_p2), 8, %v889_v5 }
 0x229   : > { %886 = vst [vmem:[#allocation2 + $0x10] sm:$0xff] (!%p4900_p2), %v882_v2  ;;  %887 = vst [vmem:[#allocation2 + $0x18] sm:$0xff] (!%p4900_p2), %v883_v4  ;;  %v895_v9 = vsel (!%p4900_p2), %vm893_vm1, 0.0, %v6955_v8 }
 0x22a   : > { %898 = vst.msk [vmem:[#allocation3] sm:$0xff] (!%p4900_p2), %vm897_vm0, %v895_v9  ;;  %vm894_vm2 = vcmp.le.s32.totalorder (!%p4900_p2), %v892_v6, %v890_v7 }
 0x22b   : > { %v896_v10 = vsel (!%p4900_p2), %vm894_vm2, 0.0, %v6955_v8 }
 0x22c   : > { %899 = vst.msk [vmem:[#allocation3 + $0x8] sm:$0xff] %vm897_vm0, %v896_v10 }
 0x22d PF: > { %s8256_s30 = sld [smem:[#allocation48_spill]]  ;;  %vm6957_vm3 = vmmov 0   ;;  %vm1660_vm4 = vcmask 523264   ;;  %vm1708_vm5 = vcmask 130048   ;;  %s6958_s0 = smov 64  }
 0x230   : > { %v901_v11 = vld [vmem:[#allocation2 + $0x8] sm:$0xff] }
 0x231   : > { %v903_v12 = vld [vmem:[#allocation2 + $0x18] sm:$0xff] }
 0x232   : > { %v7566_v13 = vpack.c.bf16 %v903_v12, %v901_v11  ;;  %v7634_v12 = vld [vmem:[#allocation2] sm:$0xff] }
 0x233   : > { %s5309_s21 = smul.u32 768, %s8256_s30  ;;  %s5310_s23 = sshll.u32 %s8256_s30, 8 }
 0x234   : > { %1594 = vmatprep.mubr.bf16.mxu1 %v7566_v13  ;;  %1551 = vmatprep.mubr.bf16.mxu0 %v7566_v13  ;;  %s1005_s1 = smul.u32 6, %s8256_s30  ;;  %s7792_s27 = scalar_lea.vmem [#allocation9], %s5310_s23 }
 0x235   : > { %s7568_s18 = scalar_lea.vmem [#allocation4], %s5309_s21  ;;  %s7837_s10 = sshll.u32 %s8256_s30, 1 }
 0x236   : > { %v5667_v14 = vld [vmem:[%s7568_s18 + $0xc] ss:$24 sps:$4 sm:$0xff]   ;;  %v5669_v15 = vld [vmem:[%s7568_s18 + $0x8] ss:$24 sps:$4 sm:$0xff]   ;;  %v5672_v17 = vld [vmem:[%s7568_s18 + $0x3c] ss:$24 sps:$4 sm:$0xff]  }
 0x237   : > { %1562 = vmatprep.subr.bf16.mxu1 %v5667_v14  ;;  %v5670_v16 = vld [vmem:[%s7568_s18 + $0x4] ss:$24 sps:$4 sm:$0xff]   ;;  %v5674_v18 = vld [vmem:[%s7568_s18] ss:$24 sps:$4 sm:$0xff]   ;;  %v5676_v20 = vld [vmem:[%s7568_s18 + $0x34] ss:$24 sps:$4 sm:$0xff]  }
 0x238   : > { %1563 = vmatpush1.bf16.msra.mxu1 %v5669_v15  ;;  %v5675_v19 = vld [vmem:[%s7568_s18 + $0x38] ss:$24 sps:$4 sm:$0xff]   ;;  %1519 = vmatprep.subr.bf16.mxu0 %v5670_v16  ;;  %v5678_v21 = vld [vmem:[%s7568_s18 + $0x6c] ss:$24 sps:$4 sm:$0xff]   ;;  %v5681_v23 = vld [vmem:[%s7568_s18 + $0x68] ss:$24 sps:$4 sm:$0xff]  }
 0x239   : > { %1564 = vmatprep.subr.bf16.mxu1 %v5672_v17  ;;  %1520 = vmatpush1.bf16.msra.mxu0 %v5674_v18  ;;  %v5680_v22 = vld [vmem:[%s7568_s18 + $0x30] ss:$24 sps:$4 sm:$0xff]   ;;  %v5682_v24 = vld [vmem:[%s7568_s18 + $0x64] ss:$24 sps:$4 sm:$0xff]   ;;  %v5686_v26 = vld [vmem:[%s7568_s18 + $0x60] ss:$24 sps:$4 sm:$0xff]  }
 0x23a   : > { %1521 = vmatprep.subr.bf16.mxu0 %v5676_v20  ;;  %v5684_v25 = vld [vmem:[%s7568_s18 + $0x9c] ss:$24 sps:$4 sm:$0xff]   ;;  %v5687_v28 = vld [vmem:[%s7568_s18 + $0x98] ss:$24 sps:$4 sm:$0xff]   ;;  %v5690_v29 = vld [vmem:[%s7568_s18 + $0xcc] ss:$24 sps:$4 sm:$0xff]  }
 0x23b   : > { %v5688_v27 = vld [vmem:[%s7568_s18 + $0x94] ss:$24 sps:$4 sm:$0xff]   ;;  %v5692_v30 = vld [vmem:[%s7568_s18 + $0x90] ss:$24 sps:$4 sm:$0xff]   ;;  %v5694_v31 = vld [vmem:[%s7568_s18 + $0xc4] ss:$24 sps:$4 sm:$0xff]  }
 0x23c   : > { %1565 = vmatpush1.bf16.msra.mxu1 %v5675_v19  ;;  %v5693_v32 = vld [vmem:[%s7568_s18 + $0xc8] ss:$24 sps:$4 sm:$0xff]   ;;  %v5696_v33 = vld [vmem:[%s7568_s18 + $0xfc] ss:$24 sps:$4 sm:$0xff]   ;;  %v5699_v36 = vld [vmem:[%s7568_s18 + $0xf8] ss:$24 sps:$4 sm:$0xff]  }
 0x23d   : > { %1566 = vmatprep.subr.bf16.mxu1 %v5678_v21  ;;  %1522 = vmatpush1.bf16.msra.mxu0 %v5680_v22  ;;  %v5698_v34 = vld [vmem:[%s7568_s18 + $0xc0] ss:$24 sps:$4 sm:$0xff]   ;;  %v5700_v35 = vld [vmem:[%s7568_s18 + $0xf4] ss:$24 sps:$4 sm:$0xff]   ;;  %v5704_v38 = vld [vmem:[%s7568_s18 + $0xf0] ss:$24 sps:$4 sm:$0xff]  }
 0x23e   : > { %1523 = vmatprep.subr.bf16.mxu0 %v5682_v24  ;;  %v5702_v37 = vld [vmem:[%s7568_s18 + $0x12c] ss:$24 sps:$4 sm:$0xff]   ;;  %v5705_v40 = vld [vmem:[%s7568_s18 + $0x128] ss:$24 sps:$4 sm:$0xff]   ;;  %v5708_v41 = vld [vmem:[%s7568_s18 + $0x15c] ss:$24 sps:$4 sm:$0xff]  }
 0x23f   : > { %v5706_v39 = vld [vmem:[%s7568_s18 + $0x124] ss:$24 sps:$4 sm:$0xff]   ;;  %v5710_v42 = vld [vmem:[%s7568_s18 + $0x120] ss:$24 sps:$4 sm:$0xff]   ;;  %v5712_v43 = vld [vmem:[%s7568_s18 + $0x154] ss:$24 sps:$4 sm:$0xff]  }
 0x240   : > { %1567 = vmatpush1.bf16.msra.mxu1 %v5681_v23  ;;  %v5711_v44 = vld [vmem:[%s7568_s18 + $0x158] ss:$24 sps:$4 sm:$0xff]   ;;  %v5714_v45 = vld [vmem:[%s7568_s18 + $0x18c] ss:$24 sps:$4 sm:$0xff]   ;;  %v5717_v48 = vld [vmem:[%s7568_s18 + $0x188] ss:$24 sps:$4 sm:$0xff]  }
 0x241   : > { %1568 = vmatprep.subr.bf16.mxu1 %v5684_v25  ;;  %1524 = vmatpush1.bf16.msra.mxu0 %v5686_v26  ;;  %v5716_v46 = vld [vmem:[%s7568_s18 + $0x150] ss:$24 sps:$4 sm:$0xff]   ;;  %v5718_v47 = vld [vmem:[%s7568_s18 + $0x184] ss:$24 sps:$4 sm:$0xff]   ;;  %v5722_v50 = vld [vmem:[%s7568_s18 + $0x180] ss:$24 sps:$4 sm:$0xff]  }
 0x242   : > { %1525 = vmatprep.subr.bf16.mxu0 %v5688_v27  ;;  %v5720_v49 = vld [vmem:[%s7568_s18 + $0x1bc] ss:$24 sps:$4 sm:$0xff]   ;;  %v5723_v52 = vld [vmem:[%s7568_s18 + $0x1b8] ss:$24 sps:$4 sm:$0xff]   ;;  %v5726_v53 = vld [vmem:[%s7568_s18 + $0x1ec] ss:$24 sps:$4 sm:$0xff]  }
 0x243   : > { %v5724_v51 = vld [vmem:[%s7568_s18 + $0x1b4] ss:$24 sps:$4 sm:$0xff]   ;;  %v5728_v54 = vld [vmem:[%s7568_s18 + $0x1b0] ss:$24 sps:$4 sm:$0xff]   ;;  %v5730_v55 = vld [vmem:[%s7568_s18 + $0x1e4] ss:$24 sps:$4 sm:$0xff]  }
 0x244   : > { %1569 = vmatpush1.bf16.msra.mxu1 %v5687_v28  ;;  %v5729_v56 = vld [vmem:[%s7568_s18 + $0x1e8] ss:$24 sps:$4 sm:$0xff]   ;;  %v5732_v57 = vld [vmem:[%s7568_s18 + $0x21c] ss:$24 sps:$4 sm:$0xff]   ;;  %v5735_v60 = vld [vmem:[%s7568_s18 + $0x218] ss:$24 sps:$4 sm:$0xff]  }
 0x245   : > { %1570 = vmatprep.subr.bf16.mxu1 %v5690_v29  ;;  %1526 = vmatpush1.bf16.msra.mxu0 %v5692_v30  ;;  %v5734_v58 = vld [vmem:[%s7568_s18 + $0x1e0] ss:$24 sps:$4 sm:$0xff]   ;;  %v5736_v59 = vld [vmem:[%s7568_s18 + $0x214] ss:$24 sps:$4 sm:$0xff]   ;;  %v5740_v62 = vld [vmem:[%s7568_s18 + $0x210] ss:$24 sps:$4 sm:$0xff]  }
 0x246   : > { %1527 = vmatprep.subr.bf16.mxu0 %v5694_v31  ;;  %v5738_v61 = vld [vmem:[%s7568_s18 + $0x24c] ss:$24 sps:$4 sm:$0xff]   ;;  %v5741_v0 = vld [vmem:[%s7568_s18 + $0x248] ss:$24 sps:$4 sm:$0xff]   ;;  %v5744_v1 = vld [vmem:[%s7568_s18 + $0x27c] ss:$24 sps:$4 sm:$0xff]  }
 0x247   : > { %v5742_v63 = vld [vmem:[%s7568_s18 + $0x244] ss:$24 sps:$4 sm:$0xff]   ;;  %v5746_v2 = vld [vmem:[%s7568_s18 + $0x240] ss:$24 sps:$4 sm:$0xff]   ;;  %v5748_v3 = vld [vmem:[%s7568_s18 + $0x274] ss:$24 sps:$4 sm:$0xff]  }
 0x248   : > { %1571 = vmatpush1.bf16.msra.mxu1 %v5693_v32  ;;  %v5747_v4 = vld [vmem:[%s7568_s18 + $0x278] ss:$24 sps:$4 sm:$0xff]   ;;  %v5750_v5 = vld [vmem:[%s7568_s18 + $0x2ac] ss:$24 sps:$4 sm:$0xff]   ;;  %v5753_v8 = vld [vmem:[%s7568_s18 + $0x2a8] ss:$24 sps:$4 sm:$0xff]  }
 0x249   : > { %1572 = vmatprep.subr.bf16.mxu1 %v5696_v33  ;;  %1528 = vmatpush1.bf16.msra.mxu0 %v5698_v34  ;;  %v5752_v6 = vld [vmem:[%s7568_s18 + $0x270] ss:$24 sps:$4 sm:$0xff]   ;;  %v5754_v7 = vld [vmem:[%s7568_s18 + $0x2a4] ss:$24 sps:$4 sm:$0xff]   ;;  %v5758_v10 = vld [vmem:[%s7568_s18 + $0x2a0] ss:$24 sps:$4 sm:$0xff]  }
 0x24a   : > { %1529 = vmatprep.subr.bf16.mxu0 %v5700_v35  ;;  %v5756_v9 = vld [vmem:[%s7568_s18 + $0x2dc] ss:$24 sps:$4 sm:$0xff]   ;;  %v5759_v14 = vld [vmem:[%s7568_s18 + $0x2d8] ss:$24 sps:$4 sm:$0xff]   ;;  %s1006_s24 = scalar_lea.vmem [#allocation7], %s1005_s1  ;;  %s2196_s17 = scalar_lea.vmem [#allocation10], %s7837_s10 }
 0x24b   : > { %v5760_v11 = vld [vmem:[%s7568_s18 + $0x2d4] ss:$24 sps:$4 sm:$0xff]   ;;  %v5762_v16 = vld [vmem:[%s7568_s18 + $0x2d0] ss:$24 sps:$4 sm:$0xff]   ;;  %v5768_v20 = vld [vmem:[%s7568_s18 + $0x44] ss:$24 sps:$4 sm:$0xff]  }
 0x24c   : > { %1573 = vmatpush1.bf16.msra.mxu1 %v5699_v36  ;;  %v7637_v15 = vld [vmem:[#allocation2 + $0x10] sm:$0xff]  ;;  %v5766_v21 = vld [vmem:[%s7568_s18 + $0x40] ss:$24 sps:$4 sm:$0xff]   ;;  %v5774_v24 = vld [vmem:[%s7568_s18 + $0xa4] ss:$24 sps:$4 sm:$0xff]   ;;  %s5311_s6 = sshll.u32 %s8256_s30, 9 }
 0x24d   : > { %1574 = vmatprep.subr.bf16.mxu1 %v5702_v37  ;;  %1530 = vmatpush1.bf16.msra.mxu0 %v5704_v38  ;;  %v7642_v17 = vpack.c.bf16 %v7637_v15, %v7634_v12  ;;  %v5765_v18 = vld [vmem:[%s7568_s18 + $0x14] ss:$24 sps:$4 sm:$0xff]   ;;  %v5763_v19 = vld [vmem:[%s7568_s18 + $0x10] ss:$24 sps:$4 sm:$0xff]   ;;  %v5772_v25 = vld [vmem:[%s7568_s18 + $0xa0] ss:$24 sps:$4 sm:$0xff]  }
 0x24e   : > { %1531 = vmatprep.subr.bf16.mxu0 %v5706_v39  ;;  %v5771_v22 = vld [vmem:[%s7568_s18 + $0x74] ss:$24 sps:$4 sm:$0xff]   ;;  %v5769_v23 = vld [vmem:[%s7568_s18 + $0x70] ss:$24 sps:$4 sm:$0xff]   ;;  %v5778_v28 = vld [vmem:[%s7568_s18 + $0x100] ss:$24 sps:$4 sm:$0xff]  }
 0x24f   : > { %v5777_v26 = vld [vmem:[%s7568_s18 + $0xd4] ss:$24 sps:$4 sm:$0xff]   ;;  %v5775_v27 = vld [vmem:[%s7568_s18 + $0xd0] ss:$24 sps:$4 sm:$0xff]   ;;  %v5786_v31 = vld [vmem:[%s7568_s18 + $0x164] ss:$24 sps:$4 sm:$0xff]  }
 0x250   : > { %1575 = vmatpush1.bf16.msra.mxu1 %v5705_v40  ;;  %v5783_v29 = vld [vmem:[%s7568_s18 + $0x134] ss:$24 sps:$4 sm:$0xff]   ;;  %v5781_v30 = vld [vmem:[%s7568_s18 + $0x130] ss:$24 sps:$4 sm:$0xff]   ;;  %v5784_v32 = vld [vmem:[%s7568_s18 + $0x160] ss:$24 sps:$4 sm:$0xff]  }
 0x251   : > { %1576 = vmatprep.subr.bf16.mxu1 %v5708_v41  ;;  %1532 = vmatpush1.bf16.msra.mxu0 %v5710_v42  ;;  %v5789_v33 = vld [vmem:[%s7568_s18 + $0x194] ss:$24 sps:$4 sm:$0xff]   ;;  %v5787_v34 = vld [vmem:[%s7568_s18 + $0x190] ss:$24 sps:$4 sm:$0xff]   ;;  %v5792_v35 = vld [vmem:[%s7568_s18 + $0x1c4] ss:$24 sps:$4 sm:$0xff]  }
 0x252   : > { %1533 = vmatprep.subr.bf16.mxu0 %v5712_v43  ;;  %v5790_v36 = vld [vmem:[%s7568_s18 + $0x1c0] ss:$24 sps:$4 sm:$0xff]   ;;  %v5795_v37 = vld [vmem:[%s7568_s18 + $0x1f4] ss:$24 sps:$4 sm:$0xff]   ;;  %v5793_v38 = vld [vmem:[%s7568_s18 + $0x1f0] ss:$24 sps:$4 sm:$0xff]  }
 0x253   : > { %v5798_v39 = vld [vmem:[%s7568_s18 + $0x224] ss:$24 sps:$4 sm:$0xff]   ;;  %v5796_v40 = vld [vmem:[%s7568_s18 + $0x220] ss:$24 sps:$4 sm:$0xff]   ;;  %v5801_v41 = vld [vmem:[%s7568_s18 + $0x254] ss:$24 sps:$4 sm:$0xff]  }
 0x254   : > { %1577 = vmatpush1.bf16.msra.mxu1 %v5711_v44  ;;  %v5799_v42 = vld [vmem:[%s7568_s18 + $0x250] ss:$24 sps:$4 sm:$0xff]   ;;  %v5804_v43 = vld [vmem:[%s7568_s18 + $0x284] ss:$24 sps:$4 sm:$0xff]   ;;  %v5802_v44 = vld [vmem:[%s7568_s18 + $0x280] ss:$24 sps:$4 sm:$0xff]  }
 0x255   : > { %1578 = vmatprep.subr.bf16.mxu1 %v5714_v45  ;;  %1534 = vmatpush1.bf16.msra.mxu0 %v5716_v46  ;;  %v5807_v45 = vld [vmem:[%s7568_s18 + $0x2b4] ss:$24 sps:$4 sm:$0xff]   ;;  %v5805_v46 = vld [vmem:[%s7568_s18 + $0x2b0] ss:$24 sps:$4 sm:$0xff]   ;;  %s7859_s2 = scalar_lea.vmem [#allocation15], %s5311_s6  ;;  %s7947_s8 = scalar_lea.vmem [#allocation18], %s5311_s6 }
 0x256   : > { %1535 = vmatprep.subr.bf16.mxu0 %v5718_v47  ;;  %v5810_v47 = vld [vmem:[%s7568_s18 + $0x2e4] ss:$24 sps:$4 sm:$0xff]   ;;  %s2416_s22 = scalar_lea.vmem [#allocation12], %s7837_s10  ;;  %s2418_s4 = scalar_lea.vmem [#allocation13], %s7837_s10 }
 0x257   : > { %s5043_s28 = sshll.u32 %s8256_s30, 2  ;;  %s3487_s1 = scalar_lea.vmem [#allocation21], %s7837_s10 }
 0x258   : > { %1579 = vmatpush1.bf16.msra.mxu1 %v5717_v48  ;;  %v5808_v48 = vld [vmem:[%s7568_s18 + $0x2e0] ss:$24 sps:$4 sm:$0xff]   ;;  %s2553_s21 = scalar_lea.vmem [#allocation16], %s5043_s28  ;;  %p5173_p10 = scmp.ne.s32.totalorder %s8256_s30, 7 }
 0x259   : > { %1580 = vmatprep.subr.bf16.mxu1 %v5720_v49  ;;  %1536 = vmatpush1.bf16.msra.mxu0 %v5722_v50  ;;  %v6956_v49 = vmov 0.0   ;;  %v1009_v50 = vlaneseq }
 0x25a   : > { %1537 = vmatprep.subr.bf16.mxu0 %v5724_v51 }
 0x25b   : > { %v1010_v51 = vshrl.u32 %v1009_v50, 7 }
 0x25c   : > { %1581 = vmatpush1.bf16.msra.mxu1 %v5723_v52 }
 0x25d   : > { %1582 = vmatprep.subr.bf16.mxu1 %v5726_v53  ;;  %1538 = vmatpush1.bf16.msra.mxu0 %v5728_v54  ;;  %v7687_v52 = vsub.s32 2, %v1010_v51  ;;  %v7689_v53 = vsub.s32 0, %v1010_v51  ;;  %v1007_v54 = vld [vmem:[%s1006_s24] sm:$0x3f]  ;;  %s3489_s24 = scalar_lea.vmem [#allocation22], %s7837_s10 }
 0x25e   : > { %1539 = vmatprep.subr.bf16.mxu0 %v5730_v55  ;;  %v7691_v55 = vsub.s32 3, %v1010_v51 }
 0x260   : > { %1583 = vmatpush1.bf16.msra.mxu1 %v5729_v56  ;;  %v7693_v56 = vsub.s32 1, %v1010_v51 }
 0x261   : > { %1584 = vmatprep.subr.bf16.mxu1 %v5732_v57  ;;  %1540 = vmatpush1.bf16.msra.mxu0 %v5734_v58  ;;  %v1020_v57 = vrot.slane %v1007_v54, %v7687_v52  ;;  %v1012_v58 = vrot.slane %v1007_v54, %v7689_v53 }
 0x262   : > { %1541 = vmatprep.subr.bf16.mxu0 %v5736_v59 }
 0x264   : > { %1585 = vmatpush1.bf16.msra.mxu1 %v5735_v60  ;;  %v1024_v60 = vrot.slane %v1007_v54, %v7691_v55 }
 0x265   : > { %1586 = vmatprep.subr.bf16.mxu1 %v5738_v61  ;;  %1542 = vmatpush1.bf16.msra.mxu0 %v5740_v62  ;;  %v1016_v61 = vrot.slane %v1007_v54, %v7693_v56 }
 0x266   : > { %1543 = vmatprep.subr.bf16.mxu0 %v5742_v63 }
 0x268   : > { %1587 = vmatpush1.bf16.msra.mxu1 %v5741_v0 }
 0x269   : > { %1588 = vmatprep.subr.bf16.mxu1 %v5744_v1  ;;  %1544 = vmatpush1.bf16.msra.mxu0 %v5746_v2 }
 0x26a   : > { %1545 = vmatprep.subr.bf16.mxu0 %v5748_v3 }
 0x26c   : > { %1589 = vmatpush1.bf16.msra.mxu1 %v5747_v4 }
 0x26d   : > { %1590 = vmatprep.subr.bf16.mxu1 %v5750_v5  ;;  %1546 = vmatpush1.bf16.msra.mxu0 %v5752_v6 }
 0x26e   : > { %1547 = vmatprep.subr.bf16.mxu0 %v5754_v7 }
 0x270   : > { %1591 = vmatpush1.bf16.msra.mxu1 %v5753_v8 }
 0x271   : > { %1592 = vmatprep.subr.bf16.mxu1 %v5756_v9  ;;  %1548 = vmatpush1.bf16.msra.mxu0 %v5758_v10 }
 0x272   : > { %1549 = vmatprep.subr.bf16.mxu0 %v5760_v11 }
 0x274   : > { %1593 = vmatpush1.bf16.msra.mxu1 %v5759_v14 }
 0x275   : > { %1550 = vmatpush1.bf16.msra.mxu0 %v5762_v16  ;;  %5355 = vmatprep.subr.bf16.mxu1 %v6956_v49 }
 0x276   : > { %1605 = vmatprep.subr.bf16.mxu0 %v5765_v18 }
 0x277   : > { %1595 = vmatmul.mubr.bf16.vlgmr.msra.gmra.mrb[0].mxu1 %v7642_v17 }
 0x278   : > { %1552 = vmatmul.mubr.bf16.vlgmr.msra.gmra.mrb[0].mxu0 %v7642_v17  ;;  %5357 = vmatprep.mubr.msk.bf16.mxu1 %vm6957_vm3, %v6956_v49 }
 0x279   : > { %1606 = vmatpush1.bf16.msra.mxu0 %v5763_v19  ;;  %1637 = vmatprep.mubr.bf16.mxu0 %v7566_v13  ;;  %v5780_v13 = vld [vmem:[%s7568_s18 + $0x104] ss:$24 sps:$4 sm:$0xff]   ;;  %s3060_s18 = scalar_lea.vmem [#allocation19], %s7837_s10 }
 0x27a   : > { %1607 = vmatprep.subr.bf16.mxu0 %v5768_v20 }
 0x27d   : > { %1608 = vmatpush1.bf16.msra.mxu0 %v5766_v21 }
 0x27e   : > { %1609 = vmatprep.subr.bf16.mxu0 %v5771_v22 }
 0x281   : > { %1610 = vmatpush1.bf16.msra.mxu0 %v5769_v23 }
 0x282   : > { %1611 = vmatprep.subr.bf16.mxu0 %v5774_v24 }
 0x285   : > { %1612 = vmatpush1.bf16.msra.mxu0 %v5772_v25 }
 0x286   : > { %1613 = vmatprep.subr.bf16.mxu0 %v5777_v26  ;;  %v1027_v26 = vsub.s32 4, %v1010_v51 }
 0x289   : > { %1614 = vmatpush1.bf16.msra.mxu0 %v5775_v27  ;;  %v1031_v27 = vsub.s32 5, %v1010_v51 }
 0x28a   : > { %1615 = vmatprep.subr.bf16.mxu0 %v5780_v13  ;;  %v1028_v13 = vrot.slane %v1007_v54, %v1027_v26 }
 0x28d   : > { %1616 = vmatpush1.bf16.msra.mxu0 %v5778_v28  ;;  %v1032_v28 = vrot.slane %v1007_v54, %v1031_v27 }
 0x28e   : > { %1617 = vmatprep.subr.bf16.mxu0 %v5783_v29 }
 0x291   : > { %1618 = vmatpush1.bf16.msra.mxu0 %v5781_v30 }
 0x292   : > { %1619 = vmatprep.subr.bf16.mxu0 %v5786_v31 }
 0x295   : > { %1620 = vmatpush1.bf16.msra.mxu0 %v5784_v32 }
 0x296   : > { %1621 = vmatprep.subr.bf16.mxu0 %v5789_v33 }
 0x299   : > { %1622 = vmatpush1.bf16.msra.mxu0 %v5787_v34 }
 0x29a   : > { %1623 = vmatprep.subr.bf16.mxu0 %v5792_v35 }
 0x29d   : > { %1624 = vmatpush1.bf16.msra.mxu0 %v5790_v36 }
 0x29e   : > { %1625 = vmatprep.subr.bf16.mxu0 %v5795_v37 }
 0x2a1   : > { %1626 = vmatpush1.bf16.msra.mxu0 %v5793_v38 }
 0x2a2   : > { %1627 = vmatprep.subr.bf16.mxu0 %v5798_v39  ;;  %v7726_v39 = vld [vmem:[#allocation3] sm:$0xff] }
 0x2a5   : > { %1628 = vmatpush1.bf16.msra.mxu0 %v5796_v40 }
 0x2a6   : > { %1629 = vmatprep.subr.bf16.mxu0 %v5801_v41  ;;  %v7728_v41 = vld [vmem:[#allocation3 + $0x8] sm:$0xff] }
 0x2a9   : > { %1630 = vmatpush1.bf16.msra.mxu0 %v5799_v42 }
 0x2aa   : > { %1631 = vmatprep.subr.bf16.mxu0 %v5804_v43 }
 0x2ad   : > { %1632 = vmatpush1.bf16.msra.mxu0 %v5802_v44 }
 0x2ae   : > { %1633 = vmatprep.subr.bf16.mxu0 %v5807_v45 }
 0x2b1   : > { %1634 = vmatpush1.bf16.msra.mxu0 %v5805_v46 }
 0x2b2   : > { %1635 = vmatprep.subr.bf16.mxu0 %v5810_v47 }
 0x2b5   : > { %1636 = vmatpush1.bf16.msra.mxu0 %v5808_v48 }
 0x2b6   : > { %5331 = vmatprep.subr.bf16.mxu0 %v6956_v49 }
 0x2b8   : > { %1638 = vmatmul.mubr.bf16.vlgmr.msra.gmra.mrb[4].mxu0 %v7642_v17 }
 0x2b9   : > { %5333 = vmatprep.mubr.msk.bf16.mxu0 %vm6957_vm3, %v6956_v49 }
 0x34a   : > { %v1596_v59 = vpop.f32.mrb[0].mxu1 }
 0x34b   : > { %v1598_v62 = vpop.f32.mrb[1].mxu1  ;;  %v1553_v0 = vpop.f32.mrb[0].mxu0  ;;  %v1597_v1 = vadd.f32 %v1596_v59, %v1020_v57 }
 0x34c   : > { %v1600_v63 = vpop.f32.mrb[2].mxu1  ;;  %v1554_v4 = vadd.f32 %v1553_v0, %v1012_v58  ;;  %v1555_v5 = vpop.f32.mrb[1].mxu0  ;;  %v1599_v6 = vadd.f32 %v1598_v62, %v1024_v60 }
 0x34d   : > { %v1601_v2 = vadd.f32 %v1600_v63, %v1020_v57  ;;  %v1602_v3 = vpop.f32.mrb[3].mxu1  ;;  %v1556_v8 = vadd.f32 %v1555_v5, %v1016_v61  ;;  %v1557_v9 = vpop.f32.mrb[2].mxu0 }
 0x34e   : > { %v1603_v7 = vadd.f32 %v1602_v3, %v1024_v60  ;;  %v1648_v11 = vmul.f32 0.125, %v1554_v4  ;;  %v1558_v14 = vadd.f32 %v1557_v9, %v1012_v58  ;;  %v1559_v16 = vpop.f32.mrb[3].mxu0 }
 0x34f   : > { %v1654_v10 = vpack.c.bf16 %v1601_v2, %v1597_v1  ;;  %v1649_v18 = vmul.f32 0.125, %v1556_v8  ;;  %v1560_v19 = vadd.f32 %v1559_v16, %v1016_v61 }
 0x350   : > { %v7699_v17 = vpack.c.bf16 %v1603_v7, %v1599_v6  ;;  %v1650_v20 = vmul.f32 0.125, %v1558_v14 }
 0x351   : > { %v1665_v21 = vsel %vm1660_vm4, %v1654_v10, 0  ;;  %v1651_v22 = vmul.f32 0.125, %v1560_v19 }
 0x352   : > { %5332 = vmatpush3.bf16.xpose.msra.mxu0 %v1665_v21  ;;  %v1904_v23 = vsel %vm1660_vm4, %v7699_v17, 0  ;;  %v7704_v24 = vpack.c.bf16 %v1650_v20, %v1648_v11 }
 0x353   : > { %5356 = vmatpush3.bf16.xpose.msra.mxu1 %v1904_v23  ;;  %5337 = vmatprep.subr.bf16.mxu0 %v6956_v49  ;;  %v7707_v25 = vpack.c.bf16 %v1651_v22, %v1649_v18 }
 0x354   : > { %5361 = vmatprep.subr.bf16.mxu1 %v6956_v49 }
 0x359   : > { %5334 = vmatmul.mubr.msk.bf16.vlgmr.msra.gmra.mrb[8].mxu0 %vm1660_vm4, %v7704_v24 }
 0x35a   : > { %5358 = vmatmul.mubr.msk.bf16.vlgmr.msra.gmra.mrb[4].mxu1 %vm1660_vm4, %v7707_v25  ;;  %5339 = vmatprep.mubr.msk.bf16.mxu0 %vm6957_vm3, %v6956_v49 }
 0x35b   : > { %5363 = vmatprep.mubr.msk.bf16.mxu1 %vm6957_vm3, %v6956_v49 }
 0x38b   : > { %v1639_v29 = vpop.f32.mrb[4].mxu0 }
 0x38c   : > { %v1640_v30 = vadd.f32 %v1639_v29, %v1028_v13  ;;  %v1641_v31 = vpop.f32.mrb[5].mxu0 }
 0x38d   : > { %v1642_v32 = vadd.f32 %v1641_v31, %v1032_v28  ;;  %v1643_v33 = vpop.f32.mrb[6].mxu0 }
 0x38e   : > { %v1644_v34 = vadd.f32 %v1643_v33, %v1028_v13  ;;  %v1645_v35 = vpop.f32.mrb[7].mxu0 }
 0x38f   : > { %v1646_v36 = vadd.f32 %v1645_v35, %v1032_v28 }
 0x390   : > { %v7718_v37 = vpack.c.bf16 %v1644_v34, %v1640_v30 }
 0x391   : > { %v7720_v38 = vpack.c.bf16 %v1646_v36, %v1642_v32 }
 0x392   : > { %5338 = vmatpush3.bf16.msra.mxu0 %v7718_v37 }
 0x393   : > { %5362 = vmatpush3.bf16.msra.mxu1 %v7720_v38  ;;  %5343 = vmatprep.subr.bf16.mxu0 %v6956_v49 }
 0x394   : > { %5367 = vmatprep.subr.bf16.mxu1 %v6956_v49 }
 0x42c   : > { %v1701_v40 = vpop.f32.mrb[8].mxu0 }
 0x42d   : > { %v1702_v42 = vadd.f32 %v1701_v40, %v7726_v39  ;;  %v5335_v43 = vpop.f32.mrb[9].mxu0  ;;  %v1940_v44 = vpop.f32.mrb[4].mxu1 }
 0x42e   : > { %v1941_v45 = vadd.f32 %v1940_v44, %v7726_v39  ;;  %v1704_v46 = vpop.f32.mrb[10].mxu0  ;;  %v5359_v47 = vpop.f32.mrb[5].mxu1 }
 0x42f   : > { %v1705_v48 = vadd.f32 %v1704_v46, %v7728_v41  ;;  %v5336_v50 = vpop.f32.mrb[11].mxu0  ;;  %v1943_v51 = vpop.f32.mrb[6].mxu1  ;;  %v1709_v54 = vsel %vm1708_vm5, %v1702_v42, -inf }
 0x430   : > { %v1944_v57 = vadd.f32 %v1943_v51, %v7728_v41  ;;  %v5360_v58 = vpop.f32.mrb[7].mxu1  ;;  %1710 = vmax.xlane.f32.xlu1 %v1709_v54  ;;  %v1947_v59 = vsel %vm1708_vm5, %v1941_v45, -inf }
 0x431   : > { %1948 = vmax.xlane.f32.xlu0 %v1947_v59  ;;  %v1712_v60 = vsel %vm1708_vm5, %v1705_v48, -inf }
 0x432   : > { %v1950_v61 = vsel %vm1708_vm5, %v1944_v57, -inf }
 0x434   : > { %1713 = vmax.xlane.f32.xlu1 %v1712_v60 }
 0x435   : > { %1951 = vmax.xlane.f32.xlu0 %v1950_v61 }
 0x445   : > { %1780 = vrot.lane.b32.xlu1 %v1654_v10, %s6958_s0 }
 0x4bd   : > { %v1711_v62 = vpop.xlane.xlu1 %1710 }
 0x4be   : > { %v1715_v63 = vsub.f32 %v1702_v42, %v1711_v62  ;;  %v1949_v0 = vpop.xlane.xlu0 %1948 }
 0x4bf   : > { %v1953_v1 = vsub.f32 %v1941_v45, %v1949_v0 }
 0x4c0   : > { %v1717_v2 = vmul.f32 1.442695, %v1715_v63 }
 0x4c1   : > { %v1955_v3 = vmul.f32 1.442695, %v1953_v1  ;;  %v1714_v4 = vpop.xlane.xlu1 %1713 }
 0x4c2   : > { %6051 = vpow2.f32 %v1717_v2  ;;  %v1716_v5 = vsub.f32 %v1705_v48, %v1714_v4  ;;  %v1952_v6 = vpop.xlane.xlu0 %1951 }
 0x4c3   : > { %v1954_v7 = vsub.f32 %v1944_v57, %v1952_v6  ;;  %6053 = vpow2.f32 %v1955_v3 }
 0x4c4   : > { %v1719_v8 = vmul.f32 1.442695, %v1716_v5 }
 0x4c5   : > { %v1957_v9 = vmul.f32 1.442695, %v1954_v7  ;;  %v1781_v22 = vpop.permute.xlu1 %1780 }
 0x4c6   : > { %6055 = vpow2.f32 %v1719_v8 }
 0x4c7   : > { %6057 = vpow2.f32 %v1957_v9 }
 0x4cc   : > { %v6052_v11 = vpop.eup %6051 }
 0x4cd   : > { %v1721_v14 = vsel %vm1708_vm5, %v6052_v11, 0.0  ;;  %v6054_v10 = vpop.eup %6053 }
 0x4ce   : > { %1722 = vadd.xlane.f32.xlu0 %v1721_v14  ;;  %v1959_v18 = vsel %vm1708_vm5, %v6054_v10, 0.0 }
 0x4d0   : > { %v6056_v16 = vpop.eup %6055 }
 0x4d1   : > { %v1724_v19 = vsel %vm1708_vm5, %v6056_v16, 0.0  ;;  %v6058_v20 = vpop.eup %6057 }
 0x4d2   : > { %1960 = vadd.xlane.f32.xlu0 %v1959_v18  ;;  %1725 = vadd.xlane.f32.xlu1 %v1724_v19  ;;  %v1962_v21 = vsel %vm1708_vm5, %v6058_v20, 0.0 }
 0x4d6   : > { %1963 = vadd.xlane.f32.xlu1 %v1962_v21 }
 0x4e7   : > { %2015 = vrot.lane.b32.xlu1 %v7707_v25, %s6958_s0 }
 0x4e8   : > { %2018 = vrot.lane.b32.xlu0 %v7699_v17, %s6958_s0 }
 0x4eb   : > { %1777 = vrot.lane.b32.xlu1 %v7704_v24, %s6958_s0  ;;  %v1786_v24 = vsel %vm1660_vm4, %v1781_v22, 0 }
 0x55b   : > { %v1723_v23 = vpop.xlane.xlu0 %1722 }
 0x55c   : > { %6059 = vrcp.f32 %v1723_v23 }
 0x55f   : > { %v1961_v26 = vpop.xlane.xlu0 %1960  ;;  %v1726_v27 = vpop.xlane.xlu1 %1725 }
 0x560   : > { %6061 = vrcp.f32 %v1726_v27 }
 0x561   : > { %6063 = vrcp.f32 %v1961_v26 }
 0x563   : > { %v1964_v13 = vpop.xlane.xlu1 %1963  ;;  %v2019_v35 = vpop.permute.xlu0 %2018 }
 0x564   : > { %6065 = vrcp.f32 %v1964_v13  ;;  %v2024_v42 = vsel %vm1660_vm4, %v2019_v35, 0 }
 0x566   : > { %v6060_v28 = vpop.eup %6059 }
 0x567   : > { %v1729_v31 = vmul.f32 %v6060_v28, %v6052_v11  ;;  %v2016_v36 = vpop.permute.xlu1 %2015 }
 0x56a   : > { %v6062_v29 = vpop.eup %6061 }
 0x56b   : > { %v6064_v30 = vpop.eup %6063  ;;  %v1730_v25 = vmul.f32 %v6062_v29, %v6056_v16  ;;  %v1778_v43 = vpop.permute.xlu1 %1777 }
 0x56c   : > { %v1967_v17 = vmul.f32 %v6064_v30, %v6054_v10 }
 0x56d   : > { %v1731_v33 = vpack.c.bf16 %v1730_v25, %v1729_v31 }
 0x56e   : > { %v6066_v32 = vpop.eup %6065 }
 0x56f   : > { %v1968_v34 = vmul.f32 %v6066_v32, %v6058_v20  ;;  %5340 = vmatmul.mubr.msk.bf16.vlgmr.msra.gmra.mrb[12].mxu0 %vm1708_vm5, %v1731_v33 }
 0x570   : > { %5344 = vmatpush3.bf16.xpose.msra.mxu0 %v1786_v24  ;;  %5345 = vmatprep.mubr.msk.bf16.mxu0 %vm6957_vm3, %v6956_v49 }
 0x571   : > { %v1969_v40 = vpack.c.bf16 %v1968_v34, %v1967_v17  ;;  %5349 = vmatprep.subr.bf16.mxu0 %v6956_v49 }
 0x573   : > { %5364 = vmatmul.mubr.msk.bf16.vlgmr.msra.gmra.mrb[8].mxu1 %vm1708_vm5, %v1969_v40 }
 0x574   : > { %5368 = vmatpush3.bf16.xpose.msra.mxu1 %v2024_v42  ;;  %5369 = vmatprep.mubr.msk.bf16.mxu1 %vm6957_vm3, %v6956_v49 }
 0x575   : > { %5373 = vmatprep.subr.bf16.mxu1 %v6956_v49 }
 0x577   : > { %5346 = vmatmul.mubr.msk.bf16.vlgmr.msra.gmra.mrb[16].mxu0 %vm1660_vm4, %v1778_v43 }
 0x578   : > { %5351 = vmatprep.mubr.msk.bf16.mxu0 %vm6957_vm3, %v6956_v49 }
 0x57b   : > { %5370 = vmatmul.mubr.msk.bf16.vlgmr.msra.gmra.mrb[12].mxu1 %vm1660_vm4, %v2016_v36 }
 0x57c   : > { %5375 = vmatprep.mubr.msk.bf16.mxu1 %vm6957_vm3, %v6956_v49 }
 0x642   : > { %v7765_v44 = vpop.f32.mrb[12].mxu0 }
 0x643   : > { %v5341_v45 = vpop.f32.mrb[13].mxu0 }
 0x644   : > { %v7767_v46 = vpop.f32.mrb[14].mxu0 }
 0x645   : > { %v5342_v47 = vpop.f32.mrb[15].mxu0 }
 0x646   : > { %v7769_v48 = vpop.f32.mrb[8].mxu1 }
 0x647   : > { %v5365_v50 = vpop.f32.mrb[9].mxu1 }
 0x648   : > { %v7771_v51 = vpop.f32.mrb[10].mxu1  ;;  %v5811_v50 = vld [vmem:[%s7792_s27] ss:$8 sps:$4 sm:$0xff]  }
 0x649   : > { %v5366_v54 = vpop.f32.mrb[11].mxu1 }
 0x64a   : > { %v1822_v57 = vpop.f32.mrb[16].mxu0  ;;  %v5813_v54 = vld [vmem:[%s7792_s27 + $0x4] ss:$8 sps:$4 sm:$0xff]  }
 0x64b   : > { %v5347_v58 = vpop.f32.mrb[17].mxu0  ;;  %v1823_v0 = vadd.f32 %v1822_v57, %v7726_v39  ;;  %v5816_v57 = vld [vmem:[%s7792_s27 + $0x14] ss:$8 sps:$4 sm:$0xff]  }
 0x64c   : > { %v1825_v59 = vpop.f32.mrb[18].mxu0  ;;  %v5814_v58 = vld [vmem:[%s7792_s27 + $0x10] ss:$8 sps:$4 sm:$0xff]  }
 0x64d   : > { %v5348_v60 = vpop.f32.mrb[19].mxu0  ;;  %v1826_v5 = vadd.f32 %v1825_v59, %v7728_v41  ;;  %v1829_v6 = vsel %vm1708_vm5, %v1823_v0, -inf  ;;  %v5819_v59 = vld [vmem:[%s7792_s27 + $0x24] ss:$8 sps:$4 sm:$0xff]  }
 0x64e   : > { %v2060_v61 = vpop.f32.mrb[12].mxu1  ;;  %v5817_v60 = vld [vmem:[%s7792_s27 + $0x20] ss:$8 sps:$4 sm:$0xff]  }
 0x64f   : > { %v2061_v62 = vadd.f32 %v2060_v61, %v7726_v39  ;;  %v5371_v49 = vpop.f32.mrb[13].mxu1  ;;  %v1832_v7 = vsel %vm1708_vm5, %v1826_v5, -inf  ;;  %v5822_v61 = vld [vmem:[%s7792_s27 + $0x34] ss:$8 sps:$4 sm:$0xff]  }
 0x650   : > { %v2063_v63 = vpop.f32.mrb[14].mxu1  ;;  %v5825_v49 = vld [vmem:[%s7792_s27 + $0x44] ss:$8 sps:$4 sm:$0xff]  }
 0x651   : > { %v2064_v1 = vadd.f32 %v2063_v63, %v7728_v41  ;;  %v5372_v2 = vpop.f32.mrb[15].mxu1  ;;  %v2067_v3 = vsel %vm1708_vm5, %v2061_v62, -inf  ;;  %v5823_v63 = vld [vmem:[%s7792_s27 + $0x40] ss:$8 sps:$4 sm:$0xff]  }
 0x652   : > { %2068 = vmax.xlane.f32.xlu0 %v2067_v3  ;;  %v5831_v2 = vld [vmem:[%s7792_s27 + $0x64] ss:$8 sps:$4 sm:$0xff]   ;;  %v5829_v3 = vld [vmem:[%s7792_s27 + $0x60] ss:$8 sps:$4 sm:$0xff]  }
 0x653   : > { %v2070_v4 = vsel %vm1708_vm5, %v2064_v1, -inf }
 0x654   : > { %2071 = vmax.xlane.f32.xlu1 %v2070_v4  ;;  %v5834_v4 = vld [vmem:[%s7792_s27 + $0x74] ss:$8 sps:$4 sm:$0xff]  }
 0x656   : > { %1830 = vmax.xlane.f32.xlu0 %v1829_v6  ;;  %v5837_v6 = vld [vmem:[%s7792_s27 + $0x84] ss:$8 sps:$4 sm:$0xff]  }
 0x65a   : > { %1833 = vmax.xlane.f32.xlu0 %v1832_v7  ;;  %v5835_v7 = vld [vmem:[%s7792_s27 + $0x80] ss:$8 sps:$4 sm:$0xff]  }
 0x6df   : > { %v2069_v8 = vpop.xlane.xlu0 %2068 }
 0x6e0   : > { %v2073_v9 = vsub.f32 %v2061_v62, %v2069_v8  ;;  %v5820_v62 = vld [vmem:[%s7792_s27 + $0x30] ss:$8 sps:$4 sm:$0xff]   ;;  %v5840_v8 = vld [vmem:[%s7792_s27 + $0x94] ss:$8 sps:$4 sm:$0xff]  }
 0x6e1   : > { %v2072_v39 = vpop.xlane.xlu1 %2071 }
 0x6e2   : > { %v2075_v10 = vmul.f32 1.442695, %v2073_v9  ;;  %v2074_v16 = vsub.f32 %v2064_v1, %v2072_v39  ;;  %v5826_v1 = vld [vmem:[%s7792_s27 + $0x50] ss:$8 sps:$4 sm:$0xff]   ;;  %v5843_v39 = vld [vmem:[%s7792_s27 + $0xa4] ss:$8 sps:$4 sm:$0xff]  }
 0x6e3   : > { %v1831_v11 = vpop.xlane.xlu0 %1830  ;;  %v5838_v9 = vld [vmem:[%s7792_s27 + $0x90] ss:$8 sps:$4 sm:$0xff]  }
 0x6e4   : > { %v1835_v14 = vsub.f32 %v1823_v0, %v1831_v11  ;;  %v2077_v21 = vmul.f32 1.442695, %v2074_v16  ;;  %v5828_v0 = vld [vmem:[%s7792_s27 + $0x54] ss:$8 sps:$4 sm:$0xff]   ;;  %v5841_v11 = vld [vmem:[%s7792_s27 + $0xa0] ss:$8 sps:$4 sm:$0xff]  }
 0x6e5   : > { %v5849_v16 = vld [vmem:[%s7792_s27 + $0xc4] ss:$8 sps:$4 sm:$0xff]  }
 0x6e6   : > { %v1837_v18 = vmul.f32 1.442695, %v1835_v14  ;;  %v5846_v14 = vld [vmem:[%s7792_s27 + $0xb4] ss:$8 sps:$4 sm:$0xff]  }
 0x6e7   : > { %v1834_v19 = vpop.xlane.xlu0 %1833 }
 0x6e8   : > { %6067 = vpow2.f32 %v1837_v18  ;;  %v1836_v20 = vsub.f32 %v1826_v5, %v1834_v19  ;;  %v5832_v5 = vld [vmem:[%s7792_s27 + $0x70] ss:$8 sps:$4 sm:$0xff]   ;;  %v5847_v18 = vld [vmem:[%s7792_s27 + $0xc0] ss:$8 sps:$4 sm:$0xff]   ;;  %v5852_v19 = vld [vmem:[%s7792_s27 + $0xd4] ss:$8 sps:$4 sm:$0xff]  }
 0x6e9   : > { %6069 = vpow2.f32 %v2075_v10  ;;  %v5844_v10 = vld [vmem:[%s7792_s27 + $0xb0] ss:$8 sps:$4 sm:$0xff]  }
 0x6ea   : > { %v1839_v41 = vmul.f32 1.442695, %v1836_v20  ;;  %v5850_v20 = vld [vmem:[%s7792_s27 + $0xd0] ss:$8 sps:$4 sm:$0xff]  }
 0x6ec   : > { %6071 = vpow2.f32 %v1839_v41  ;;  %v5855_v41 = vld [vmem:[%s7792_s27 + $0xe4] ss:$8 sps:$4 sm:$0xff]  }
 0x6ed   : > { %6073 = vpow2.f32 %v2077_v21  ;;  %v5853_v21 = vld [vmem:[%s7792_s27 + $0xe0] ss:$8 sps:$4 sm:$0xff]  }
 0x6f2   : > { %v6068_v22 = vpop.eup %6067 }
 0x6f3   : > { %v1841_v23 = vsel %vm1708_vm5, %v6068_v22, 0.0  ;;  %v6070_v26 = vpop.eup %6069 }
 0x6f4   : > { %1842 = vadd.xlane.f32.xlu0 %v1841_v23  ;;  %v2079_v13 = vsel %vm1708_vm5, %v6070_v26, 0.0 }
 0x6f6   : > { %v6072_v27 = vpop.eup %6071 }
 0x6f7   : > { %v1844_v28 = vsel %vm1708_vm5, %v6072_v27, 0.0  ;;  %v6074_v29 = vpop.eup %6073 }
 0x6f8   : > { %2080 = vadd.xlane.f32.xlu0 %v2079_v13  ;;  %1845 = vadd.xlane.f32.xlu1 %v1844_v28  ;;  %v2082_v30 = vsel %vm1708_vm5, %v6074_v29, 0.0  ;;  %v5856_v13 = vld [vmem:[%s7792_s27 + $0xf0] ss:$8 sps:$4 sm:$0xff]  }
 0x6fc   : > { %2083 = vadd.xlane.f32.xlu1 %v2082_v30 }
 0x70d   : > { %1853 = vrot.lane.b32.xlu1 %v7718_v37, %s6958_s0 }
 0x70e   : > { %2091 = vrot.lane.b32.xlu0 %v7720_v38, %s6958_s0 }
 0x781   : > { %v1843_v31 = vpop.xlane.xlu0 %1842 }
 0x782   : > { %6075 = vrcp.f32 %v1843_v31 }
 0x785   : > { %v1846_v25 = vpop.xlane.xlu1 %1845  ;;  %v2081_v32 = vpop.xlane.xlu0 %2080 }
 0x786   : > { %6077 = vrcp.f32 %v1846_v25 }
 0x787   : > { %6079 = vrcp.f32 %v2081_v32 }
 0x789   : > { %v2084_v33 = vpop.xlane.xlu1 %2083  ;;  %v2092_v17 = vpop.permute.xlu0 %2091 }
 0x78a   : > { %6081 = vrcp.f32 %v2084_v33  ;;  %5374 = vmatpush3.bf16.msra.mxu1 %v2092_v17 }
 0x78c   : > { %v6076_v24 = vpop.eup %6075 }
 0x78d   : > { %v1854_v34 = vpop.permute.xlu1 %1853  ;;  %v1849_v36 = vmul.f32 %v6076_v24, %v6068_v22 }
 0x78e   : > { %5350 = vmatpush3.bf16.msra.mxu0 %v1854_v34 }
 0x78f   : > { %2369 = vmatprep.subr.bf16.mxu0 %v5813_v54 }
 0x790   : > { %v6078_v35 = vpop.eup %6077 }
 0x791   : > { %v1850_v37 = vmul.f32 %v6078_v35, %v6072_v27  ;;  %v6080_v40 = vpop.eup %6079 }
 0x792   : > { %v2087_v43 = vmul.f32 %v6080_v40, %v6070_v26  ;;  %v5858_v26 = vld [vmem:[%s7792_s27 + $0xf4] ss:$8 sps:$4 sm:$0xff]  }
 0x793   : > { %v1851_v42 = vpack.c.bf16 %v1850_v37, %v1849_v36 }
 0x794   : > { %v6082_v38 = vpop.eup %6081 }
 0x795   : > { %v2088_v45 = vmul.f32 %v6082_v38, %v6074_v29  ;;  %5352 = vmatmul.mubr.msk.bf16.vlgmr.msra.gmra.mrb[20].mxu0 %vm1708_vm5, %v1851_v42 }
 0x796   : > { %2370 = vmatpush1.bf16.msra.mxu0 %v5811_v50 }
 0x797   : > { %v2089_v47 = vpack.c.bf16 %v2088_v45, %v2087_v43  ;;  %2371 = vmatprep.subr.bf16.mxu0 %v5816_v57 }
 0x799   : > { %5376 = vmatmul.mubr.msk.bf16.vlgmr.msra.gmra.mrb[16].mxu1 %vm1708_vm5, %v2089_v47 }
 0x79a   : > { %2372 = vmatpush1.bf16.msra.mxu0 %v5814_v58 }
 0x79b   : > { %2373 = vmatprep.subr.bf16.mxu0 %v5819_v59 }
 0x79e   : > { %2374 = vmatpush1.bf16.msra.mxu0 %v5817_v60 }
 0x79f   : > { %2375 = vmatprep.subr.bf16.mxu0 %v5822_v61 }
 0x7a2   : > { %2376 = vmatpush1.bf16.msra.mxu0 %v5820_v62  ;;  %v6091_v62 = vld [vmem:[#allocation2 + $0x8] sm:$0xff] }
 0x7a3   : > { %2377 = vmatprep.subr.bf16.mxu0 %v5825_v49 }
 0x7a6   : > { %2378 = vmatpush1.bf16.msra.mxu0 %v5823_v63 }
 0x7a7   : > { %2379 = vmatprep.subr.bf16.mxu0 %v5828_v0 }
 0x7aa   : > { %2380 = vmatpush1.bf16.msra.mxu0 %v5826_v1  ;;  %v6092_v1 = vld [vmem:[#allocation2 + $0x18] sm:$0xff] }
 0x7ab   : > { %2381 = vmatprep.subr.bf16.mxu0 %v5831_v2 }
 0x7ae   : > { %2382 = vmatpush1.bf16.msra.mxu0 %v5829_v3 }
 0x7af   : > { %2383 = vmatprep.subr.bf16.mxu0 %v5834_v4  ;;  %v5861_v4 = vld [vmem:[%s7859_s2 + $0x4] ss:$16 sps:$4 sm:$0xff]  }
 0x7b0   : > { %2896 = vmatprep.subr.bf16.mxu1 %v5861_v4  ;;  %v5928_v4 = vld [vmem:[%s7859_s2 + $0x168] ss:$16 sps:$4 sm:$0xff]  }
 0x7b2   : > { %2384 = vmatpush1.bf16.msra.mxu0 %v5832_v5  ;;  %v5862_v5 = vld [vmem:[%s7859_s2 + $0x8] ss:$16 sps:$4 sm:$0xff]  }
 0x7b3   : > { %2385 = vmatprep.subr.bf16.mxu0 %v5837_v6  ;;  %v5864_v6 = vld [vmem:[%s7859_s2 + $0xc] ss:$16 sps:$4 sm:$0xff]  }
 0x7b6   : > { %2386 = vmatpush1.bf16.msra.mxu0 %v5835_v7  ;;  %v5865_v7 = vld [vmem:[%s7859_s2 + $0x20] ss:$16 sps:$4 sm:$0xff]  }
 0x7b7   : > { %2387 = vmatprep.subr.bf16.mxu0 %v5840_v8  ;;  %v5867_v8 = vld [vmem:[%s7859_s2 + $0x24] ss:$16 sps:$4 sm:$0xff]  }
 0x7ba   : > { %2388 = vmatpush1.bf16.msra.mxu0 %v5838_v9  ;;  %v5868_v9 = vld [vmem:[%s7859_s2 + $0x28] ss:$16 sps:$4 sm:$0xff]  }
 0x7bb   : > { %2389 = vmatprep.subr.bf16.mxu0 %v5843_v39  ;;  %v5870_v39 = vld [vmem:[%s7859_s2 + $0x2c] ss:$16 sps:$4 sm:$0xff]  }
 0x7be   : > { %2390 = vmatpush1.bf16.msra.mxu0 %v5841_v11  ;;  %v5873_v11 = vld [vmem:[%s7859_s2 + $0x44] ss:$16 sps:$4 sm:$0xff]  }
 0x7bf   : > { %2391 = vmatprep.subr.bf16.mxu0 %v5846_v14  ;;  %v5871_v14 = vld [vmem:[%s7859_s2 + $0x40] ss:$16 sps:$4 sm:$0xff]  }
 0x7c2   : > { %2392 = vmatpush1.bf16.msra.mxu0 %v5844_v10  ;;  %v5876_v10 = vld [vmem:[%s7859_s2 + $0x4c] ss:$16 sps:$4 sm:$0xff]  }
 0x7c3   : > { %2393 = vmatprep.subr.bf16.mxu0 %v5849_v16  ;;  %v5874_v16 = vld [vmem:[%s7859_s2 + $0x48] ss:$16 sps:$4 sm:$0xff]  }
 0x7c6   : > { %2394 = vmatpush1.bf16.msra.mxu0 %v5847_v18  ;;  %v5879_v18 = vld [vmem:[%s7859_s2 + $0x64] ss:$16 sps:$4 sm:$0xff]  }
 0x7c7   : > { %2395 = vmatprep.subr.bf16.mxu0 %v5852_v19  ;;  %v5882_v19 = vld [vmem:[%s7859_s2 + $0x6c] ss:$16 sps:$4 sm:$0xff]  }
 0x7ca   : > { %2396 = vmatpush1.bf16.msra.mxu0 %v5850_v20  ;;  %v5877_v20 = vld [vmem:[%s7859_s2 + $0x60] ss:$16 sps:$4 sm:$0xff]  }
 0x7cb   : > { %2397 = vmatprep.subr.bf16.mxu0 %v5855_v41  ;;  %v5885_v41 = vld [vmem:[%s7859_s2 + $0x84] ss:$16 sps:$4 sm:$0xff]  }
 0x7ce   : > { %2398 = vmatpush1.bf16.msra.mxu0 %v5853_v21  ;;  %v5880_v21 = vld [vmem:[%s7859_s2 + $0x68] ss:$16 sps:$4 sm:$0xff]  }
 0x7cf   : > { %2399 = vmatprep.subr.bf16.mxu0 %v5858_v26  ;;  %v5886_v26 = vld [vmem:[%s7859_s2 + $0x88] ss:$16 sps:$4 sm:$0xff]  }
 0x7d2   : > { %2400 = vmatpush1.bf16.msra.mxu0 %v5856_v13  ;;  %v5894_v13 = vld [vmem:[%s7859_s2 + $0xac] ss:$16 sps:$4 sm:$0xff]  }
 0x7d3   : > { %2939 = vmatprep.subr.bf16.mxu0 %v5864_v6  ;;  %v5936_v6 = vld [vmem:[%s7859_s2 + $0x18c] ss:$16 sps:$4 sm:$0xff]  }
 0x868   : > { %v1893_v22 = vpop.f32.mrb[20].mxu0 }
 0x869   : > { %v5353_v23 = vpop.f32.mrb[21].mxu0 }
 0x86a   : > { %v1896_v27 = vpop.f32.mrb[22].mxu0  ;;  %v5883_v23 = vld [vmem:[%s7859_s2 + $0x80] ss:$16 sps:$4 sm:$0xff]  }
 0x86b   : > { %v5662_v28 = vpack.i.bf16 %v1896_v27, %v1893_v22  ;;  %v5354_v29 = vpop.f32.mrb[23].mxu0  ;;  %v5888_v22 = vld [vmem:[%s7859_s2 + $0x8c] ss:$16 sps:$4 sm:$0xff]   ;;  %v5891_v27 = vld [vmem:[%s7859_s2 + $0xa4] ss:$16 sps:$4 sm:$0xff]  }
 0x86c   : > { %v2131_v30 = vpop.f32.mrb[16].mxu1  ;;  %v5892_v29 = vld [vmem:[%s7859_s2 + $0xa8] ss:$16 sps:$4 sm:$0xff]  }
 0x86d   : > { %v5377_v31 = vpop.f32.mrb[17].mxu1 }
 0x86e   : > { %v2134_v25 = vpop.f32.mrb[18].mxu1  ;;  %v5895_v31 = vld [vmem:[%s7859_s2 + $0xc0] ss:$16 sps:$4 sm:$0xff]  }
 0x86f   : > { %v5657_v32 = vpack.i.bf16 %v2134_v25, %v2131_v30  ;;  %v5378_v33 = vpop.f32.mrb[19].mxu1  ;;  %v5897_v30 = vld [vmem:[%s7859_s2 + $0xc4] ss:$16 sps:$4 sm:$0xff]   ;;  %v5900_v25 = vld [vmem:[%s7859_s2 + $0xcc] ss:$16 sps:$4 sm:$0xff]  }
 0x870   : > { %v5903_v33 = vld [vmem:[%s7859_s2 + $0xe4] ss:$16 sps:$4 sm:$0xff]  }
 0x871   : > { %5658 = vrot.lane.b32.xlu1 %v5657_v32, %s6958_s0  ;;  %v5898_v32 = vld [vmem:[%s7859_s2 + $0xc8] ss:$16 sps:$4 sm:$0xff]  }
 0x875   : > { %5663 = vrot.lane.b32.xlu1 %v5662_v28, %s6958_s0  ;;  %v5889_v28 = vld [vmem:[%s7859_s2 + $0xa0] ss:$16 sps:$4 sm:$0xff]  }
 0x8e3   : > { %v5659_v17 = vpop.permute.xlu1 %5658 }
 0x8e4   : > { %v5661_v34 = vunpack.i.h.bf16 %v5659_v17  ;;  %v5660_v24 = vunpack.i.l.bf16 %v5659_v17  ;;  %v5906_v17 = vld [vmem:[%s7859_s2 + $0xec] ss:$16 sps:$4 sm:$0xff]  }
 0x8e6   : > { %v2156_v35 = vsel %vm1660_vm4, %v7769_v48, %v5660_v24  ;;  %v2157_v36 = vsel %vm1660_vm4, %v7771_v51, %v5661_v34  ;;  %v2197_v48 = vld [vmem:[%s2196_s17] sm:$0x3]  ;;  %v5904_v24 = vld [vmem:[%s7859_s2 + $0xe8] ss:$16 sps:$4 sm:$0xff]  }
 0x8e7   : > { %v5664_v37 = vpop.permute.xlu1 %5663  ;;  %v2159_v40 = vpack.c.bf16 %v2157_v36, %v2156_v35  ;;  %v2202_v51 = vrot.slane %v2197_v48, %v7689_v53  ;;  %v2206_v50 = vrot.slane %v2197_v48, %v7693_v56  ;;  %v5901_v34 = vld [vmem:[%s7859_s2 + $0xe0] ss:$16 sps:$4 sm:$0xff]   ;;  %v5909_v35 = vld [vmem:[%s7859_s2 + $0x104] ss:$16 sps:$4 sm:$0xff]   ;;  %v5912_v36 = vld [vmem:[%s7859_s2 + $0x10c] ss:$16 sps:$4 sm:$0xff]  }
 0x8e8   : > { %v5666_v42 = vunpack.i.h.bf16 %v5664_v37  ;;  %v5665_v38 = vunpack.i.l.bf16 %v5664_v37  ;;  %v5907_v37 = vld [vmem:[%s7859_s2 + $0x100] ss:$16 sps:$4 sm:$0xff]  }
 0x8e9   : > { %2401 = vmatprep.mubr.bf16.mxu0 %v2159_v40  ;;  %v5910_v40 = vld [vmem:[%s7859_s2 + $0x108] ss:$16 sps:$4 sm:$0xff]  }
 0x8ea   : > { %v2155_v43 = vsel %vm1660_vm4, %v7767_v46, %v5666_v42  ;;  %v2154_v45 = vsel %vm1660_vm4, %v7765_v44, %v5665_v38 }
 0x8eb   : > { %v2158_v47 = vpack.c.bf16 %v2155_v43, %v2154_v45 }
 0x8ed   : > { %2402 = vmatmul.mubr.bf16.vlgmr.msra.gmra.mrb[24].mxu0 %v2158_v47 }
 0x8ee   : > { %2940 = vmatpush1.bf16.msra.mxu0 %v5862_v5  ;;  %v5933_v5 = vld [vmem:[%s7859_s2 + $0x184] ss:$16 sps:$4 sm:$0xff]  }
 0x8ef   : > { %2941 = vmatprep.subr.bf16.mxu0 %v5870_v39  ;;  %v5942_v39 = vld [vmem:[%s7859_s2 + $0x1ac] ss:$16 sps:$4 sm:$0xff]  }
 0x8f2   : > { %2942 = vmatpush1.bf16.msra.mxu0 %v5868_v9  ;;  %v5939_v9 = vld [vmem:[%s7859_s2 + $0x1a4] ss:$16 sps:$4 sm:$0xff]  }
 0x8f3   : > { %2943 = vmatprep.subr.bf16.mxu0 %v5876_v10  ;;  %v5943_v10 = vld [vmem:[%s7859_s2 + $0x1c0] ss:$16 sps:$4 sm:$0xff]  }
 0x8f6   : > { %2944 = vmatpush1.bf16.msra.mxu0 %v5874_v16  ;;  %v5945_v16 = vld [vmem:[%s7859_s2 + $0x1c4] ss:$16 sps:$4 sm:$0xff]  }
 0x8f7   : > { %2945 = vmatprep.subr.bf16.mxu0 %v5882_v19  ;;  %v5948_v19 = vld [vmem:[%s7859_s2 + $0x1cc] ss:$16 sps:$4 sm:$0xff]  }
 0x8fa   : > { %2946 = vmatpush1.bf16.msra.mxu0 %v5880_v21  ;;  %v5954_v21 = vld [vmem:[%s7859_s2 + $0x1ec] ss:$16 sps:$4 sm:$0xff]  }
 0x8fb   : > { %2947 = vmatprep.subr.bf16.mxu0 %v5888_v22  ;;  %v5952_v22 = vld [vmem:[%s7859_s2 + $0x1e8] ss:$16 sps:$4 sm:$0xff]  }
 0x8fe   : > { %2948 = vmatpush1.bf16.msra.mxu0 %v5886_v26 }
 0x8ff   : > { %2949 = vmatprep.subr.bf16.mxu0 %v5894_v13 }
 0x902   : > { %2950 = vmatpush1.bf16.msra.mxu0 %v5892_v29 }
 0x903   : > { %2951 = vmatprep.subr.bf16.mxu0 %v5900_v25 }
 0x906   : > { %2952 = vmatpush1.bf16.msra.mxu0 %v5898_v32 }
 0x907   : > { %2953 = vmatprep.subr.bf16.mxu0 %v5906_v17 }
 0x90a   : > { %2954 = vmatpush1.bf16.msra.mxu0 %v5904_v24 }
 0x90b   : > { %2955 = vmatprep.subr.bf16.mxu0 %v5912_v36 }
 0x90e   : > { %2956 = vmatpush1.bf16.msra.mxu0 %v5910_v40 }
 0x9c0   : > { %v2403_v54 = vpop.f32.mrb[24].mxu0 }
 0x9c1   : > { %v2404_v57 = vadd.f32 %v2403_v54, %v2202_v51  ;;  %v2405_v58 = vpop.f32.mrb[25].mxu0 }
 0x9c2   : > { %v2406_v59 = vadd.f32 %v2405_v58, %v2206_v50  ;;  %v2407_v46 = vpop.f32.mrb[26].mxu0 }
 0x9c3   : > { %v7843_v44 = vadd.f32 %v2404_v57, %v7634_v12  ;;  %v2408_v60 = vadd.f32 %v2407_v46, %v2202_v51  ;;  %v2409_v61 = vpop.f32.mrb[27].mxu0 }
 0x9c4   : > { %v7845_v49 = vadd.f32 %v6091_v62, %v2406_v59  ;;  %v2410_v63 = vadd.f32 %v2409_v61, %v2206_v50  ;;  %v5918_v61 = vld [vmem:[%s7859_s2 + $0x12c] ss:$16 sps:$4 sm:$0xff]   ;;  %v5913_v62 = vld [vmem:[%s7859_s2 + $0x120] ss:$16 sps:$4 sm:$0xff]  }
 0x9c5   : > { %v7848_v0 = vadd.f32 %v2408_v60, %v7637_v15  ;;  %v5859_v15 = vld [vmem:[%s7859_s2] ss:$16 sps:$4 sm:$0xff]   ;;  %v5915_v60 = vld [vmem:[%s7859_s2 + $0x124] ss:$16 sps:$4 sm:$0xff]   ;;  %2957 = vmatprep.subr.bf16.mxu0 %v5918_v61 }
 0x9c6   : > { %v7850_v2 = vadd.f32 %v6092_v1, %v2410_v63  ;;  %v2420_v3 = vadd.f32 %v7845_v49, %v7843_v44  ;;  %2897 = vmatpush1.bf16.msra.mxu1 %v5859_v15  ;;  %v5921_v63 = vld [vmem:[%s7859_s2 + $0x144] ss:$16 sps:$4 sm:$0xff]   ;;  %v5919_v1 = vld [vmem:[%s7859_s2 + $0x140] ss:$16 sps:$4 sm:$0xff]  }
 0x9c7   : > { %2898 = vmatprep.subr.bf16.mxu1 %v5867_v8  ;;  %v5925_v15 = vld [vmem:[%s7859_s2 + $0x160] ss:$16 sps:$4 sm:$0xff]   ;;  %v5934_v8 = vld [vmem:[%s7859_s2 + $0x188] ss:$16 sps:$4 sm:$0xff]  }
 0x9c8   : > { %2421 = vadd.xlane.f32.xlu0 %v2420_v3  ;;  %v2423_v12 = vadd.f32 %v7850_v2, %v7848_v0  ;;  %v5927_v3 = vld [vmem:[%s7859_s2 + $0x164] ss:$16 sps:$4 sm:$0xff]   ;;  %v5961_v61 = vld [vmem:[%s7947_s8 + $0x20] ss:$8 sps:$4 sm:$0xff]  }
 0x9ca   : > { %2424 = vadd.xlane.f32.xlu1 %v2423_v12  ;;  %2899 = vmatpush1.bf16.msra.mxu1 %v5865_v7  ;;  %v5930_v12 = vld [vmem:[%s7859_s2 + $0x16c] ss:$16 sps:$4 sm:$0xff]   ;;  %v5931_v7 = vld [vmem:[%s7859_s2 + $0x180] ss:$16 sps:$4 sm:$0xff]  }
 0x9cb   : > { %2900 = vmatprep.subr.bf16.mxu1 %v5873_v11  ;;  %v5937_v11 = vld [vmem:[%s7859_s2 + $0x1a0] ss:$16 sps:$4 sm:$0xff]  }
 0x9ce   : > { %2901 = vmatpush1.bf16.msra.mxu1 %v5871_v14  ;;  %v5940_v14 = vld [vmem:[%s7859_s2 + $0x1a8] ss:$16 sps:$4 sm:$0xff]  }
 0x9cf   : > { %2902 = vmatprep.subr.bf16.mxu1 %v5879_v18  ;;  %v5946_v18 = vld [vmem:[%s7859_s2 + $0x1c8] ss:$16 sps:$4 sm:$0xff]  }
 0x9d2   : > { %2903 = vmatpush1.bf16.msra.mxu1 %v5877_v20  ;;  %v5951_v20 = vld [vmem:[%s7859_s2 + $0x1e4] ss:$16 sps:$4 sm:$0xff]  }
 0x9d3   : > { %2904 = vmatprep.subr.bf16.mxu1 %v5885_v41  ;;  %v5949_v41 = vld [vmem:[%s7859_s2 + $0x1e0] ss:$16 sps:$4 sm:$0xff]  }
 0x9d6   : > { %2905 = vmatpush1.bf16.msra.mxu1 %v5883_v23  ;;  %v5957_v23 = vld [vmem:[%s7947_s8 + $0x4] ss:$8 sps:$4 sm:$0xff]  }
 0x9d7   : > { %2906 = vmatprep.subr.bf16.mxu1 %v5891_v27 }
 0x9da   : > { %2907 = vmatpush1.bf16.msra.mxu1 %v5889_v28 }
 0x9db   : > { %2908 = vmatprep.subr.bf16.mxu1 %v5897_v30 }
 0x9de   : > { %2909 = vmatpush1.bf16.msra.mxu1 %v5895_v31  ;;  %v2417_v31 = vld [vmem:[%s2416_s22] sm:$0x3] }
 0x9df   : > { %2910 = vmatprep.subr.bf16.mxu1 %v5903_v33  ;;  %v2419_v33 = vld [vmem:[%s2418_s4] sm:$0x3]  ;;  %v2461_v24 = vrot.slane %v2417_v31, %v7693_v56 }
 0x9e0   : > { %v2472_v36 = vrot.slane %v2419_v33, %v7689_v53 }
 0x9e2   : > { %2911 = vmatpush1.bf16.msra.mxu1 %v5901_v34  ;;  %v2457_v34 = vrot.slane %v2417_v31, %v7689_v53 }
 0x9e3   : > { %2912 = vmatprep.subr.bf16.mxu1 %v5909_v35 }
 0x9e6   : > { %2913 = vmatpush1.bf16.msra.mxu1 %v5907_v37  ;;  %v2476_v37 = vrot.slane %v2419_v33, %v7693_v56 }
 0x9e7   : > { %2914 = vmatprep.subr.bf16.mxu1 %v5915_v60  ;;  %v5963_v60 = vld [vmem:[%s7947_s8 + $0x24] ss:$8 sps:$4 sm:$0xff]  }
 0x9ea   : > { %2915 = vmatpush1.bf16.msra.mxu1 %v5913_v62  ;;  %v5966_v62 = vld [vmem:[%s7947_s8 + $0x34] ss:$8 sps:$4 sm:$0xff]  }
 0x9eb   : > { %2916 = vmatprep.subr.bf16.mxu1 %v5921_v63  ;;  %v5969_v63 = vld [vmem:[%s7947_s8 + $0x44] ss:$8 sps:$4 sm:$0xff]  }
 0x9ee   : > { %2917 = vmatpush1.bf16.msra.mxu1 %v5919_v1  ;;  %v5972_v1 = vld [vmem:[%s7947_s8 + $0x54] ss:$8 sps:$4 sm:$0xff]  }
 0x9ef   : > { %2918 = vmatprep.subr.bf16.mxu1 %v5927_v3  ;;  %v5975_v3 = vld [vmem:[%s7947_s8 + $0x64] ss:$8 sps:$4 sm:$0xff]  }
 0x9f2   : > { %2919 = vmatpush1.bf16.msra.mxu1 %v5925_v15  ;;  %v5978_v15 = vld [vmem:[%s7947_s8 + $0x74] ss:$8 sps:$4 sm:$0xff]  }
 0x9f3   : > { %2920 = vmatprep.subr.bf16.mxu1 %v5933_v5  ;;  %v5981_v5 = vld [vmem:[%s7947_s8 + $0x84] ss:$8 sps:$4 sm:$0xff]  }
 0x9f6   : > { %2921 = vmatpush1.bf16.msra.mxu1 %v5931_v7  ;;  %v5984_v7 = vld [vmem:[%s7947_s8 + $0x94] ss:$8 sps:$4 sm:$0xff]  }
 0x9f7   : > { %2922 = vmatprep.subr.bf16.mxu1 %v5939_v9  ;;  %v5987_v9 = vld [vmem:[%s7947_s8 + $0xa4] ss:$8 sps:$4 sm:$0xff]  }
 0x9fa   : > { %2923 = vmatpush1.bf16.msra.mxu1 %v5937_v11  ;;  %v5990_v11 = vld [vmem:[%s7947_s8 + $0xb4] ss:$8 sps:$4 sm:$0xff]  }
 0x9fb   : > { %2924 = vmatprep.subr.bf16.mxu1 %v5945_v16  ;;  %v5991_v16 = vld [vmem:[%s7947_s8 + $0xc0] ss:$8 sps:$4 sm:$0xff]  }
 0x9fe   : > { %2925 = vmatpush1.bf16.msra.mxu1 %v5943_v10  ;;  %v5993_v10 = vld [vmem:[%s7947_s8 + $0xc4] ss:$8 sps:$4 sm:$0xff]  }
 0x9ff   : > { %2926 = vmatprep.subr.bf16.mxu1 %v5951_v20  ;;  %v5999_v20 = vld [vmem:[%s7947_s8 + $0xe4] ss:$8 sps:$4 sm:$0xff]  }
 0xa02   : > { %2927 = vmatpush1.bf16.msra.mxu1 %v5949_v41  ;;  %v6002_v41 = vld [vmem:[%s7947_s8 + $0xf4] ss:$8 sps:$4 sm:$0xff]  }
 0xa03   : > { %3393 = vmatprep.subr.bf16.mxu1 %v5957_v23  ;;  %v6005_v23 = vld [vmem:[%s7947_s8 + $0x104] ss:$8 sps:$4 sm:$0xff]  }
 0xa55   : > { %v2422_v42 = vpop.xlane.xlu0 %2421 }
 0xa56   : > { %v2427_v38 = vmul.f32 0.00390625, %v2422_v42 }
 0xa57   : > { %v2425_v43 = vpop.xlane.xlu1 %2424 }
 0xa58   : > { %v7898_v45 = vsub.f32 %v7843_v44, %v2427_v38  ;;  %v7901_v47 = vsub.f32 %v7845_v49, %v2427_v38  ;;  %v2428_v48 = vmul.f32 0.00390625, %v2425_v43  ;;  %v5916_v49 = vld [vmem:[%s7859_s2 + $0x128] ss:$16 sps:$4 sm:$0xff]  }
 0xa59   : > { %2958 = vmatpush1.bf16.msra.mxu0 %v5916_v49  ;;  %v5964_v49 = vld [vmem:[%s7947_s8 + $0x30] ss:$8 sps:$4 sm:$0xff]  }
 0xa5a   : > { %v7904_v51 = vsub.f32 %v7848_v0, %v2428_v48  ;;  %v7907_v50 = vsub.f32 %v7850_v2, %v2428_v48  ;;  %v2433_v54 = vmul.f32 %v7898_v45, %v7898_v45  ;;  %v2434_v57 = vmul.f32 %v7901_v47, %v7901_v47  ;;  %v5924_v0 = vld [vmem:[%s7859_s2 + $0x14c] ss:$16 sps:$4 sm:$0xff]   ;;  %v5922_v2 = vld [vmem:[%s7859_s2 + $0x148] ss:$16 sps:$4 sm:$0xff]  }
 0xa5b   : > { %2959 = vmatprep.subr.bf16.mxu0 %v5924_v0  ;;  %v5967_v0 = vld [vmem:[%s7947_s8 + $0x40] ss:$8 sps:$4 sm:$0xff]  }
 0xa5c   : > { %v2437_v58 = vadd.f32 %v2434_v57, %v2433_v54  ;;  %v2435_v59 = vmul.f32 %v7904_v51, %v7904_v51  ;;  %v2436_v46 = vmul.f32 %v7907_v50, %v7907_v50 }
 0xa5d   : > { %2960 = vmatpush1.bf16.msra.mxu0 %v5922_v2  ;;  %v5970_v2 = vld [vmem:[%s7947_s8 + $0x50] ss:$8 sps:$4 sm:$0xff]  }
 0xa5e   : > { %2438 = vadd.xlane.f32.xlu0 %v2437_v58  ;;  %v2440_v44 = vadd.f32 %v2436_v46, %v2435_v59  ;;  %2961 = vmatprep.subr.bf16.mxu0 %v5930_v12  ;;  %v5955_v59 = vld [vmem:[%s7947_s8] ss:$8 sps:$4 sm:$0xff]   ;;  %v5960_v46 = vld [vmem:[%s7947_s8 + $0x14] ss:$8 sps:$4 sm:$0xff]  }
 0xa5f   : > { %v5973_v12 = vld [vmem:[%s7947_s8 + $0x60] ss:$8 sps:$4 sm:$0xff]  }
 0xa61   : > { %2962 = vmatpush1.bf16.msra.mxu0 %v5928_v4  ;;  %v5976_v4 = vld [vmem:[%s7947_s8 + $0x70] ss:$8 sps:$4 sm:$0xff]  }
 0xa62   : > { %2441 = vadd.xlane.f32.xlu0 %v2440_v44  ;;  %2963 = vmatprep.subr.bf16.mxu0 %v5936_v6  ;;  %v5958_v44 = vld [vmem:[%s7947_s8 + $0x10] ss:$8 sps:$4 sm:$0xff]   ;;  %v5979_v6 = vld [vmem:[%s7947_s8 + $0x80] ss:$8 sps:$4 sm:$0xff]  }
 0xa65   : > { %2964 = vmatpush1.bf16.msra.mxu0 %v5934_v8  ;;  %v5982_v8 = vld [vmem:[%s7947_s8 + $0x90] ss:$8 sps:$4 sm:$0xff]  }
 0xa66   : > { %2965 = vmatprep.subr.bf16.mxu0 %v5942_v39  ;;  %v5985_v39 = vld [vmem:[%s7947_s8 + $0xa0] ss:$8 sps:$4 sm:$0xff]  }
 0xa69   : > { %2966 = vmatpush1.bf16.msra.mxu0 %v5940_v14  ;;  %v5988_v14 = vld [vmem:[%s7947_s8 + $0xb0] ss:$8 sps:$4 sm:$0xff]  }
 0xa6a   : > { %2967 = vmatprep.subr.bf16.mxu0 %v5948_v19  ;;  %v5994_v19 = vld [vmem:[%s7947_s8 + $0xd0] ss:$8 sps:$4 sm:$0xff]  }
 0xa6d   : > { %2968 = vmatpush1.bf16.msra.mxu0 %v5946_v18  ;;  %v5996_v18 = vld [vmem:[%s7947_s8 + $0xd4] ss:$8 sps:$4 sm:$0xff]  }
 0xa6e   : > { %2969 = vmatprep.subr.bf16.mxu0 %v5954_v21  ;;  %v5997_v21 = vld [vmem:[%s7947_s8 + $0xe0] ss:$8 sps:$4 sm:$0xff]  }
 0xa71   : > { %2970 = vmatpush1.bf16.msra.mxu0 %v5952_v22  ;;  %v6000_v22 = vld [vmem:[%s7947_s8 + $0xf0] ss:$8 sps:$4 sm:$0xff]  }
 0xaeb   : > { %v2439_v26 = vpop.xlane.xlu0 %2438 }
 0xaec   : > { %v2443_v27 = vmul.f32 0.00390625, %v2439_v26  ;;  %v2554_v26 = vld [vmem:[%s2553_s21] sm:$0xf] }
 0xaee   : > { %v2445_v13 = vadd.f32 1e-05, %v2443_v27  ;;  %v2559_v27 = vrot.slane %v2554_v26, %v7689_v53 }
 0xaef   : > { %v2442_v28 = vpop.xlane.xlu0 %2441 }
 0xaf0   : > { %6083 = vrsqrt.f32 %v2445_v13  ;;  %v2444_v29 = vmul.f32 0.00390625, %v2442_v28  ;;  %v2567_v13 = vrot.slane %v2554_v26, %v7687_v52  ;;  %v2563_v28 = vrot.slane %v2554_v26, %v7693_v56 }
 0xaf2   : > { %v2446_v30 = vadd.f32 1e-05, %v2444_v29  ;;  %v2571_v29 = vrot.slane %v2554_v26, %v7691_v55  ;;  %v6041_v26 = vld [vmem:[%s7947_s8 + $0x1c4] ss:$8 sps:$4 sm:$0xff]  }
 0xaf4   : > { %6085 = vrsqrt.f32 %v2446_v30 }
 0xafa   : > { %v6084_v25 = vpop.eup %6083 }
 0xafb   : > { %v2449_v32 = vmul.f32 %v6084_v25, %v7898_v45  ;;  %v2450_v17 = vmul.f32 %v6084_v25, %v7901_v47 }
 0xafd   : > { %v2465_v38 = vmul.f32 %v2461_v24, %v2450_v17  ;;  %v2464_v43 = vmul.f32 %v2457_v34, %v2449_v32 }
 0xafe   : > { %v6086_v35 = vpop.eup %6085 }
 0xaff   : > { %v2451_v40 = vmul.f32 %v6086_v35, %v7904_v51  ;;  %v2452_v42 = vmul.f32 %v6086_v35, %v7907_v50  ;;  %v7960_v48 = vadd.f32 %v2476_v37, %v2465_v38  ;;  %v7964_v57 = vadd.f32 %v2472_v36, %v2464_v43 }
 0xb01   : > { %v2467_v45 = vmul.f32 %v2461_v24, %v2452_v42  ;;  %v2466_v47 = vmul.f32 %v2457_v34, %v2451_v40 }
 0xb03   : > { %v7962_v54 = vadd.f32 %v2476_v37, %v2467_v45  ;;  %v7966_v58 = vadd.f32 %v2472_v36, %v2466_v47 }
 0xb05   : > { %v2484_v51 = vpack.c.bf16 %v7962_v54, %v7960_v48  ;;  %v2483_v50 = vpack.c.bf16 %v7966_v58, %v7964_v57 }
 0xb07   : > { %2928 = vmatprep.mubr.bf16.mxu1 %v2484_v51  ;;  %2971 = vmatprep.mubr.bf16.mxu0 %v2484_v51 }
 0xb08   : > { %2929 = vmatmul.mubr.bf16.vlgmr.msra.gmra.mrb[20].mxu1 %v2483_v50  ;;  %2972 = vmatmul.mubr.bf16.vlgmr.msra.gmra.mrb[28].mxu0 %v2483_v50 }
 0xb09   : > { %3394 = vmatpush1.bf16.msra.mxu1 %v5955_v59 }
 0xb0a   : > { %3395 = vmatprep.subr.bf16.mxu1 %v5960_v46 }
 0xb0d   : > { %3396 = vmatpush1.bf16.msra.mxu1 %v5958_v44 }
 0xb0e   : > { %3397 = vmatprep.subr.bf16.mxu1 %v5963_v60 }
 0xb11   : > { %3398 = vmatpush1.bf16.msra.mxu1 %v5961_v61 }
 0xb12   : > { %3399 = vmatprep.subr.bf16.mxu1 %v5966_v62 }
 0xb15   : > { %3400 = vmatpush1.bf16.msra.mxu1 %v5964_v49 }
 0xb16   : > { %3401 = vmatprep.subr.bf16.mxu1 %v5969_v63 }
 0xb19   : > { %3402 = vmatpush1.bf16.msra.mxu1 %v5967_v0 }
 0xb1a   : > { %3403 = vmatprep.subr.bf16.mxu1 %v5972_v1  ;;  %v6003_v1 = vld [vmem:[%s7947_s8 + $0x100] ss:$8 sps:$4 sm:$0xff]  }
 0xb1d   : > { %3404 = vmatpush1.bf16.msra.mxu1 %v5970_v2  ;;  %v6008_v2 = vld [vmem:[%s7947_s8 + $0x114] ss:$8 sps:$4 sm:$0xff]  }
 0xb1e   : > { %3405 = vmatprep.subr.bf16.mxu1 %v5975_v3  ;;  %v6006_v3 = vld [vmem:[%s7947_s8 + $0x110] ss:$8 sps:$4 sm:$0xff]  }
 0xb21   : > { %3406 = vmatpush1.bf16.msra.mxu1 %v5973_v12  ;;  %v6011_v12 = vld [vmem:[%s7947_s8 + $0x124] ss:$8 sps:$4 sm:$0xff]  }
 0xb22   : > { %3407 = vmatprep.subr.bf16.mxu1 %v5978_v15  ;;  %v6009_v15 = vld [vmem:[%s7947_s8 + $0x120] ss:$8 sps:$4 sm:$0xff]  }
 0xb25   : > { %3408 = vmatpush1.bf16.msra.mxu1 %v5976_v4  ;;  %v6014_v4 = vld [vmem:[%s7947_s8 + $0x134] ss:$8 sps:$4 sm:$0xff]  }
 0xb26   : > { %3409 = vmatprep.subr.bf16.mxu1 %v5981_v5  ;;  %v6012_v5 = vld [vmem:[%s7947_s8 + $0x130] ss:$8 sps:$4 sm:$0xff]  }
 0xb29   : > { %3410 = vmatpush1.bf16.msra.mxu1 %v5979_v6  ;;  %v6017_v6 = vld [vmem:[%s7947_s8 + $0x144] ss:$8 sps:$4 sm:$0xff]  }
 0xb2a   : > { %3411 = vmatprep.subr.bf16.mxu1 %v5984_v7  ;;  %v6015_v7 = vld [vmem:[%s7947_s8 + $0x140] ss:$8 sps:$4 sm:$0xff]  }
 0xb2d   : > { %3412 = vmatpush1.bf16.msra.mxu1 %v5982_v8  ;;  %v6020_v8 = vld [vmem:[%s7947_s8 + $0x154] ss:$8 sps:$4 sm:$0xff]  }
 0xb2e   : > { %3413 = vmatprep.subr.bf16.mxu1 %v5987_v9  ;;  %v6018_v9 = vld [vmem:[%s7947_s8 + $0x150] ss:$8 sps:$4 sm:$0xff]  }
 0xb31   : > { %3414 = vmatpush1.bf16.msra.mxu1 %v5985_v39  ;;  %v6023_v39 = vld [vmem:[%s7947_s8 + $0x164] ss:$8 sps:$4 sm:$0xff]  }
 0xb32   : > { %3415 = vmatprep.subr.bf16.mxu1 %v5990_v11  ;;  %v6021_v11 = vld [vmem:[%s7947_s8 + $0x160] ss:$8 sps:$4 sm:$0xff]  }
 0xb35   : > { %3416 = vmatpush1.bf16.msra.mxu1 %v5988_v14  ;;  %v6026_v14 = vld [vmem:[%s7947_s8 + $0x174] ss:$8 sps:$4 sm:$0xff]  }
 0xb36   : > { %3417 = vmatprep.subr.bf16.mxu1 %v5993_v10  ;;  %v6024_v10 = vld [vmem:[%s7947_s8 + $0x170] ss:$8 sps:$4 sm:$0xff]  }
 0xb39   : > { %3418 = vmatpush1.bf16.msra.mxu1 %v5991_v16  ;;  %v6029_v16 = vld [vmem:[%s7947_s8 + $0x184] ss:$8 sps:$4 sm:$0xff]  }
 0xb3a   : > { %3419 = vmatprep.subr.bf16.mxu1 %v5996_v18  ;;  %v6027_v18 = vld [vmem:[%s7947_s8 + $0x180] ss:$8 sps:$4 sm:$0xff]  }
 0xb3d   : > { %3420 = vmatpush1.bf16.msra.mxu1 %v5994_v19  ;;  %v6032_v19 = vld [vmem:[%s7947_s8 + $0x194] ss:$8 sps:$4 sm:$0xff]  }
 0xb3e   : > { %3421 = vmatprep.subr.bf16.mxu1 %v5999_v20  ;;  %v6030_v20 = vld [vmem:[%s7947_s8 + $0x190] ss:$8 sps:$4 sm:$0xff]  }
 0xb41   : > { %3422 = vmatpush1.bf16.msra.mxu1 %v5997_v21  ;;  %v6035_v21 = vld [vmem:[%s7947_s8 + $0x1a4] ss:$8 sps:$4 sm:$0xff]  }
 0xb42   : > { %3423 = vmatprep.subr.bf16.mxu1 %v6002_v41  ;;  %v6033_v41 = vld [vmem:[%s7947_s8 + $0x1a0] ss:$8 sps:$4 sm:$0xff]  }
 0xb45   : > { %3424 = vmatpush1.bf16.msra.mxu1 %v6000_v22  ;;  %v6038_v22 = vld [vmem:[%s7947_s8 + $0x1b4] ss:$8 sps:$4 sm:$0xff]  }
 0xb46   : > { %3436 = vmatprep.subr.bf16.mxu1 %v6005_v23  ;;  %v6036_v23 = vld [vmem:[%s7947_s8 + $0x1b0] ss:$8 sps:$4 sm:$0xff]  }
 0xbdb   : > { %v2930_v30 = vpop.f32.mrb[20].mxu1  ;;  %v2973_v31 = vpop.f32.mrb[28].mxu0 }
 0xbdc   : > { %v2931_v25 = vadd.f32 %v2930_v30, %v2559_v27  ;;  %v2974_v32 = vadd.f32 %v2973_v31, %v2567_v13  ;;  %v2932_v33 = vpop.f32.mrb[21].mxu1  ;;  %v2975_v17 = vpop.f32.mrb[29].mxu0  ;;  %v6045_v30 = vld [vmem:[%s7947_s8 + $0x1e0] ss:$8 sps:$4 sm:$0xff]   ;;  %v6050_v31 = vld [vmem:[%s7947_s8 + $0x1f4] ss:$8 sps:$4 sm:$0xff]  }
 0xbdd   : > { %v2933_v34 = vadd.f32 %v2932_v33, %v2563_v28  ;;  %v2976_v24 = vadd.f32 %v2975_v17, %v2571_v29  ;;  %v2934_v35 = vpop.f32.mrb[22].mxu1  ;;  %v2977_v36 = vpop.f32.mrb[30].mxu0 }
 0xbde   : > { %v2935_v37 = vadd.f32 %v2934_v35, %v2559_v27  ;;  %v2978_v40 = vadd.f32 %v2977_v36, %v2567_v13  ;;  %v2936_v42 = vpop.f32.mrb[23].mxu1  ;;  %v2979_v38 = vpop.f32.mrb[31].mxu0  ;;  %v2982_v47 = vmax.f32 %v2931_v25, 0.0  ;;  %v2984_v51 = vmax.f32 %v2974_v32, 0.0  ;;  %v6039_v27 = vld [vmem:[%s7947_s8 + $0x1c0] ss:$8 sps:$4 sm:$0xff]  }
 0xbdf   : > { %v2937_v43 = vadd.f32 %v2936_v42, %v2563_v28  ;;  %v2980_v45 = vadd.f32 %v2979_v38, %v2571_v29  ;;  %v2983_v46 = vmax.f32 %v2933_v34, 0.0  ;;  %v2985_v44 = vmax.f32 %v2976_v24, 0.0  ;;  %v6044_v13 = vld [vmem:[%s7947_s8 + $0x1d4] ss:$8 sps:$4 sm:$0xff]   ;;  %v6042_v28 = vld [vmem:[%s7947_s8 + $0x1d0] ss:$8 sps:$4 sm:$0xff]  }
 0xbe0   : > { %v2986_v50 = vmax.f32 %v2935_v37, 0.0  ;;  %v2988_v59 = vmax.f32 %v2978_v40, 0.0  ;;  %v6047_v29 = vld [vmem:[%s7947_s8 + $0x1e4] ss:$8 sps:$4 sm:$0xff]   ;;  %v6048_v25 = vld [vmem:[%s7947_s8 + $0x1f0] ss:$8 sps:$4 sm:$0xff]  }
 0xbe1   : > { %v2987_v60 = vmax.f32 %v2937_v43, 0.0  ;;  %v2989_v61 = vmax.f32 %v2980_v45, 0.0  ;;  %v3061_v32 = vld [vmem:[%s3060_s18] sm:$0x3] }
 0xbe2   : > { %v2990_v62 = vpack.c.bf16 %v2986_v50, %v2982_v47  ;;  %v8009_v49 = vpack.c.bf16 %v2988_v59, %v2984_v51  ;;  %v3066_v33 = vrot.slane %v3061_v32, %v7689_v53  ;;  %v3070_v17 = vrot.slane %v3061_v32, %v7693_v56 }
 0xbe3   : > { %v2991_v63 = vpack.c.bf16 %v2987_v60, %v2983_v46  ;;  %v2993_v0 = vpack.c.bf16 %v2989_v61, %v2985_v44 }
 0xbe5   : > { %3425 = vmatprep.mubr.bf16.mxu1 %v2991_v63 }
 0xbe6   : > { %3426 = vmatmul.mubr.bf16.vlgmr.msra.gmra.mrb[24].mxu1 %v2990_v62 }
 0xbe7   : > { %3437 = vmatpush1.bf16.msra.mxu1 %v6003_v1  ;;  %3468 = vmatprep.mubr.bf16.mxu1 %v2993_v0 }
 0xbe8   : > { %3438 = vmatprep.subr.bf16.mxu1 %v6008_v2 }
 0xbeb   : > { %3439 = vmatpush1.bf16.msra.mxu1 %v6006_v3 }
 0xbec   : > { %3440 = vmatprep.subr.bf16.mxu1 %v6011_v12 }
 0xbef   : > { %3441 = vmatpush1.bf16.msra.mxu1 %v6009_v15 }
 0xbf0   : > { %3442 = vmatprep.subr.bf16.mxu1 %v6014_v4 }
 0xbf3   : > { %3443 = vmatpush1.bf16.msra.mxu1 %v6012_v5 }
 0xbf4   : > { %3444 = vmatprep.subr.bf16.mxu1 %v6017_v6 }
 0xbf7   : > { %3445 = vmatpush1.bf16.msra.mxu1 %v6015_v7 }
 0xbf8   : > { %3446 = vmatprep.subr.bf16.mxu1 %v6020_v8 }
 0xbfb   : > { %3447 = vmatpush1.bf16.msra.mxu1 %v6018_v9 }
 0xbfc   : > { %3448 = vmatprep.subr.bf16.mxu1 %v6023_v39 }
 0xbff   : > { %3449 = vmatpush1.bf16.msra.mxu1 %v6021_v11  ;;  %v3488_v11 = vld [vmem:[%s3487_s1] sm:$0x3] }
 0xc00   : > { %3450 = vmatprep.subr.bf16.mxu1 %v6026_v14  ;;  %v3490_v14 = vld [vmem:[%s3489_s24] sm:$0x3] }
 0xc03   : > { %3451 = vmatpush1.bf16.msra.mxu1 %v6024_v10  ;;  %v3527_v10 = vrot.slane %v3488_v11, %v7689_v53 }
 0xc04   : > { %3452 = vmatprep.subr.bf16.mxu1 %v6029_v16  ;;  %v3531_v16 = vrot.slane %v3488_v11, %v7693_v56  ;;  %v6162_v11 = vld [vmem:[#allocation27 + $0x74] ss:$8 sps:$4 sm:$0xff] (!%p5173_p10)  }
 0xc07   : > { %3453 = vmatpush1.bf16.msra.mxu1 %v6027_v18 }
 0xc08   : > { %3454 = vmatprep.subr.bf16.mxu1 %v6032_v19  ;;  %v3542_v19 = vrot.slane %v3490_v14, %v7689_v53 }
 0xc0b   : > { %3455 = vmatpush1.bf16.msra.mxu1 %v6030_v20  ;;  %v3546_v20 = vrot.slane %v3490_v14, %v7693_v56  ;;  %v6131_v14 = vld [vmem:[#allocation24 + $0xc0] ss:$8 sps:$4 sm:$0xff] (!%p5173_p10)  }
 0xc0c   : > { %3456 = vmatprep.subr.bf16.mxu1 %v6035_v21 }
 0xc0f   : > { %3457 = vmatpush1.bf16.msra.mxu1 %v6033_v41 }
 0xc10   : > { %3458 = vmatprep.subr.bf16.mxu1 %v6038_v22 }
 0xc13   : > { %3459 = vmatpush1.bf16.msra.mxu1 %v6036_v23 }
 0xc14   : > { %3460 = vmatprep.subr.bf16.mxu1 %v6041_v26 }
 0xc17   : > { %3461 = vmatpush1.bf16.msra.mxu1 %v6039_v27 }
 0xc18   : > { %3462 = vmatprep.subr.bf16.mxu1 %v6044_v13 }
 0xc1b   : > { %3463 = vmatpush1.bf16.msra.mxu1 %v6042_v28 }
 0xc1c   : > { %3464 = vmatprep.subr.bf16.mxu1 %v6047_v29 }
 0xc1f   : > { %3465 = vmatpush1.bf16.msra.mxu1 %v6045_v30 }
 0xc20   : > { %3466 = vmatprep.subr.bf16.mxu1 %v6050_v31 }
 0xc23   : > { %3467 = vmatpush1.bf16.msra.mxu1 %v6048_v25 }
 0xc26   : > { %3469 = vmatmul.mubr.bf16.vlgmr.msra.gmra.mrb[24].mxu1 %v8009_v49 }
 0xcf9   : > { %v3470_v34 = vpop.f32.mrb[24].mxu1 }
 0xcfa   : > { %v5379_v24 = vadd.f32 %v3470_v34, %v3066_v33  ;;  %v3472_v35 = vpop.f32.mrb[25].mxu1  ;;  %v6095_v34 = vld [vmem:[#allocation24] ss:$8 sps:$4 sm:$0xff] (!%p5173_p10)  }
 0xcfb   : > { %v5380_v36 = vadd.f32 %v3472_v35, %v3070_v17  ;;  %v3474_v37 = vpop.f32.mrb[26].mxu1  ;;  %v6098_v35 = vld [vmem:[#allocation24 + $0x10] ss:$8 sps:$4 sm:$0xff] (!%p5173_p10)  }
 0xcfc   : > { %v3479_v40 = vmax.f32 %v5379_v24, 0.0  ;;  %v5381_v42 = vadd.f32 %v3474_v37, %v3066_v33  ;;  %v3476_v38 = vpop.f32.mrb[27].mxu1  ;;  %v6093_v33 = vld [vmem:[#allocation24 + $0x4] ss:$8 sps:$4 sm:$0xff] (!%p5173_p10)   ;;  %v6096_v24 = vld [vmem:[#allocation24 + $0x14] ss:$8 sps:$4 sm:$0xff] (!%p5173_p10)  }
 0xcfd   : > { %v3480_v43 = vmax.f32 %v5380_v36, 0.0  ;;  %v5382_v45 = vadd.f32 %v3476_v38, %v3070_v17  ;;  %3767 = vmatprep.subr.bf16.mxu0 (!%p5173_p10), %v6093_v33  ;;  %v6099_v36 = vld [vmem:[#allocation24 + $0x24] ss:$8 sps:$4 sm:$0xff] (!%p5173_p10)   ;;  %v6101_v37 = vld [vmem:[#allocation24 + $0x20] ss:$8 sps:$4 sm:$0xff] (!%p5173_p10)  }
 0xcfe   : > { %v3483_v47 = vadd.f32 %v3479_v40, %v7964_v57  ;;  %v3481_v51 = vmax.f32 %v5381_v42, 0.0  ;;  %3768 = vmatpush1.bf16.msra.mxu0 (!%p5173_p10), %v6095_v34  ;;  %v6102_v40 = vld [vmem:[#allocation24 + $0x34] ss:$8 sps:$4 sm:$0xff] (!%p5173_p10)   ;;  %v6104_v42 = vld [vmem:[#allocation24 + $0x30] ss:$8 sps:$4 sm:$0xff] (!%p5173_p10)  }
 0xcff   : > { %v3484_v50 = vadd.f32 %v3480_v43, %v7960_v48  ;;  %v3482_v59 = vmax.f32 %v5382_v45, 0.0  ;;  %3769 = vmatprep.subr.bf16.mxu0 (!%p5173_p10), %v6096_v24  ;;  %v6105_v38 = vld [vmem:[#allocation24 + $0x44] ss:$8 sps:$4 sm:$0xff] (!%p5173_p10)   ;;  %v6107_v43 = vld [vmem:[#allocation24 + $0x40] ss:$8 sps:$4 sm:$0xff] (!%p5173_p10)  }
 0xd00   : > { %v3485_v46 = vadd.f32 %v3481_v51, %v7966_v58  ;;  %v6108_v45 = vld [vmem:[#allocation24 + $0x54] ss:$8 sps:$4 sm:$0xff] (!%p5173_p10)   ;;  %v6111_v51 = vld [vmem:[#allocation24 + $0x64] ss:$8 sps:$4 sm:$0xff] (!%p5173_p10)  }
 0xd01   : > { %v3486_v44 = vadd.f32 %v3482_v59, %v7962_v54  ;;  %v3491_v60 = vadd.f32 %v3484_v50, %v3483_v47  ;;  %v6143_v59 = vld [vmem:[#allocation27] ss:$8 sps:$4 sm:$0xff] (!%p5173_p10)   ;;  %v6177_v33 = vld [vmem:[#allocation27 + $0xc4] ss:$8 sps:$4 sm:$0xff] (!%p5173_p10)   ;;  %v6180_v34 = vld [vmem:[#allocation27 + $0xd4] ss:$8 sps:$4 sm:$0xff] (!%p5173_p10)  }
 0xd02   : > { %3770 = vmatpush1.bf16.msra.mxu0 (!%p5173_p10), %v6098_v35  ;;  %v6182_v24 = vld [vmem:[#allocation27 + $0xd0] ss:$8 sps:$4 sm:$0xff] (!%p5173_p10)   ;;  %v6183_v35 = vld [vmem:[#allocation27 + $0xe4] ss:$8 sps:$4 sm:$0xff] (!%p5173_p10)  }
 0xd03   : > { %3492 = vadd.xlane.f32.xlu0 %v3491_v60  ;;  %v3494_v61 = vadd.f32 %v3486_v44, %v3485_v46  ;;  %3771 = vmatprep.subr.bf16.mxu0 (!%p5173_p10), %v6099_v36  ;;  %v6114_v60 = vld [vmem:[#allocation24 + $0x74] ss:$8 sps:$4 sm:$0xff] (!%p5173_p10)   ;;  %v6185_v36 = vld [vmem:[#allocation27 + $0xe0] ss:$8 sps:$4 sm:$0xff] (!%p5173_p10)  }
 0xd05   : > { %3495 = vadd.xlane.f32.xlu1 %v3494_v61  ;;  %v6146_v61 = vld [vmem:[#allocation27 + $0x10] ss:$8 sps:$4 sm:$0xff] (!%p5173_p10)  }
 0xd06   : > { %3772 = vmatpush1.bf16.msra.mxu0 (!%p5173_p10), %v6101_v37  ;;  %v6189_v37 = vld [vmem:[#allocation30] ss:$16 sps:$4 sm:$0xff] (!%p5173_p10)  }
 0xd07   : > { %3773 = vmatprep.subr.bf16.mxu0 (!%p5173_p10), %v6102_v40  ;;  %v6191_v40 = vld [vmem:[#allocation30 + $0x4] ss:$16 sps:$4 sm:$0xff] (!%p5173_p10)  }
 0xd0a   : > { %3774 = vmatpush1.bf16.msra.mxu0 (!%p5173_p10), %v6104_v42  ;;  %v6194_v42 = vld [vmem:[#allocation30 + $0xc] ss:$16 sps:$4 sm:$0xff] (!%p5173_p10)  }
 0xd0b   : > { %3775 = vmatprep.subr.bf16.mxu0 (!%p5173_p10), %v6105_v38  ;;  %v6197_v38 = vld [vmem:[#allocation30 + $0x24] ss:$16 sps:$4 sm:$0xff] (!%p5173_p10)  }
 0xd0e   : > { %3776 = vmatpush1.bf16.msra.mxu0 (!%p5173_p10), %v6107_v43  ;;  %v6195_v43 = vld [vmem:[#allocation30 + $0x20] ss:$16 sps:$4 sm:$0xff] (!%p5173_p10)  }
 0xd0f   : > { %3777 = vmatprep.subr.bf16.mxu0 (!%p5173_p10), %v6108_v45  ;;  %v6203_v45 = vld [vmem:[#allocation30 + $0x44] ss:$16 sps:$4 sm:$0xff] (!%p5173_p10)  }
 0xd90   : > { %v3493_v62 = vpop.xlane.xlu0 %3492 }
 0xd91   : > { %v3497_v49 = vmul.f32 0.00390625, %v3493_v62  ;;  %v6147_v62 = vld [vmem:[#allocation27 + $0x24] ss:$8 sps:$4 sm:$0xff] (!%p5173_p10)  }
 0xd92   : > { %v3496_v63 = vpop.xlane.xlu1 %3495 }
 0xd93   : > { %v3499_v0 = vsub.f32 %v3483_v47, %v3497_v49  ;;  %v3500_v1 = vsub.f32 %v3484_v50, %v3497_v49  ;;  %v3498_v2 = vmul.f32 0.00390625, %v3496_v63  ;;  %v6110_v47 = vld [vmem:[#allocation24 + $0x50] ss:$8 sps:$4 sm:$0xff] (!%p5173_p10)   ;;  %v6117_v63 = vld [vmem:[#allocation24 + $0x84] ss:$8 sps:$4 sm:$0xff] (!%p5173_p10)  }
 0xd94   : > { %v6141_v50 = vld [vmem:[#allocation27 + $0x4] ss:$8 sps:$4 sm:$0xff] (!%p5173_p10)   ;;  %3778 = vmatpush1.bf16.msra.mxu0 (!%p5173_p10), %v6110_v47 }
 0xd95   : > { %v3501_v3 = vsub.f32 %v3485_v46, %v3498_v2  ;;  %v3502_v57 = vsub.f32 %v3486_v44, %v3498_v2  ;;  %v3503_v12 = vmul.f32 %v3499_v0, %v3499_v0  ;;  %v3504_v48 = vmul.f32 %v3500_v1, %v3500_v1  ;;  %v6113_v46 = vld [vmem:[#allocation24 + $0x60] ss:$8 sps:$4 sm:$0xff] (!%p5173_p10)   ;;  %3779 = vmatprep.subr.bf16.mxu0 (!%p5173_p10), %v6111_v51  ;;  %v6116_v49 = vld [vmem:[#allocation24 + $0x70] ss:$8 sps:$4 sm:$0xff] (!%p5173_p10)   ;;  %v6201_v47 = vld [vmem:[#allocation30 + $0x40] ss:$16 sps:$4 sm:$0xff] (!%p5173_p10)  }
 0xd96   : > { %v6144_v44 = vld [vmem:[#allocation27 + $0x14] ss:$8 sps:$4 sm:$0xff] (!%p5173_p10)   ;;  %4020 = vmatprep.subr.bf16.mxu1 (!%p5173_p10), %v6141_v50 }
 0xd97   : > { %v3507_v15 = vadd.f32 %v3504_v48, %v3503_v12  ;;  %v3505_v58 = vmul.f32 %v3501_v3, %v3501_v3  ;;  %v3506_v4 = vmul.f32 %v3502_v57, %v3502_v57  ;;  %4021 = vmatpush1.bf16.msra.mxu1 (!%p5173_p10), %v6143_v59  ;;  %v6119_v2 = vld [vmem:[#allocation24 + $0x80] ss:$8 sps:$4 sm:$0xff] (!%p5173_p10)   ;;  %v6122_v48 = vld [vmem:[#allocation24 + $0x90] ss:$8 sps:$4 sm:$0xff] (!%p5173_p10)   ;;  %v6207_v50 = vld [vmem:[#allocation30 + $0x60] ss:$16 sps:$4 sm:$0xff] (!%p5173_p10)  }
 0xd98   : > { %4022 = vmatprep.subr.bf16.mxu1 (!%p5173_p10), %v6144_v44  ;;  %3780 = vmatpush1.bf16.msra.mxu0 (!%p5173_p10), %v6113_v46  ;;  %v6153_v12 = vld [vmem:[#allocation27 + $0x44] ss:$8 sps:$4 sm:$0xff] (!%p5173_p10)  }
 0xd99   : > { %3508 = vadd.xlane.f32.xlu0 %v3507_v15  ;;  %v3510_v54 = vadd.f32 %v3506_v4, %v3505_v58  ;;  %3781 = vmatprep.subr.bf16.mxu0 (!%p5173_p10), %v6114_v60  ;;  %v6123_v15 = vld [vmem:[#allocation24 + $0xa4] ss:$8 sps:$4 sm:$0xff] (!%p5173_p10)   ;;  %v6125_v4 = vld [vmem:[#allocation24 + $0xa0] ss:$8 sps:$4 sm:$0xff] (!%p5173_p10)  }
 0xd9a   : > { %v6155_v58 = vld [vmem:[#allocation27 + $0x40] ss:$8 sps:$4 sm:$0xff] (!%p5173_p10)  }
 0xd9b   : > { %3511 = vadd.xlane.f32.xlu1 %v3510_v54  ;;  %4023 = vmatpush1.bf16.msra.mxu1 (!%p5173_p10), %v6146_v61  ;;  %v6156_v54 = vld [vmem:[#allocation27 + $0x54] ss:$8 sps:$4 sm:$0xff] (!%p5173_p10)  }
 0xd9c   : > { %4024 = vmatprep.subr.bf16.mxu1 (!%p5173_p10), %v6147_v62  ;;  %3782 = vmatpush1.bf16.msra.mxu0 (!%p5173_p10), %v6116_v49  ;;  %v6209_v51 = vld [vmem:[#allocation30 + $0x64] ss:$16 sps:$4 sm:$0xff] (!%p5173_p10)   ;;  %v6213_v46 = vld [vmem:[#allocation30 + $0x80] ss:$16 sps:$4 sm:$0xff] (!%p5173_p10)  }
 0xd9d   : > { %3783 = vmatprep.subr.bf16.mxu0 (!%p5173_p10), %v6117_v63  ;;  %v6215_v59 = vld [vmem:[#allocation30 + $0x84] ss:$16 sps:$4 sm:$0xff] (!%p5173_p10)   ;;  %v6219_v60 = vld [vmem:[#allocation30 + $0xa0] ss:$16 sps:$4 sm:$0xff] (!%p5173_p10)  }
 0xd9e   : > { %v6221_v44 = vld [vmem:[#allocation30 + $0xa4] ss:$16 sps:$4 sm:$0xff] (!%p5173_p10)   ;;  %v6225_v62 = vld [vmem:[#allocation30 + $0xc0] ss:$16 sps:$4 sm:$0xff] (!%p5173_p10)  }
 0xd9f   : > { %v6227_v61 = vld [vmem:[#allocation30 + $0xc4] ss:$16 sps:$4 sm:$0xff] (!%p5173_p10)   ;;  %v6231_v63 = vld [vmem:[#allocation30 + $0xe0] ss:$16 sps:$4 sm:$0xff] (!%p5173_p10)  }
 0xda0   : > { %3784 = vmatpush1.bf16.msra.mxu0 (!%p5173_p10), %v6119_v2  ;;  %v6233_v49 = vld [vmem:[#allocation30 + $0xe4] ss:$16 sps:$4 sm:$0xff] (!%p5173_p10)  }
 0xda1   : > { %v6245_v2 = vld [vmem:[#allocation30 + $0x124] ss:$16 sps:$4 sm:$0xff] (!%p5173_p10)  }
 0xe26   : > { %v3509_v5 = vpop.xlane.xlu0 %3508 }
 0xe27   : > { %v3513_v6 = vmul.f32 0.00390625, %v3509_v5  ;;  %v6126_v5 = vld [vmem:[#allocation24 + $0xb4] ss:$8 sps:$4 sm:$0xff] (!%p5173_p10)  }
 0xe28   : > { %v3512_v7 = vpop.xlane.xlu1 %3511 }
 0xe29   : > { %v3515_v8 = vadd.f32 1e-05, %v3513_v6  ;;  %v3514_v9 = vmul.f32 0.00390625, %v3512_v7  ;;  %v6158_v6 = vld [vmem:[#allocation27 + $0x50] ss:$8 sps:$4 sm:$0xff] (!%p5173_p10)  }
 0xe2a   : > { %v6159_v7 = vld [vmem:[#allocation27 + $0x64] ss:$8 sps:$4 sm:$0xff] (!%p5173_p10)  }
 0xe2b   : > { %6087 = vrsqrt.f32 %v3515_v8  ;;  %v3516_v39 = vadd.f32 1e-05, %v3514_v9  ;;  %v6128_v8 = vld [vmem:[#allocation24 + $0xb0] ss:$8 sps:$4 sm:$0xff] (!%p5173_p10)   ;;  %v6129_v9 = vld [vmem:[#allocation24 + $0xc4] ss:$8 sps:$4 sm:$0xff] (!%p5173_p10)  }
 0xe2d   : > { %6089 = vrsqrt.f32 %v3516_v39  ;;  %v6161_v39 = vld [vmem:[#allocation27 + $0x60] ss:$8 sps:$4 sm:$0xff] (!%p5173_p10)  }
 0xe35   : > { %v6088_v18 = vpop.eup %6087 }
 0xe36   : > { %v3519_v21 = vmul.f32 %v6088_v18, %v3499_v0  ;;  %v3520_v41 = vmul.f32 %v6088_v18, %v3500_v1  ;;  %v6149_v0 = vld [vmem:[#allocation27 + $0x20] ss:$8 sps:$4 sm:$0xff] (!%p5173_p10)   ;;  %v6150_v1 = vld [vmem:[#allocation27 + $0x34] ss:$8 sps:$4 sm:$0xff] (!%p5173_p10)   ;;  %v6165_v18 = vld [vmem:[#allocation27 + $0x84] ss:$8 sps:$4 sm:$0xff] (!%p5173_p10)  }
 0xe37   : > { %v6090_v22 = vpop.eup %6089  ;;  %4025 = vmatpush1.bf16.msra.mxu1 (!%p5173_p10), %v6149_v0  ;;  %v6239_v0 = vld [vmem:[#allocation30 + $0x104] ss:$16 sps:$4 sm:$0xff] (!%p5173_p10)  }
 0xe38   : > { %v3534_v23 = vmul.f32 %v3527_v10, %v3519_v21  ;;  %v3535_v26 = vmul.f32 %v3531_v16, %v3520_v41  ;;  %v3521_v27 = vmul.f32 %v6090_v22, %v3501_v3  ;;  %v3522_v13 = vmul.f32 %v6090_v22, %v3502_v57  ;;  %3560 = sbr.rel (%p5173_p10) target bundleno = 4331 (0x10eb), region = 176  ;;  %v6120_v3 = vld [vmem:[#allocation24 + $0x94] ss:$8 sps:$4 sm:$0xff] (!%p5173_p10)   ;;  %4026 = vmatprep.subr.bf16.mxu1 (!%p5173_p10), %v6150_v1  ;;  %v6167_v21 = vld [vmem:[#allocation27 + $0x80] ss:$8 sps:$4 sm:$0xff] (!%p5173_p10)  }
 0xe39   : > { %v6152_v57 = vld [vmem:[#allocation27 + $0x30] ss:$8 sps:$4 sm:$0xff] (!%p5173_p10)   ;;  %3785 = vmatprep.subr.bf16.mxu0 (!%p5173_p10), %v6120_v3  ;;  %v6168_v41 = vld [vmem:[#allocation27 + $0x94] ss:$8 sps:$4 sm:$0xff] (!%p5173_p10)  }
 0xe3a   : > { %v8056_v28 = vadd.f32 %v3542_v19, %v3534_v23  ;;  %v3550_v29 = vadd.f32 %v3546_v20, %v3535_v26  ;;  %v3536_v30 = vmul.f32 %v3527_v10, %v3521_v27  ;;  %v3537_v31 = vmul.f32 %v3531_v16, %v3522_v13  ;;  %3786 = vmatpush1.bf16.msra.mxu0 (!%p5173_p10), %v6122_v48  ;;  %v6132_v10 = vld [vmem:[#allocation24 + $0xd4] ss:$8 sps:$4 sm:$0xff] (!%p5173_p10)   ;;  %v6137_v22 = vld [vmem:[#allocation24 + $0xe0] ss:$8 sps:$4 sm:$0xff] (!%p5173_p10)   ;;  %v6140_v13 = vld [vmem:[#allocation24 + $0xf0] ss:$8 sps:$4 sm:$0xff] (!%p5173_p10)  }
 0xe3b   : > { %4027 = vmatpush1.bf16.msra.mxu1 (!%p5173_p10), %v6152_v57  ;;  %3787 = vmatprep.subr.bf16.mxu0 (!%p5173_p10), %v6123_v15  ;;  %v6164_v16 = vld [vmem:[#allocation27 + $0x70] ss:$8 sps:$4 sm:$0xff] (!%p5173_p10)   ;;  %v6171_v27 = vld [vmem:[#allocation27 + $0xa4] ss:$8 sps:$4 sm:$0xff] (!%p5173_p10)  }
 0xe3c   : > { %3553 = vst [vmem:[#allocation2] sm:$0xff] %v8056_v28  ;;  %3554 = vst [vmem:[#allocation2 + $0x8] sm:$0xff] %v3550_v29  ;;  %v8059_v25 = vadd.f32 %v3542_v19, %v3536_v30  ;;  %v3552_v32 = vadd.f32 %v3546_v20, %v3537_v31  ;;  %4028 = vmatprep.subr.bf16.mxu1 (!%p5173_p10), %v6153_v12  ;;  %v6134_v19 = vld [vmem:[#allocation24 + $0xd0] ss:$8 sps:$4 sm:$0xff] (!%p5173_p10)   ;;  %v6135_v20 = vld [vmem:[#allocation24 + $0xe4] ss:$8 sps:$4 sm:$0xff] (!%p5173_p10)  }
 0xe3d   : > { %v6138_v23 = vld [vmem:[#allocation24 + $0xf4] ss:$8 sps:$4 sm:$0xff] (!%p5173_p10)   ;;  %v6251_v57 = vld [vmem:[#allocation30 + $0x144] ss:$16 sps:$4 sm:$0xff] (!%p5173_p10)  }
 0xe3e   : > { %3555 = vst [vmem:[#allocation2 + $0x10] sm:$0xff] %v8059_v25  ;;  %3556 = vst [vmem:[#allocation2 + $0x18] sm:$0xff] %v3552_v32  ;;  %v3562_v17 = vpack.c.bf16 (!%p5173_p10), %v3552_v32, %v3550_v29  ;;  %3788 = vmatpush1.bf16.msra.mxu0 (!%p5173_p10), %v6125_v4  ;;  %v6170_v26 = vld [vmem:[#allocation27 + $0x90] ss:$8 sps:$4 sm:$0xff] (!%p5173_p10)   ;;  %v6173_v29 = vld [vmem:[#allocation27 + $0xa0] ss:$8 sps:$4 sm:$0xff] (!%p5173_p10)   ;;  %v3561_v30 = vpack.c.bf16 (!%p5173_p10), %v8059_v25, %v8056_v28 }
 0xe3f   : > { %4029 = vmatpush1.bf16.msra.mxu1 %v6155_v58  ;;  %3789 = vmatprep.subr.bf16.mxu0 %v6126_v5  ;;  %v6174_v31 = vld [vmem:[#allocation27 + $0xb4] ss:$8 sps:$4 sm:$0xff]   ;;  %v6176_v32 = vld [vmem:[#allocation27 + $0xb0] ss:$8 sps:$4 sm:$0xff]  }
 0xe40   : > { %3799 = vmatprep.mubr.bf16.mxu0 %v3562_v17  ;;  %4030 = vmatprep.subr.bf16.mxu1 %v6156_v54  ;;  %v6179_v17 = vld [vmem:[#allocation27 + $0xc0] ss:$8 sps:$4 sm:$0xff]   ;;  %v6186_v28 = vld [vmem:[#allocation27 + $0xf4] ss:$8 sps:$4 sm:$0xff]   ;;  %v6188_v25 = vld [vmem:[#allocation27 + $0xf0] ss:$8 sps:$4 sm:$0xff]  }
 0xe41   : > { %v6237_v1 = vld [vmem:[#allocation30 + $0x100] ss:$16 sps:$4 sm:$0xff]   ;;  %v6257_v48 = vld [vmem:[#allocation30 + $0x164] ss:$16 sps:$4 sm:$0xff]  }
 0xe42   : > { %3790 = vmatpush1.bf16.msra.mxu0 %v6128_v8  ;;  %v6243_v3 = vld [vmem:[#allocation30 + $0x120] ss:$16 sps:$4 sm:$0xff]   ;;  %v6263_v58 = vld [vmem:[#allocation30 + $0x184] ss:$16 sps:$4 sm:$0xff]  }
 0xe43   : > { %4031 = vmatpush1.bf16.msra.mxu1 %v6158_v6  ;;  %3791 = vmatprep.subr.bf16.mxu0 %v6129_v9  ;;  %v6249_v12 = vld [vmem:[#allocation30 + $0x140] ss:$16 sps:$4 sm:$0xff]   ;;  %v6269_v54 = vld [vmem:[#allocation30 + $0x1a4] ss:$16 sps:$4 sm:$0xff]   ;;  %v3595_v6 = vld [vmem:[#allocation25] sm:$0x3] }
 0xe44   : > { %4032 = vmatprep.subr.bf16.mxu1 %v6159_v7  ;;  %v6255_v15 = vld [vmem:[#allocation30 + $0x160] ss:$16 sps:$4 sm:$0xff]   ;;  %v3600_v7 = vrot.slane %v3595_v6, %v7689_v53  ;;  %v3604_v8 = vrot.slane %v3595_v6, %v7693_v56 }
 0xe45   : > { %v6261_v4 = vld [vmem:[#allocation30 + $0x180] ss:$16 sps:$4 sm:$0xff]  }
 0xe46   : > { %3792 = vmatpush1.bf16.msra.mxu0 %v6131_v14  ;;  %v6267_v5 = vld [vmem:[#allocation30 + $0x1a0] ss:$16 sps:$4 sm:$0xff]  }
 0xe47   : > { %4033 = vmatpush1.bf16.msra.mxu1 %v6161_v39  ;;  %3793 = vmatprep.subr.bf16.mxu0 %v6132_v10 }
 0xe48   : > { %4034 = vmatprep.subr.bf16.mxu1 %v6162_v11 }
 0xe4a   : > { %3794 = vmatpush1.bf16.msra.mxu0 %v6134_v19 }
 0xe4b   : > { %4035 = vmatpush1.bf16.msra.mxu1 %v6164_v16  ;;  %3795 = vmatprep.subr.bf16.mxu0 %v6135_v20 }
 0xe4c   : > { %4036 = vmatprep.subr.bf16.mxu1 %v6165_v18 }
 0xe4e   : > { %3796 = vmatpush1.bf16.msra.mxu0 %v6137_v22 }
 0xe4f   : > { %4037 = vmatpush1.bf16.msra.mxu1 %v6167_v21  ;;  %3797 = vmatprep.subr.bf16.mxu0 %v6138_v23 }
 0xe50   : > { %4038 = vmatprep.subr.bf16.mxu1 %v6168_v41 }
 0xe52   : > { %3798 = vmatpush1.bf16.msra.mxu0 %v6140_v13  ;;  %v6200_v13 = vld [vmem:[#allocation30 + $0x2c] ss:$16 sps:$4 sm:$0xff]  }
 0xe53   : > { %4039 = vmatpush1.bf16.msra.mxu1 %v6170_v26  ;;  %4475 = vmatprep.subr.bf16.mxu0 %v6191_v40  ;;  %v6242_v40 = vld [vmem:[#allocation30 + $0x10c] ss:$16 sps:$4 sm:$0xff]  }
 0xe54   : > { %4040 = vmatprep.subr.bf16.mxu1 %v6171_v27  ;;  %v6192_v27 = vld [vmem:[#allocation30 + $0x8] ss:$16 sps:$4 sm:$0xff]  }
 0xe55   : > { %3800 = vmatmul.mubr.bf16.vlgmr.msra.gmra.mrb[0].mxu0 %v3561_v30  ;;  %v6206_v30 = vld [vmem:[#allocation30 + $0x4c] ss:$16 sps:$4 sm:$0xff]  }
 0xe56   : > { %4476 = vmatpush1.bf16.msra.mxu0 %v6189_v37  ;;  %v6234_v37 = vld [vmem:[#allocation30 + $0xe8] ss:$16 sps:$4 sm:$0xff]  }
 0xe57   : > { %4041 = vmatpush1.bf16.msra.mxu1 %v6173_v29  ;;  %4477 = vmatprep.subr.bf16.mxu0 %v6197_v38  ;;  %v6198_v29 = vld [vmem:[#allocation30 + $0x28] ss:$16 sps:$4 sm:$0xff]   ;;  %v6248_v38 = vld [vmem:[#allocation30 + $0x12c] ss:$16 sps:$4 sm:$0xff]  }
 0xe58   : > { %4042 = vmatprep.subr.bf16.mxu1 %v6174_v31  ;;  %v6204_v31 = vld [vmem:[#allocation30 + $0x48] ss:$16 sps:$4 sm:$0xff]  }
 0xe5a   : > { %4478 = vmatpush1.bf16.msra.mxu0 %v6195_v43  ;;  %v6246_v43 = vld [vmem:[#allocation30 + $0x128] ss:$16 sps:$4 sm:$0xff]  }
 0xe5b   : > { %4043 = vmatpush1.bf16.msra.mxu1 %v6176_v32  ;;  %4479 = vmatprep.subr.bf16.mxu0 %v6203_v45  ;;  %v6212_v32 = vld [vmem:[#allocation30 + $0x6c] ss:$16 sps:$4 sm:$0xff]  }
 0xe5c   : > { %4044 = vmatprep.subr.bf16.mxu1 %v6177_v33  ;;  %v6210_v33 = vld [vmem:[#allocation30 + $0x68] ss:$16 sps:$4 sm:$0xff]   ;;  %v6254_v45 = vld [vmem:[#allocation30 + $0x14c] ss:$16 sps:$4 sm:$0xff]  }
 0xe5e   : > { %4480 = vmatpush1.bf16.msra.mxu0 %v6201_v47  ;;  %v6252_v47 = vld [vmem:[#allocation30 + $0x148] ss:$16 sps:$4 sm:$0xff]  }
 0xe5f   : > { %4045 = vmatpush1.bf16.msra.mxu1 %v6179_v17  ;;  %4481 = vmatprep.subr.bf16.mxu0 %v6209_v51  ;;  %v6218_v17 = vld [vmem:[#allocation30 + $0x8c] ss:$16 sps:$4 sm:$0xff]  }
 0xe60   : > { %4046 = vmatprep.subr.bf16.mxu1 %v6180_v34  ;;  %v6216_v34 = vld [vmem:[#allocation30 + $0x88] ss:$16 sps:$4 sm:$0xff]   ;;  %v6260_v51 = vld [vmem:[#allocation30 + $0x16c] ss:$16 sps:$4 sm:$0xff]  }
 0xe62   : > { %4482 = vmatpush1.bf16.msra.mxu0 %v6207_v50  ;;  %v6258_v50 = vld [vmem:[#allocation30 + $0x168] ss:$16 sps:$4 sm:$0xff]  }
 0xe63   : > { %4047 = vmatpush1.bf16.msra.mxu1 %v6182_v24  ;;  %4483 = vmatprep.subr.bf16.mxu0 %v6215_v59  ;;  %v6224_v24 = vld [vmem:[#allocation30 + $0xac] ss:$16 sps:$4 sm:$0xff]  }
 0xe64   : > { %4048 = vmatprep.subr.bf16.mxu1 %v6183_v35  ;;  %v6222_v35 = vld [vmem:[#allocation30 + $0xa8] ss:$16 sps:$4 sm:$0xff]   ;;  %v6266_v59 = vld [vmem:[#allocation30 + $0x18c] ss:$16 sps:$4 sm:$0xff]  }
 0xe66   : > { %4484 = vmatpush1.bf16.msra.mxu0 %v6213_v46  ;;  %v6264_v46 = vld [vmem:[#allocation30 + $0x188] ss:$16 sps:$4 sm:$0xff]  }
 0xe67   : > { %4049 = vmatpush1.bf16.msra.mxu1 %v6185_v36  ;;  %4485 = vmatprep.subr.bf16.mxu0 %v6221_v44  ;;  %v6230_v36 = vld [vmem:[#allocation30 + $0xcc] ss:$16 sps:$4 sm:$0xff]  }
 0xe68   : > { %4050 = vmatprep.subr.bf16.mxu1 %v6186_v28  ;;  %v6228_v28 = vld [vmem:[#allocation30 + $0xc8] ss:$16 sps:$4 sm:$0xff]   ;;  %v6272_v44 = vld [vmem:[#allocation30 + $0x1ac] ss:$16 sps:$4 sm:$0xff]  }
 0xe6a   : > { %4486 = vmatpush1.bf16.msra.mxu0 %v6219_v60  ;;  %v6270_v60 = vld [vmem:[#allocation30 + $0x1a8] ss:$16 sps:$4 sm:$0xff]  }
 0xe6b   : > { %4051 = vmatpush1.bf16.msra.mxu1 %v6188_v25  ;;  %4487 = vmatprep.subr.bf16.mxu0 %v6227_v61  ;;  %v6236_v25 = vld [vmem:[#allocation30 + $0xec] ss:$16 sps:$4 sm:$0xff]   ;;  %v6275_v61 = vld [vmem:[#allocation30 + $0x1c4] ss:$16 sps:$4 sm:$0xff]  }
 0xe6c   : > { %4518 = vmatprep.subr.bf16.mxu1 %v6194_v42  ;;  %v6240_v42 = vld [vmem:[#allocation30 + $0x108] ss:$16 sps:$4 sm:$0xff]  }
 0xe6e   : > { %4488 = vmatpush1.bf16.msra.mxu0 %v6225_v62  ;;  %v6278_v62 = vld [vmem:[#allocation30 + $0x1cc] ss:$16 sps:$4 sm:$0xff]  }
 0xe6f   : > { %4489 = vmatprep.subr.bf16.mxu0 %v6233_v49  ;;  %v6273_v49 = vld [vmem:[#allocation30 + $0x1c0] ss:$16 sps:$4 sm:$0xff]  }
 0xe72   : > { %4490 = vmatpush1.bf16.msra.mxu0 %v6231_v63  ;;  %v6276_v63 = vld [vmem:[#allocation30 + $0x1c8] ss:$16 sps:$4 sm:$0xff]  }
 0xe73   : > { %4491 = vmatprep.subr.bf16.mxu0 %v6239_v0  ;;  %v6281_v0 = vld [vmem:[#allocation30 + $0x1e4] ss:$16 sps:$4 sm:$0xff]  }
 0xe76   : > { %4492 = vmatpush1.bf16.msra.mxu0 %v6237_v1  ;;  %v6284_v1 = vld [vmem:[#allocation30 + $0x1ec] ss:$16 sps:$4 sm:$0xff]  }
 0xe77   : > { %4493 = vmatprep.subr.bf16.mxu0 %v6245_v2  ;;  %v6279_v2 = vld [vmem:[#allocation30 + $0x1e0] ss:$16 sps:$4 sm:$0xff]  }
 0xe7a   : > { %4494 = vmatpush1.bf16.msra.mxu0 %v6243_v3  ;;  %v6282_v3 = vld [vmem:[#allocation30 + $0x1e8] ss:$16 sps:$4 sm:$0xff]  }
 0xe7b   : > { %4495 = vmatprep.subr.bf16.mxu0 %v6251_v57  ;;  %v3848_v57 = vld [vmem:[#allocation28] sm:$0x3] }
 0xe7e   : > { %4496 = vmatpush1.bf16.msra.mxu0 %v6249_v12  ;;  %v3853_v12 = vrot.slane %v3848_v57, %v7689_v53 }
 0xe7f   : > { %4497 = vmatprep.subr.bf16.mxu0 %v6257_v48  ;;  %v3857_v48 = vrot.slane %v3848_v57, %v7693_v56 }
 0xe82   : > { %4498 = vmatpush1.bf16.msra.mxu0 %v6255_v15 }
 0xe83   : > { %4499 = vmatprep.subr.bf16.mxu0 %v6263_v58 }
 0xe86   : > { %4500 = vmatpush1.bf16.msra.mxu0 %v6261_v4 }
 0xe87   : > { %4501 = vmatprep.subr.bf16.mxu0 %v6269_v54 }
 0xe8a   : > { %4502 = vmatpush1.bf16.msra.mxu0 %v6267_v5 }
 0xe8b   : > { %4503 = vmatprep.subr.bf16.mxu0 %v6275_v61 }
 0xe8e   : > { %4504 = vmatpush1.bf16.msra.mxu0 %v6273_v49 }
 0xe8f   : > { %4505 = vmatprep.subr.bf16.mxu0 %v6281_v0 }
 0xe92   : > { %4506 = vmatpush1.bf16.msra.mxu0 %v6279_v2 }
 0xf28   : > { %v3801_v9 = vpop.f32.mrb[0].mxu0 }
 0xf29   : > { %v3802_v39 = vadd.f32 %v3801_v9, %v3600_v7  ;;  %v3803_v11 = vpop.f32.mrb[1].mxu0 }
 0xf2a   : > { %v3804_v14 = vadd.f32 %v3803_v11, %v3604_v8  ;;  %v3805_v10 = vpop.f32.mrb[2].mxu0 }
 0xf2b   : > { %v3806_v16 = vadd.f32 %v3805_v10, %v3600_v7  ;;  %v3807_v18 = vpop.f32.mrb[3].mxu0  ;;  %v3810_v20 = vmax.f32 %v3802_v39, 0.0 }
 0xf2c   : > { %v3808_v19 = vadd.f32 %v3807_v18, %v3604_v8  ;;  %v3811_v41 = vmax.f32 %v3804_v14, 0.0  ;;  %v4133_v18 = vld [vmem:[#allocation31] sm:$0xf] }
 0xf2d   : > { %v3812_v21 = vmax.f32 %v3806_v16, 0.0 }
 0xf2e   : > { %v3813_v22 = vmax.f32 %v3808_v19, 0.0  ;;  %v4138_v19 = vrot.slane %v4133_v18, %v7689_v53 }
 0xf2f   : > { %v3814_v23 = vpack.c.bf16 %v3812_v21, %v3810_v20  ;;  %v4146_v20 = vrot.slane %v4133_v18, %v7687_v52  ;;  %v4142_v21 = vrot.slane %v4133_v18, %v7693_v56 }
 0xf30   : > { %v3815_v26 = vpack.c.bf16 %v3813_v22, %v3811_v41  ;;  %v4150_v41 = vrot.slane %v4133_v18, %v7691_v55 }
 0xf32   : > { %4052 = vmatprep.mubr.bf16.mxu1 %v3815_v26 }
 0xf33   : > { %4053 = vmatmul.mubr.bf16.vlgmr.msra.gmra.mrb[0].mxu1 %v3814_v23 }
 0xf34   : > { %4519 = vmatpush1.bf16.msra.mxu1 %v6192_v27 }
 0xf35   : > { %4520 = vmatprep.subr.bf16.mxu1 %v6200_v13 }
 0xf38   : > { %4521 = vmatpush1.bf16.msra.mxu1 %v6198_v29 }
 0xf39   : > { %4522 = vmatprep.subr.bf16.mxu1 %v6206_v30 }
 0xf3c   : > { %4523 = vmatpush1.bf16.msra.mxu1 %v6204_v31 }
 0xf3d   : > { %4524 = vmatprep.subr.bf16.mxu1 %v6212_v32 }
 0xf40   : > { %4525 = vmatpush1.bf16.msra.mxu1 %v6210_v33 }
 0xf41   : > { %4526 = vmatprep.subr.bf16.mxu1 %v6218_v17 }
 0xf44   : > { %4527 = vmatpush1.bf16.msra.mxu1 %v6216_v34 }
 0xf45   : > { %4528 = vmatprep.subr.bf16.mxu1 %v6224_v24 }
 0xf48   : > { %4529 = vmatpush1.bf16.msra.mxu1 %v6222_v35 }
 0xf49   : > { %4530 = vmatprep.subr.bf16.mxu1 %v6230_v36 }
 0xf4c   : > { %4531 = vmatpush1.bf16.msra.mxu1 %v6228_v28 }
 0xf4d   : > { %4532 = vmatprep.subr.bf16.mxu1 %v6236_v25 }
 0xf50   : > { %4533 = vmatpush1.bf16.msra.mxu1 %v6234_v37 }
 0xf51   : > { %4534 = vmatprep.subr.bf16.mxu1 %v6242_v40 }
 0xf54   : > { %4535 = vmatpush1.bf16.msra.mxu1 %v6240_v42 }
 0xf55   : > { %4536 = vmatprep.subr.bf16.mxu1 %v6248_v38 }
 0xf58   : > { %4537 = vmatpush1.bf16.msra.mxu1 %v6246_v43 }
 0xf59   : > { %4538 = vmatprep.subr.bf16.mxu1 %v6254_v45 }
 0xf5c   : > { %4539 = vmatpush1.bf16.msra.mxu1 %v6252_v47 }
 0xf5d   : > { %4540 = vmatprep.subr.bf16.mxu1 %v6260_v51 }
 0xf60   : > { %4541 = vmatpush1.bf16.msra.mxu1 %v6258_v50 }
 0xf61   : > { %4542 = vmatprep.subr.bf16.mxu1 %v6266_v59 }
 0xf64   : > { %4543 = vmatpush1.bf16.msra.mxu1 %v6264_v46 }
 0xf65   : > { %4544 = vmatprep.subr.bf16.mxu1 %v6272_v44 }
 0xf68   : > { %4545 = vmatpush1.bf16.msra.mxu1 %v6270_v60 }
 0xf69   : > { %4546 = vmatprep.subr.bf16.mxu1 %v6278_v62 }
 0xf6c   : > { %4547 = vmatpush1.bf16.msra.mxu1 %v6276_v63 }
 0xf6d   : > { %4548 = vmatprep.subr.bf16.mxu1 %v6284_v1 }
 0xf70   : > { %4549 = vmatpush1.bf16.msra.mxu1 %v6282_v3 }
0x1006   : > { %v4054_v15 = vpop.f32.mrb[0].mxu1 }
0x1007   : > { %v4055_v58 = vadd.f32 %v4054_v15, %v3853_v12  ;;  %v4056_v4 = vpop.f32.mrb[1].mxu1 }
0x1008   : > { %v4057_v54 = vadd.f32 %v4056_v4, %v3857_v48  ;;  %v4058_v5 = vpop.f32.mrb[2].mxu1 }
0x1009   : > { %v4059_v6 = vadd.f32 %v4058_v5, %v3853_v12  ;;  %v4060_v7 = vpop.f32.mrb[3].mxu1  ;;  %v4063_v9 = vmax.f32 %v4055_v58, 0.0 }
0x100a   : > { %v4061_v8 = vadd.f32 %v4060_v7, %v3857_v48  ;;  %v4064_v11 = vmax.f32 %v4057_v54, 0.0 }
0x100b   : > { %v4065_v39 = vmax.f32 %v4059_v6, 0.0 }
0x100c   : > { %v4066_v14 = vmax.f32 %v4061_v8, 0.0 }
0x100d   : > { %v4067_v10 = vpack.c.bf16 %v4065_v39, %v4063_v9 }
0x100e   : > { %v4068_v16 = vpack.c.bf16 %v4066_v14, %v4064_v11 }
0x1010   : > { %4507 = vmatprep.mubr.bf16.mxu0 %v4068_v16  ;;  %4550 = vmatprep.mubr.bf16.mxu1 %v4068_v16 }
0x1011   : > { %4508 = vmatmul.mubr.bf16.vlgmr.msra.gmra.mrb[4].mxu0 %v4067_v10  ;;  %4551 = vmatmul.mubr.bf16.vlgmr.msra.gmra.mrb[4].mxu1 %v4067_v10 }
0x10e4   : > { %v4509_v22 = vpop.f32.mrb[4].mxu0  ;;  %v4552_v23 = vpop.f32.mrb[4].mxu1 }
0x10e5   : > { %v4510_v26 = vadd.f32 %v4509_v22, %v4138_v19  ;;  %v4553_v27 = vadd.f32 %v4552_v23, %v4146_v20  ;;  %v4511_v13 = vpop.f32.mrb[5].mxu0  ;;  %v4554_v29 = vpop.f32.mrb[5].mxu1 }
0x10e6   : > { %v4512_v30 = vadd.f32 %v4511_v13, %v4142_v21  ;;  %v4555_v31 = vadd.f32 %v4554_v29, %v4150_v41  ;;  %v4513_v53 = vpop.f32.mrb[6].mxu0  ;;  %v4556_v52 = vpop.f32.mrb[6].mxu1 }
0x10e7   : > { %4561 = vst [vmem:[%s7562_s20] sm:$0xff] %v4510_v26  ;;  %4563 = vst [vmem:[%s7562_s20 + $0x10] sm:$0xff] %v4553_v27  ;;  %v4514_v56 = vadd.f32 %v4513_v53, %v4138_v19  ;;  %v4557_v55 = vadd.f32 %v4556_v52, %v4146_v20  ;;  %v4515_v32 = vpop.f32.mrb[7].mxu0  ;;  %v4558_v33 = vpop.f32.mrb[7].mxu1 }
0x10e8   : > { %4562 = vst [vmem:[%s7562_s20 + $0x8] sm:$0xff] %v4512_v30  ;;  %4564 = vst [vmem:[%s7562_s20 + $0x18] sm:$0xff] %v4555_v31  ;;  %v4516_v17 = vadd.f32 %v4515_v32, %v4142_v21  ;;  %v4559_v34 = vadd.f32 %v4558_v33, %v4150_v41 }
0x10e9   : > { %4565 = vst [vmem:[%s7562_s20 + $0x20] sm:$0xff] %v4514_v56  ;;  %4567 = vst [vmem:[%s7562_s20 + $0x30] sm:$0xff] %v4557_v55 }
0x10ea   : > { %4566 = vst [vmem:[%s7562_s20 + $0x28] sm:$0xff] %v4516_v17  ;;  %4568 = vst [vmem:[%s7562_s20 + $0x38] sm:$0xff] %v4559_v34 }
0x10eb PF: > { %s8257_s30 = sld [smem:[#allocation49_spill]]  ;;  %s8259_s23 = sld [smem:[#allocation54_spill]] }
0x10ec   : > { %s8260_s6 = sld [smem:[#allocation70_spill]]  ;;  %s4584_s8 = sshll.u32 %s7562_s20, 4  ;;  %s8088_s8 = int_to_ptr.vmem [resolvable:$true] %s4584_s8 }
0x10ed   : > { %s8092_s22 = scalar_lea.sflag [#allocation6], %s864_s29  ;;  %s6789_s4 = scalar_lea.vmem %s8088_s8, 1024 }
0x10ee   : > { %p6790_p13 = scmp.ne.s32.totalorder %s8088_s8, %s6789_s4  ;;  %s6959_s28 = smov [#allocation33]  }
0x10ef   : > { %s6793_s21 = sshll.u32 %s6959_s28, 4  ;;  %s6794_s21 = int_to_ptr.vmem [resolvable:$false] %s6793_s21 }
0x10f0   : > { %s6795_s18 = scalar_lea.vmem %s6794_s21, 2048  ;;  %p6796_p6 = scmp.lt.s32.totalorder %s8088_s8, %s6794_s21 }
0x10f1   : > { %s5314_s27 = sshll.u32 %s8257_s30, 10  ;;  %p8261_p1 = scmp.ne.s32.totalorder %s8259_s23, 0 }
0x10f2   : > { %s8085_s2 = scalar_lea.hbm %s8260_s6, %s5314_s27  ;;  %p6797_p7 = scmp.lt.s32.totalorder %s6795_s18, %s6789_s4 }
0x10f3   : > { %p6791_p4 = pnand %p6790_p13, %p8261_p1 }
0x10f4   : > { %p6798_p8 = por %p6797_p7, %p6796_p6 }
0x10f5   : > { %p6792_p5 = pneg %p6791_p4 }
0x10f7   : > { %p6799_p11 = pnand %p6798_p8, %p6792_p5 }
0x10f9   : > { %6802 = shalt.err (!%p6799_p11)
}
0x10fa   : > { %s6803_s29 = scalar_lea.hbm %s8085_s2, 1024  ;;  %s6807_s24 = scalar_lea.hbm %s8260_s6, 2048 }
0x10fb   : > { %p6804_p12 = scmp.ne.s32.totalorder %s8085_s2, %s6803_s29  ;;  %p6808_p0 = scmp.lt.u32.totalorder %s8085_s2, %s8260_s6 }
0x10fc   : > { %p6809_p2 = scmp.lt.u32.totalorder %s6807_s24, %s6803_s29  ;;  %p6811_p13 = scmp.lt.u32.totalorder %s6803_s29, %s8085_s2 }
0x10fd   : > { %p6805_p3 = pnand %p6804_p12, %p8261_p1 }
0x10fe   : > { %p6810_p10 = por %p6809_p2, %p6808_p0 }
0x10ff   : > { %p6806_p9 = pneg %p6805_p3 }
0x1100   : > { %p6812_p4 = por %p6811_p13, %p6810_p10 }
0x1102   : > { %p6813_p5 = pnand %p6812_p4, %p6806_p9 }
0x1104   : > { %6816 = shalt.err (!%p6813_p5)
}
0x1105   : > { %s6960_s27 = smov 512   ;;  %s6961_s10 = smov 32  }
0x1106   : > { %5459 = dma.vmem_to_hbm [thread:$0]  (%p8261_p1), %s8088_s8, 1024, %s8085_s2, %s8092_s22, %s6960_s27, %s6960_s27, %s6961_s10  }
0x1107 PF: > { %s8262_s17 = sld [smem:[#allocation52_spill]]  ;;  %s8263_s4 = sld [smem:[#allocation45_spill]] }
0x1108   : > { %s8264_s28 = sld [smem:[#allocation56_spill]] }
0x110d   : > { %p5556_p6 = scmp.ge.s32.totalorder %s8262_s17, 2  ;;  %s4599_s21 = sand.u32 1, %s8263_s4  }
0x110e   : > { %p8265_p7 = scmp.ne.s32.totalorder %s8264_s28, 0  ;;  %s4600_s18 = scalar_lea.sflag [#allocation6], %s4599_s21 }
0x1110   : > { %p5517_p8 = pnand %p5556_p6, %p8265_p7 }
0x1112   : > { %6890 = dma.done.wait (!%p5517_p8), %s4600_s18, 1024  }
0x1113   : > { %6892 = vsyncadd (!%p5517_p8), %s4600_s18, 4294966272  ;;  %s42_s23 = sadd.s32 1, %s8262_s17   ;;  %s8266_s0 = sld [smem:[#allocation46_spill]] }
0x1114   : > { %p39_p11 = scmp.ge.s32.totalorder %s42_s23, 18   ;;  %s8267_s30 = sld [smem:[#allocation47_spill]] }
0x1115   : > { %s8268_s20 = sld [smem:[#allocation59_spill]]  ;;  %s8269_s21 = sld [smem:[#allocation50_spill]] }
0x1116   : > { %s8270_s1 = sld [smem:[#allocation51_spill]]  ;;  %s8271_s22 = sld [smem:[#allocation53_spill]] }
0x1117   : > { %s8272_s2 = sld [smem:[#allocation55_spill]]  ;;  %41 = sbr.rel (!%p39_p11) target bundleno = 27 (0x1b), region = 224 }
0x111e   :  { %4605 = vsyncpa [#allocation5], 1 }
0x111f   :  { %4607 = vsyncpa [#allocation5 + $0x1], 1 }
0x1120   :  { %4608 = vsyncpa [#allocation8], 1 }
0x1121   :  { %4609 = vsyncpa [#allocation11], 1 }
0x1122   :  { %4610 = vsyncpa [#allocation14], 1 }
0x1123   :  { %4611 = vsyncpa [#allocation17], 1 }
0x1124   :  { %4612 = vsyncpa [#allocation20], 1 }
0x1125   :  { %4613 = vsyncpa [#allocation23], 1 }
0x1126   :  { %4614 = vsyncpa [#allocation26], 1 }
0x1127   :  { %4615 = vsyncpa [#allocation29], 1 }
0x1128   :  { %4616 = vsyncpa [#allocation32], 1 }
0x1129   :  { %4617 = vsyncpa [#allocation6], 1 }
0x112a   :  { %4619 = vsyncpa [#allocation6 + $0x1], 1 }

</bundles_post_ra>
